<compile_context>
chip_gen: v5e
topology: v5e:2x2
jax: 0.10.0
libtpu: 0.0.40
codegen_flags: <defaults>
</compile_context>

<pallas_src>
import jax
import jax.numpy as jnp
from jax.experimental import pallas as pl
from jax.experimental.pallas import tpu as pltpu

EPS = 1e-5


# ---------------------------------------------------------------------------
# Fused ResnetBlock kernel (one grid step == one sample)
# ---------------------------------------------------------------------------
def _make_resnet_block_kernel(H, W, C):
    HW = H * W

    def kernel(x_ref, w1_ref, b1_ref, w2_ref, b2_ref, o_ref, pad_ref):
        # x_ref / o_ref : (1, C, HW) f32   -- lane-dense (HW multiple of 128)
        # w*_ref        : (9, C, C) bf16   -- index [kh*3+kw, c_in, c_out]
        # b*_ref        : (1, C)    f32
        # pad_ref       : (H+2, W+2, C) f32 scratch, reused for both convs

        def reflect_pad(src_hwc):
            # ReflectionPad2d(1): padded row 0 <- row 1, padded row H+1 <- row H-2.
            pad_ref[1:H + 1, 1:W + 1, :] = src_hwc
            pad_ref[0:1, 1:W + 1, :] = src_hwc[1:2, :, :]
            pad_ref[H + 1:H + 2, 1:W + 1, :] = src_hwc[H - 2:H - 1, :, :]
            # Columns last: corners come out right because rows are already padded.
            pad_ref[:, 0:1, :] = pad_ref[:, 2:3, :]
            pad_ref[:, W + 1:W + 2, :] = pad_ref[:, W - 1:W, :]

        def conv3x3(w_ref, b_ref):
            # 3x3 conv as 9 shifted (HW, C) @ (C, C) MXU matmuls over pad_ref.
            acc = jnp.zeros((HW, C), jnp.float32)
            for kh in range(3):
                for kw in range(3):
                    win = pad_ref[kh:kh + H, kw:kw + W, :].reshape(HW, C)
                    acc = acc + jnp.dot(win.astype(jnp.bfloat16),
                                        w_ref[kh * 3 + kw],
                                        preferred_element_type=jnp.float32)
            return acc + b_ref[...]                       # (1, C) broadcast

        def instance_norm(y):
            # Per-channel stats over HW (this grid step == one sample),
            # one pass via sum / sum-of-squares.
            s = jnp.sum(y, axis=0, keepdims=True)
            ss = jnp.sum(y * y, axis=0, keepdims=True)
            mean = s * (1.0 / HW)
            var = jnp.maximum(ss * (1.0 / HW) - mean * mean, 0.0)
            return (y - mean) * jax.lax.rsqrt(var + EPS)

        x_hw_c = jnp.transpose(x_ref[0])                  # (HW, C); kept for residual

        reflect_pad(x_hw_c.reshape(H, W, C))
        h = jnp.maximum(instance_norm(conv3x3(w1_ref, b1_ref)), 0.0)   # ReLU
        # TODO(synk): nn.Dropout(0.5) (use_dropout=True path) not implemented;
        # this block is instantiated with use_dropout=False.
        reflect_pad(h.reshape(H, W, C))
        y = instance_norm(conv3x3(w2_ref, b2_ref))

        o_ref[0] = jnp.transpose(x_hw_c + y)              # residual; (C, HW) lane-dense store

    return kernel


# ---------------------------------------------------------------------------
# Host wrapper
# ---------------------------------------------------------------------------
def resnet_block_forward(params, x_nchw):
    """out = x + conv_block(x), matching ResnetBlock.forward."""
    N, C, H, W = x_nchw.shape
    assert H >= 2 and W >= 2, "reflection pad of 1 needs spatial >= 2"
    assert W % 8 == 0 and (H * W) % 128 == 0 and C % 8 == 0, (
        "kernel assumes TPU-friendly shapes (W % 8 == 0, H*W % 128 == 0, C % 8 == 0)")
    HW = H * W

    x_flat = x_nchw.reshape(N, C, HW).astype(jnp.float32)   # free reshape, lane-dense last dim
    # (OC, IC, KH, KW) -> (9, IC, OC) so w[kh*3+kw] is the (C_in, C_out) matrix.
    wm1 = jnp.transpose(params["w1"], (2, 3, 1, 0)).reshape(9, C, C).astype(jnp.bfloat16)
    wm2 = jnp.transpose(params["w2"], (2, 3, 1, 0)).reshape(9, C, C).astype(jnp.bfloat16)
    b1 = params["b1"].reshape(1, C).astype(jnp.float32)
    b2 = params["b2"].reshape(1, C).astype(jnp.float32)

    out_flat = pl.pallas_call(
        _make_resnet_block_kernel(H, W, C),
        out_shape=jax.ShapeDtypeStruct((N, C, HW), jnp.float32),
        grid=(N,),
        in_specs=[
            pl.BlockSpec((1, C, HW), lambda n: (n, 0, 0)),
            pl.BlockSpec((9, C, C), lambda n: (0, 0, 0)),
            pl.BlockSpec((1, C), lambda n: (0, 0)),
            pl.BlockSpec((9, C, C), lambda n: (0, 0, 0)),
            pl.BlockSpec((1, C), lambda n: (0, 0)),
        ],
        out_specs=pl.BlockSpec((1, C, HW), lambda n: (n, 0, 0)),
        scratch_shapes=[pltpu.VMEM((H + 2, W + 2, C), jnp.float32)],
        compiler_params=pltpu.CompilerParams(
            dimension_semantics=("parallel",)),       # one sample per TC (v7x megacore)
    )(x_flat, wm1, b1, wm2, b2)

    return out_flat.reshape(N, C, H, W)


# ---------------------------------------------------------------------------
# Pure-JAX reference (f32) for a correctness check
# ---------------------------------------------------------------------------
def _reference(params, x_nchw):
    def conv3x3(x, w, b):
        xp = jnp.pad(x, ((0, 0), (0, 0), (1, 1), (1, 1)), mode="reflect")
        y = jax.lax.conv_general_dilated(
            xp, w, window_strides=(1, 1), padding="VALID",
            dimension_numbers=("NCHW", "OIHW", "NCHW"),
            preferred_element_type=jnp.float32)
        return y + b[None, :, None, None]

    def instance_norm(y):
        mean = jnp.mean(y, axis=(2, 3), keepdims=True)
        var = jnp.mean(jnp.square(y - mean), axis=(2, 3), keepdims=True)
        return (y - mean) * jax.lax.rsqrt(var + EPS)

    h = jax.nn.relu(instance_norm(conv3x3(x_nchw, params["w1"], params["b1"])))
    y = instance_norm(conv3x3(h, params["w2"], params["b2"]))
    return x_nchw + y


def init_params(key, dim):
    k1, k2, k3, k4 = jax.random.split(key, 4)
    return {
        "w1": 0.05 * jax.random.normal(k1, (dim, dim, 3, 3), jnp.float32),
        "b1": 0.05 * jax.random.normal(k2, (dim,), jnp.float32),
        "w2": 0.05 * jax.random.normal(k3, (dim, dim, 3, 3), jnp.float32),
        "b2": 0.05 * jax.random.normal(k4, (dim,), jnp.float32),
    }


if __name__ == "__main__":
    batch, dim, spatial = 2, 32, 16

    key = jax.random.PRNGKey(0)
    k_x, k_p = jax.random.split(key)
    x = jax.random.normal(k_x, (batch, dim, spatial, spatial), jnp.float32)
    params = init_params(k_p, dim)

    out = jax.block_until_ready(jax.jit(resnet_block_forward)(params, x))

    assert out.shape == (batch, dim, spatial, spatial), out.shape
    assert bool(jnp.all(jnp.isfinite(out)))

    ref = jax.block_until_ready(_reference(params, x))
    err = float(jnp.max(jnp.abs(out - ref)))
    assert err < 5e-2, f"max abs error vs reference: {err}"

    print("KERNEL_OK")
</pallas_src>

<mosaic_0001>
module attributes {stable_mosaic.version = 11 : i64} {
  func.func @kernel(%arg0: i32, %arg1: memref<1x32x256xf32, #tpu.memory_space<vmem>>, %arg2: memref<9x32x32xbf16, #tpu.memory_space<vmem>>, %arg3: memref<1x32xf32, #tpu.memory_space<vmem>>, %arg4: memref<9x32x32xbf16, #tpu.memory_space<vmem>>, %arg5: memref<1x32xf32, #tpu.memory_space<vmem>>, %arg6: memref<1x32x256xf32, #tpu.memory_space<vmem>>, %arg7: memref<18x18x32xf32, #tpu.memory_space<vmem>>) attributes {dimension_semantics = [#tpu.dimension_semantics<parallel>], iteration_bounds = array<i64: 2>, scalar_prefetch = 0 : i64, scratch_operands = 1 : i64, tpu.core_type = #tpu.core_type<tc>, window_params = [{transform_indices = @transform_0, window_bounds = array<i64: 1, 32, 256>}, {pipeline_mode = #tpu.pipeline_mode<synchronous>, transform_indices = @transform_1, window_bounds = array<i64: 9, 32, 32>}, {pipeline_mode = #tpu.pipeline_mode<synchronous>, transform_indices = @transform_2, window_bounds = array<i64: 1, 32>}, {pipeline_mode = #tpu.pipeline_mode<synchronous>, transform_indices = @transform_3, window_bounds = array<i64: 9, 32, 32>}, {pipeline_mode = #tpu.pipeline_mode<synchronous>, transform_indices = @transform_4, window_bounds = array<i64: 1, 32>}, {transform_indices = @transform_5, window_bounds = array<i64: 1, 32, 256>}]} {
    %c0 = arith.constant 0 : index
    %c0_0 = arith.constant 0 : index
    %c0_1 = arith.constant 0 : index
    %0 = vector.load %arg1[%c0, %c0_0, %c0_1] : memref<1x32x256xf32, #tpu.memory_space<vmem>>, vector<1x32x256xf32>
    %1 = vector.shape_cast %0 : vector<1x32x256xf32> to vector<32x256xf32>
    %2 = tpu.transpose %1, [1, 0] : vector<32x256xf32> -> vector<256x32xf32>
    %3 = vector.shape_cast %2 : vector<256x32xf32> to vector<16x16x32xf32>
    %c1 = arith.constant 1 : index
    %c1_2 = arith.constant 1 : index
    %c0_3 = arith.constant 0 : index
    %4 = vector.load %arg7[%c1, %c1_2, %c0_3] : memref<18x18x32xf32, #tpu.memory_space<vmem>>, vector<16x16x32xf32>
    tpu.vector_store %arg7[%c1, %c1_2, %c0_3], %3 {strides = array<i32>} : memref<18x18x32xf32, #tpu.memory_space<vmem>>, vector<16x16x32xf32>,
    %5 = vector.extract_strided_slice %3 {offsets = [1, 0, 0], sizes = [1, 16, 32], strides = [1, 1, 1]} : vector<16x16x32xf32> to vector<1x16x32xf32>
    %c0_4 = arith.constant 0 : index
    %c1_5 = arith.constant 1 : index
    %c0_6 = arith.constant 0 : index
    %6 = vector.load %arg7[%c0_4, %c1_5, %c0_6] : memref<18x18x32xf32, #tpu.memory_space<vmem>>, vector<1x16x32xf32>
    tpu.vector_store %arg7[%c0_4, %c1_5, %c0_6], %5 {strides = array<i32>} : memref<18x18x32xf32, #tpu.memory_space<vmem>>, vector<1x16x32xf32>,
    %7 = vector.extract_strided_slice %3 {offsets = [14, 0, 0], sizes = [1, 16, 32], strides = [1, 1, 1]} : vector<16x16x32xf32> to vector<1x16x32xf32>
    %c17 = arith.constant 17 : index
    %c1_7 = arith.constant 1 : index
    %c0_8 = arith.constant 0 : index
    %8 = vector.load %arg7[%c17, %c1_7, %c0_8] : memref<18x18x32xf32, #tpu.memory_space<vmem>>, vector<1x16x32xf32>
    tpu.vector_store %arg7[%c17, %c1_7, %c0_8], %7 {strides = array<i32>} : memref<18x18x32xf32, #tpu.memory_space<vmem>>, vector<1x16x32xf32>,
    %c0_9 = arith.constant 0 : index
    %c2 = arith.constant 2 : index
    %c0_10 = arith.constant 0 : index
    %9 = vector.load %arg7[%c0_9, %c2, %c0_10] : memref<18x18x32xf32, #tpu.memory_space<vmem>>, vector<18x1x32xf32>
    %c0_11 = arith.constant 0 : index
    %c0_12 = arith.constant 0 : index
    %c0_13 = arith.constant 0 : index
    %10 = vector.load %arg7[%c0_11, %c0_12, %c0_13] : memref<18x18x32xf32, #tpu.memory_space<vmem>>, vector<18x1x32xf32>
    tpu.vector_store %arg7[%c0_11, %c0_12, %c0_13], %9 {strides = array<i32>} : memref<18x18x32xf32, #tpu.memory_space<vmem>>, vector<18x1x32xf32>,
    %c0_14 = arith.constant 0 : index
    %c15 = arith.constant 15 : index
    %c0_15 = arith.constant 0 : index
    %11 = vector.load %arg7[%c0_14, %c15, %c0_15] : memref<18x18x32xf32, #tpu.memory_space<vmem>>, vector<18x1x32xf32>
    %c0_16 = arith.constant 0 : index
    %c17_17 = arith.constant 17 : index
    %c0_18 = arith.constant 0 : index
    %12 = vector.load %arg7[%c0_16, %c17_17, %c0_18] : memref<18x18x32xf32, #tpu.memory_space<vmem>>, vector<18x1x32xf32>
    tpu.vector_store %arg7[%c0_16, %c17_17, %c0_18], %11 {strides = array<i32>} : memref<18x18x32xf32, #tpu.memory_space<vmem>>, vector<18x1x32xf32>,
    %cst = arith.constant 0.000000e+00 : f32
    %13 = vector.broadcast %cst : f32 to vector<256x32xf32>
    %c0_19 = arith.constant 0 : index
    %c0_20 = arith.constant 0 : index
    %c0_21 = arith.constant 0 : index
    %14 = vector.load %arg7[%c0_19, %c0_20, %c0_21] : memref<18x18x32xf32, #tpu.memory_space<vmem>>, vector<16x16x32xf32>
    %15 = vector.shape_cast %14 : vector<16x16x32xf32> to vector<256x32xf32>
    %16 = arith.truncf %15 : vector<256x32xf32> to vector<256x32xbf16>
    %c0_22 = arith.constant 0 : index
    %c0_23 = arith.constant 0 : index
    %c0_24 = arith.constant 0 : index
    %17 = vector.load %arg2[%c0_22, %c0_23, %c0_24] : memref<9x32x32xbf16, #tpu.memory_space<vmem>>, vector<1x32x32xbf16>
    %18 = vector.shape_cast %17 : vector<1x32x32xbf16> to vector<32x32xbf16>
    %cst_25 = arith.constant dense<0.000000e+00> : vector<256x32xf32>
    %19 = tpu.matmul %16, %18, %cst_25 {dimension_numbers = #tpu.dot_dimension_numbers<[1], [0], [0], [1], [0, 0, 1, 1], [], []>} : vector<256x32xbf16>, vector<32x32xbf16>, vector<256x32xf32> -> vector<256x32xf32>
    %20 = arith.addf %13, %19 : vector<256x32xf32>
    %c0_26 = arith.constant 0 : index
    %c1_27 = arith.constant 1 : index
    %c0_28 = arith.constant 0 : index
    %21 = vector.load %arg7[%c0_26, %c1_27, %c0_28] : memref<18x18x32xf32, #tpu.memory_space<vmem>>, vector<16x16x32xf32>
    %22 = vector.shape_cast %21 : vector<16x16x32xf32> to vector<256x32xf32>
    %23 = arith.truncf %22 : vector<256x32xf32> to vector<256x32xbf16>
    %c1_29 = arith.constant 1 : index
    %c0_30 = arith.constant 0 : index
    %c0_31 = arith.constant 0 : index
    %24 = vector.load %arg2[%c1_29, %c0_30, %c0_31] : memref<9x32x32xbf16, #tpu.memory_space<vmem>>, vector<1x32x32xbf16>
    %25 = vector.shape_cast %24 : vector<1x32x32xbf16> to vector<32x32xbf16>
    %cst_32 = arith.constant dense<0.000000e+00> : vector<256x32xf32>
    %26 = tpu.matmul %23, %25, %cst_32 {dimension_numbers = #tpu.dot_dimension_numbers<[1], [0], [0], [1], [0, 0, 1, 1], [], []>} : vector<256x32xbf16>, vector<32x32xbf16>, vector<256x32xf32> -> vector<256x32xf32>
    %27 = arith.addf %20, %26 : vector<256x32xf32>
    %c0_33 = arith.constant 0 : index
    %c2_34 = arith.constant 2 : index
    %c0_35 = arith.constant 0 : index
    %28 = vector.load %arg7[%c0_33, %c2_34, %c0_35] : memref<18x18x32xf32, #tpu.memory_space<vmem>>, vector<16x16x32xf32>
    %29 = vector.shape_cast %28 : vector<16x16x32xf32> to vector<256x32xf32>
    %30 = arith.truncf %29 : vector<256x32xf32> to vector<256x32xbf16>
    %c2_36 = arith.constant 2 : index
    %c0_37 = arith.constant 0 : index
    %c0_38 = arith.constant 0 : index
    %31 = vector.load %arg2[%c2_36, %c0_37, %c0_38] : memref<9x32x32xbf16, #tpu.memory_space<vmem>>, vector<1x32x32xbf16>
    %32 = vector.shape_cast %31 : vector<1x32x32xbf16> to vector<32x32xbf16>
    %cst_39 = arith.constant dense<0.000000e+00> : vector<256x32xf32>
    %33 = tpu.matmul %30, %32, %cst_39 {dimension_numbers = #tpu.dot_dimension_numbers<[1], [0], [0], [1], [0, 0, 1, 1], [], []>} : vector<256x32xbf16>, vector<32x32xbf16>, vector<256x32xf32> -> vector<256x32xf32>
    %34 = arith.addf %27, %33 : vector<256x32xf32>
    %c1_40 = arith.constant 1 : index
    %c0_41 = arith.constant 0 : index
    %c0_42 = arith.constant 0 : index
    %35 = vector.load %arg7[%c1_40, %c0_41, %c0_42] : memref<18x18x32xf32, #tpu.memory_space<vmem>>, vector<16x16x32xf32>
    %36 = vector.shape_cast %35 : vector<16x16x32xf32> to vector<256x32xf32>
    %37 = arith.truncf %36 : vector<256x32xf32> to vector<256x32xbf16>
    %c3 = arith.constant 3 : index
    %c0_43 = arith.constant 0 : index
    %c0_44 = arith.constant 0 : index
    %38 = vector.load %arg2[%c3, %c0_43, %c0_44] : memref<9x32x32xbf16, #tpu.memory_space<vmem>>, vector<1x32x32xbf16>
    %39 = vector.shape_cast %38 : vector<1x32x32xbf16> to vector<32x32xbf16>
    %cst_45 = arith.constant dense<0.000000e+00> : vector<256x32xf32>
    %40 = tpu.matmul %37, %39, %cst_45 {dimension_numbers = #tpu.dot_dimension_numbers<[1], [0], [0], [1], [0, 0, 1, 1], [], []>} : vector<256x32xbf16>, vector<32x32xbf16>, vector<256x32xf32> -> vector<256x32xf32>
    %41 = arith.addf %34, %40 : vector<256x32xf32>
    %c1_46 = arith.constant 1 : index
    %c1_47 = arith.constant 1 : index
    %c0_48 = arith.constant 0 : index
    %42 = vector.load %arg7[%c1_46, %c1_47, %c0_48] : memref<18x18x32xf32, #tpu.memory_space<vmem>>, vector<16x16x32xf32>
    %43 = vector.shape_cast %42 : vector<16x16x32xf32> to vector<256x32xf32>
    %44 = arith.truncf %43 : vector<256x32xf32> to vector<256x32xbf16>
    %c4 = arith.constant 4 : index
    %c0_49 = arith.constant 0 : index
    %c0_50 = arith.constant 0 : index
    %45 = vector.load %arg2[%c4, %c0_49, %c0_50] : memref<9x32x32xbf16, #tpu.memory_space<vmem>>, vector<1x32x32xbf16>
    %46 = vector.shape_cast %45 : vector<1x32x32xbf16> to vector<32x32xbf16>
    %cst_51 = arith.constant dense<0.000000e+00> : vector<256x32xf32>
    %47 = tpu.matmul %44, %46, %cst_51 {dimension_numbers = #tpu.dot_dimension_numbers<[1], [0], [0], [1], [0, 0, 1, 1], [], []>} : vector<256x32xbf16>, vector<32x32xbf16>, vector<256x32xf32> -> vector<256x32xf32>
    %48 = arith.addf %41, %47 : vector<256x32xf32>
    %c1_52 = arith.constant 1 : index
    %c2_53 = arith.constant 2 : index
    %c0_54 = arith.constant 0 : index
    %49 = vector.load %arg7[%c1_52, %c2_53, %c0_54] : memref<18x18x32xf32, #tpu.memory_space<vmem>>, vector<16x16x32xf32>
    %50 = vector.shape_cast %49 : vector<16x16x32xf32> to vector<256x32xf32>
    %51 = arith.truncf %50 : vector<256x32xf32> to vector<256x32xbf16>
    %c5 = arith.constant 5 : index
    %c0_55 = arith.constant 0 : index
    %c0_56 = arith.constant 0 : index
    %52 = vector.load %arg2[%c5, %c0_55, %c0_56] : memref<9x32x32xbf16, #tpu.memory_space<vmem>>, vector<1x32x32xbf16>
    %53 = vector.shape_cast %52 : vector<1x32x32xbf16> to vector<32x32xbf16>
    %cst_57 = arith.constant dense<0.000000e+00> : vector<256x32xf32>
    %54 = tpu.matmul %51, %53, %cst_57 {dimension_numbers = #tpu.dot_dimension_numbers<[1], [0], [0], [1], [0, 0, 1, 1], [], []>} : vector<256x32xbf16>, vector<32x32xbf16>, vector<256x32xf32> -> vector<256x32xf32>
    %55 = arith.addf %48, %54 : vector<256x32xf32>
    %c2_58 = arith.constant 2 : index
    %c0_59 = arith.constant 0 : index
    %c0_60 = arith.constant 0 : index
    %56 = vector.load %arg7[%c2_58, %c0_59, %c0_60] : memref<18x18x32xf32, #tpu.memory_space<vmem>>, vector<16x16x32xf32>
    %57 = vector.shape_cast %56 : vector<16x16x32xf32> to vector<256x32xf32>
    %58 = arith.truncf %57 : vector<256x32xf32> to vector<256x32xbf16>
    %c6 = arith.constant 6 : index
    %c0_61 = arith.constant 0 : index
    %c0_62 = arith.constant 0 : index
    %59 = vector.load %arg2[%c6, %c0_61, %c0_62] : memref<9x32x32xbf16, #tpu.memory_space<vmem>>, vector<1x32x32xbf16>
    %60 = vector.shape_cast %59 : vector<1x32x32xbf16> to vector<32x32xbf16>
    %cst_63 = arith.constant dense<0.000000e+00> : vector<256x32xf32>
    %61 = tpu.matmul %58, %60, %cst_63 {dimension_numbers = #tpu.dot_dimension_numbers<[1], [0], [0], [1], [0, 0, 1, 1], [], []>} : vector<256x32xbf16>, vector<32x32xbf16>, vector<256x32xf32> -> vector<256x32xf32>
    %62 = arith.addf %55, %61 : vector<256x32xf32>
    %c2_64 = arith.constant 2 : index
    %c1_65 = arith.constant 1 : index
    %c0_66 = arith.constant 0 : index
    %63 = vector.load %arg7[%c2_64, %c1_65, %c0_66] : memref<18x18x32xf32, #tpu.memory_space<vmem>>, vector<16x16x32xf32>
    %64 = vector.shape_cast %63 : vector<16x16x32xf32> to vector<256x32xf32>
    %65 = arith.truncf %64 : vector<256x32xf32> to vector<256x32xbf16>
    %c7 = arith.constant 7 : index
    %c0_67 = arith.constant 0 : index
    %c0_68 = arith.constant 0 : index
    %66 = vector.load %arg2[%c7, %c0_67, %c0_68] : memref<9x32x32xbf16, #tpu.memory_space<vmem>>, vector<1x32x32xbf16>
    %67 = vector.shape_cast %66 : vector<1x32x32xbf16> to vector<32x32xbf16>
    %cst_69 = arith.constant dense<0.000000e+00> : vector<256x32xf32>
    %68 = tpu.matmul %65, %67, %cst_69 {dimension_numbers = #tpu.dot_dimension_numbers<[1], [0], [0], [1], [0, 0, 1, 1], [], []>} : vector<256x32xbf16>, vector<32x32xbf16>, vector<256x32xf32> -> vector<256x32xf32>
    %69 = arith.addf %62, %68 : vector<256x32xf32>
    %c2_70 = arith.constant 2 : index
    %c2_71 = arith.constant 2 : index
    %c0_72 = arith.constant 0 : index
    %70 = vector.load %arg7[%c2_70, %c2_71, %c0_72] : memref<18x18x32xf32, #tpu.memory_space<vmem>>, vector<16x16x32xf32>
    %71 = vector.shape_cast %70 : vector<16x16x32xf32> to vector<256x32xf32>
    %72 = arith.truncf %71 : vector<256x32xf32> to vector<256x32xbf16>
    %c8 = arith.constant 8 : index
    %c0_73 = arith.constant 0 : index
    %c0_74 = arith.constant 0 : index
    %73 = vector.load %arg2[%c8, %c0_73, %c0_74] : memref<9x32x32xbf16, #tpu.memory_space<vmem>>, vector<1x32x32xbf16>
    %74 = vector.shape_cast %73 : vector<1x32x32xbf16> to vector<32x32xbf16>
    %cst_75 = arith.constant dense<0.000000e+00> : vector<256x32xf32>
    %75 = tpu.matmul %72, %74, %cst_75 {dimension_numbers = #tpu.dot_dimension_numbers<[1], [0], [0], [1], [0, 0, 1, 1], [], []>} : vector<256x32xbf16>, vector<32x32xbf16>, vector<256x32xf32> -> vector<256x32xf32>
    %76 = arith.addf %69, %75 : vector<256x32xf32>
    %c0_76 = arith.constant 0 : index
    %c0_77 = arith.constant 0 : index
    %77 = vector.load %arg3[%c0_76, %c0_77] : memref<1x32xf32, #tpu.memory_space<vmem>>, vector<1x32xf32>
    %78 = vector.broadcast %77 : vector<1x32xf32> to vector<256x32xf32>
    %79 = arith.addf %76, %78 : vector<256x32xf32>
    %cst_78 = arith.constant dense<0.000000e+00> : vector<32xf32>
    %80 = vector.multi_reduction <add>, %79, %cst_78 [0] : vector<256x32xf32> to vector<32xf32>
    %81 = vector.shape_cast %80 : vector<32xf32> to vector<1x32xf32>
    %82 = arith.mulf %79, %79 : vector<256x32xf32>
    %cst_79 = arith.constant dense<0.000000e+00> : vector<32xf32>
    %83 = vector.multi_reduction <add>, %82, %cst_79 [0] : vector<256x32xf32> to vector<32xf32>
    %84 = vector.shape_cast %83 : vector<32xf32> to vector<1x32xf32>
    %cst_80 = arith.constant 3.906250e-03 : f32
    %85 = vector.broadcast %cst_80 : f32 to vector<1x32xf32>
    %86 = arith.mulf %81, %85 : vector<1x32xf32>
    %cst_81 = arith.constant 3.906250e-03 : f32
    %87 = vector.broadcast %cst_81 : f32 to vector<1x32xf32>
    %88 = arith.mulf %84, %87 : vector<1x32xf32>
    %89 = arith.mulf %86, %86 : vector<1x32xf32>
    %90 = arith.subf %88, %89 : vector<1x32xf32>
    %cst_82 = arith.constant 0.000000e+00 : f32
    %91 = vector.broadcast %cst_82 : f32 to vector<1x32xf32>
    %92 = arith.maximumf %90, %91 : vector<1x32xf32>
    %93 = vector.broadcast %86 : vector<1x32xf32> to vector<256x32xf32>
    %94 = arith.subf %79, %93 : vector<256x32xf32>
    %cst_83 = arith.constant 9.99999974E-6 : f32
    %95 = vector.broadcast %cst_83 : f32 to vector<1x32xf32>
    %96 = arith.addf %92, %95 : vector<1x32xf32>
    %97 = math.rsqrt %96 : vector<1x32xf32>
    %98 = vector.broadcast %97 : vector<1x32xf32> to vector<256x32xf32>
    %99 = arith.mulf %94, %98 : vector<256x32xf32>
    %cst_84 = arith.constant 0.000000e+00 : f32
    %100 = vector.broadcast %cst_84 : f32 to vector<256x32xf32>
    %101 = arith.maximumf %99, %100 : vector<256x32xf32>
    %102 = vector.shape_cast %101 : vector<256x32xf32> to vector<16x16x32xf32>
    %c1_85 = arith.constant 1 : index
    %c1_86 = arith.constant 1 : index
    %c0_87 = arith.constant 0 : index
    %103 = vector.load %arg7[%c1_85, %c1_86, %c0_87] : memref<18x18x32xf32, #tpu.memory_space<vmem>>, vector<16x16x32xf32>
    tpu.vector_store %arg7[%c1_85, %c1_86, %c0_87], %102 {strides = array<i32>} : memref<18x18x32xf32, #tpu.memory_space<vmem>>, vector<16x16x32xf32>,
    %104 = vector.extract_strided_slice %102 {offsets = [1, 0, 0], sizes = [1, 16, 32], strides = [1, 1, 1]} : vector<16x16x32xf32> to vector<1x16x32xf32>
    %c0_88 = arith.constant 0 : index
    %c1_89 = arith.constant 1 : index
    %c0_90 = arith.constant 0 : index
    %105 = vector.load %arg7[%c0_88, %c1_89, %c0_90] : memref<18x18x32xf32, #tpu.memory_space<vmem>>, vector<1x16x32xf32>
    tpu.vector_store %arg7[%c0_88, %c1_89, %c0_90], %104 {strides = array<i32>} : memref<18x18x32xf32, #tpu.memory_space<vmem>>, vector<1x16x32xf32>,
    %106 = vector.extract_strided_slice %102 {offsets = [14, 0, 0], sizes = [1, 16, 32], strides = [1, 1, 1]} : vector<16x16x32xf32> to vector<1x16x32xf32>
    %c17_91 = arith.constant 17 : index
    %c1_92 = arith.constant 1 : index
    %c0_93 = arith.constant 0 : index
    %107 = vector.load %arg7[%c17_91, %c1_92, %c0_93] : memref<18x18x32xf32, #tpu.memory_space<vmem>>, vector<1x16x32xf32>
    tpu.vector_store %arg7[%c17_91, %c1_92, %c0_93], %106 {strides = array<i32>} : memref<18x18x32xf32, #tpu.memory_space<vmem>>, vector<1x16x32xf32>,
    %c0_94 = arith.constant 0 : index
    %c2_95 = arith.constant 2 : index
    %c0_96 = arith.constant 0 : index
    %108 = vector.load %arg7[%c0_94, %c2_95, %c0_96] : memref<18x18x32xf32, #tpu.memory_space<vmem>>, vector<18x1x32xf32>
    %c0_97 = arith.constant 0 : index
    %c0_98 = arith.constant 0 : index
    %c0_99 = arith.constant 0 : index
    %109 = vector.load %arg7[%c0_97, %c0_98, %c0_99] : memref<18x18x32xf32, #tpu.memory_space<vmem>>, vector<18x1x32xf32>
    tpu.vector_store %arg7[%c0_97, %c0_98, %c0_99], %108 {strides = array<i32>} : memref<18x18x32xf32, #tpu.memory_space<vmem>>, vector<18x1x32xf32>,
    %c0_100 = arith.constant 0 : index
    %c15_101 = arith.constant 15 : index
    %c0_102 = arith.constant 0 : index
    %110 = vector.load %arg7[%c0_100, %c15_101, %c0_102] : memref<18x18x32xf32, #tpu.memory_space<vmem>>, vector<18x1x32xf32>
    %c0_103 = arith.constant 0 : index
    %c17_104 = arith.constant 17 : index
    %c0_105 = arith.constant 0 : index
    %111 = vector.load %arg7[%c0_103, %c17_104, %c0_105] : memref<18x18x32xf32, #tpu.memory_space<vmem>>, vector<18x1x32xf32>
    tpu.vector_store %arg7[%c0_103, %c17_104, %c0_105], %110 {strides = array<i32>} : memref<18x18x32xf32, #tpu.memory_space<vmem>>, vector<18x1x32xf32>,
    %cst_106 = arith.constant 0.000000e+00 : f32
    %112 = vector.broadcast %cst_106 : f32 to vector<256x32xf32>
    %c0_107 = arith.constant 0 : index
    %c0_108 = arith.constant 0 : index
    %c0_109 = arith.constant 0 : index
    %113 = vector.load %arg7[%c0_107, %c0_108, %c0_109] : memref<18x18x32xf32, #tpu.memory_space<vmem>>, vector<16x16x32xf32>
    %114 = vector.shape_cast %113 : vector<16x16x32xf32> to vector<256x32xf32>
    %115 = arith.truncf %114 : vector<256x32xf32> to vector<256x32xbf16>
    %c0_110 = arith.constant 0 : index
    %c0_111 = arith.constant 0 : index
    %c0_112 = arith.constant 0 : index
    %116 = vector.load %arg4[%c0_110, %c0_111, %c0_112] : memref<9x32x32xbf16, #tpu.memory_space<vmem>>, vector<1x32x32xbf16>
    %117 = vector.shape_cast %116 : vector<1x32x32xbf16> to vector<32x32xbf16>
    %cst_113 = arith.constant dense<0.000000e+00> : vector<256x32xf32>
    %118 = tpu.matmul %115, %117, %cst_113 {dimension_numbers = #tpu.dot_dimension_numbers<[1], [0], [0], [1], [0, 0, 1, 1], [], []>} : vector<256x32xbf16>, vector<32x32xbf16>, vector<256x32xf32> -> vector<256x32xf32>
    %119 = arith.addf %112, %118 : vector<256x32xf32>
    %c0_114 = arith.constant 0 : index
    %c1_115 = arith.constant 1 : index
    %c0_116 = arith.constant 0 : index
    %120 = vector.load %arg7[%c0_114, %c1_115, %c0_116] : memref<18x18x32xf32, #tpu.memory_space<vmem>>, vector<16x16x32xf32>
    %121 = vector.shape_cast %120 : vector<16x16x32xf32> to vector<256x32xf32>
    %122 = arith.truncf %121 : vector<256x32xf32> to vector<256x32xbf16>
    %c1_117 = arith.constant 1 : index
    %c0_118 = arith.constant 0 : index
    %c0_119 = arith.constant 0 : index
    %123 = vector.load %arg4[%c1_117, %c0_118, %c0_119] : memref<9x32x32xbf16, #tpu.memory_space<vmem>>, vector<1x32x32xbf16>
    %124 = vector.shape_cast %123 : vector<1x32x32xbf16> to vector<32x32xbf16>
    %cst_120 = arith.constant dense<0.000000e+00> : vector<256x32xf32>
    %125 = tpu.matmul %122, %124, %cst_120 {dimension_numbers = #tpu.dot_dimension_numbers<[1], [0], [0], [1], [0, 0, 1, 1], [], []>} : vector<256x32xbf16>, vector<32x32xbf16>, vector<256x32xf32> -> vector<256x32xf32>
    %126 = arith.addf %119, %125 : vector<256x32xf32>
    %c0_121 = arith.constant 0 : index
    %c2_122 = arith.constant 2 : index
    %c0_123 = arith.constant 0 : index
    %127 = vector.load %arg7[%c0_121, %c2_122, %c0_123] : memref<18x18x32xf32, #tpu.memory_space<vmem>>, vector<16x16x32xf32>
    %128 = vector.shape_cast %127 : vector<16x16x32xf32> to vector<256x32xf32>
    %129 = arith.truncf %128 : vector<256x32xf32> to vector<256x32xbf16>
    %c2_124 = arith.constant 2 : index
    %c0_125 = arith.constant 0 : index
    %c0_126 = arith.constant 0 : index
    %130 = vector.load %arg4[%c2_124, %c0_125, %c0_126] : memref<9x32x32xbf16, #tpu.memory_space<vmem>>, vector<1x32x32xbf16>
    %131 = vector.shape_cast %130 : vector<1x32x32xbf16> to vector<32x32xbf16>
    %cst_127 = arith.constant dense<0.000000e+00> : vector<256x32xf32>
    %132 = tpu.matmul %129, %131, %cst_127 {dimension_numbers = #tpu.dot_dimension_numbers<[1], [0], [0], [1], [0, 0, 1, 1], [], []>} : vector<256x32xbf16>, vector<32x32xbf16>, vector<256x32xf32> -> vector<256x32xf32>
    %133 = arith.addf %126, %132 : vector<256x32xf32>
    %c1_128 = arith.constant 1 : index
    %c0_129 = arith.constant 0 : index
    %c0_130 = arith.constant 0 : index
    %134 = vector.load %arg7[%c1_128, %c0_129, %c0_130] : memref<18x18x32xf32, #tpu.memory_space<vmem>>, vector<16x16x32xf32>
    %135 = vector.shape_cast %134 : vector<16x16x32xf32> to vector<256x32xf32>
    %136 = arith.truncf %135 : vector<256x32xf32> to vector<256x32xbf16>
    %c3_131 = arith.constant 3 : index
    %c0_132 = arith.constant 0 : index
    %c0_133 = arith.constant 0 : index
    %137 = vector.load %arg4[%c3_131, %c0_132, %c0_133] : memref<9x32x32xbf16, #tpu.memory_space<vmem>>, vector<1x32x32xbf16>
    %138 = vector.shape_cast %137 : vector<1x32x32xbf16> to vector<32x32xbf16>
    %cst_134 = arith.constant dense<0.000000e+00> : vector<256x32xf32>
    %139 = tpu.matmul %136, %138, %cst_134 {dimension_numbers = #tpu.dot_dimension_numbers<[1], [0], [0], [1], [0, 0, 1, 1], [], []>} : vector<256x32xbf16>, vector<32x32xbf16>, vector<256x32xf32> -> vector<256x32xf32>
    %140 = arith.addf %133, %139 : vector<256x32xf32>
    %c1_135 = arith.constant 1 : index
    %c1_136 = arith.constant 1 : index
    %c0_137 = arith.constant 0 : index
    %141 = vector.load %arg7[%c1_135, %c1_136, %c0_137] : memref<18x18x32xf32, #tpu.memory_space<vmem>>, vector<16x16x32xf32>
    %142 = vector.shape_cast %141 : vector<16x16x32xf32> to vector<256x32xf32>
    %143 = arith.truncf %142 : vector<256x32xf32> to vector<256x32xbf16>
    %c4_138 = arith.constant 4 : index
    %c0_139 = arith.constant 0 : index
    %c0_140 = arith.constant 0 : index
    %144 = vector.load %arg4[%c4_138, %c0_139, %c0_140] : memref<9x32x32xbf16, #tpu.memory_space<vmem>>, vector<1x32x32xbf16>
    %145 = vector.shape_cast %144 : vector<1x32x32xbf16> to vector<32x32xbf16>
    %cst_141 = arith.constant dense<0.000000e+00> : vector<256x32xf32>
    %146 = tpu.matmul %143, %145, %cst_141 {dimension_numbers = #tpu.dot_dimension_numbers<[1], [0], [0], [1], [0, 0, 1, 1], [], []>} : vector<256x32xbf16>, vector<32x32xbf16>, vector<256x32xf32> -> vector<256x32xf32>
    %147 = arith.addf %140, %146 : vector<256x32xf32>
    %c1_142 = arith.constant 1 : index
    %c2_143 = arith.constant 2 : index
    %c0_144 = arith.constant 0 : index
    %148 = vector.load %arg7[%c1_142, %c2_143, %c0_144] : memref<18x18x32xf32, #tpu.memory_space<vmem>>, vector<16x16x32xf32>
    %149 = vector.shape_cast %148 : vector<16x16x32xf32> to vector<256x32xf32>
    %150 = arith.truncf %149 : vector<256x32xf32> to vector<256x32xbf16>
    %c5_145 = arith.constant 5 : index
    %c0_146 = arith.constant 0 : index
    %c0_147 = arith.constant 0 : index
    %151 = vector.load %arg4[%c5_145, %c0_146, %c0_147] : memref<9x32x32xbf16, #tpu.memory_space<vmem>>, vector<1x32x32xbf16>
    %152 = vector.shape_cast %151 : vector<1x32x32xbf16> to vector<32x32xbf16>
    %cst_148 = arith.constant dense<0.000000e+00> : vector<256x32xf32>
    %153 = tpu.matmul %150, %152, %cst_148 {dimension_numbers = #tpu.dot_dimension_numbers<[1], [0], [0], [1], [0, 0, 1, 1], [], []>} : vector<256x32xbf16>, vector<32x32xbf16>, vector<256x32xf32> -> vector<256x32xf32>
    %154 = arith.addf %147, %153 : vector<256x32xf32>
    %c2_149 = arith.constant 2 : index
    %c0_150 = arith.constant 0 : index
    %c0_151 = arith.constant 0 : index
    %155 = vector.load %arg7[%c2_149, %c0_150, %c0_151] : memref<18x18x32xf32, #tpu.memory_space<vmem>>, vector<16x16x32xf32>
    %156 = vector.shape_cast %155 : vector<16x16x32xf32> to vector<256x32xf32>
    %157 = arith.truncf %156 : vector<256x32xf32> to vector<256x32xbf16>
    %c6_152 = arith.constant 6 : index
    %c0_153 = arith.constant 0 : index
    %c0_154 = arith.constant 0 : index
    %158 = vector.load %arg4[%c6_152, %c0_153, %c0_154] : memref<9x32x32xbf16, #tpu.memory_space<vmem>>, vector<1x32x32xbf16>
    %159 = vector.shape_cast %158 : vector<1x32x32xbf16> to vector<32x32xbf16>
    %cst_155 = arith.constant dense<0.000000e+00> : vector<256x32xf32>
    %160 = tpu.matmul %157, %159, %cst_155 {dimension_numbers = #tpu.dot_dimension_numbers<[1], [0], [0], [1], [0, 0, 1, 1], [], []>} : vector<256x32xbf16>, vector<32x32xbf16>, vector<256x32xf32> -> vector<256x32xf32>
    %161 = arith.addf %154, %160 : vector<256x32xf32>
    %c2_156 = arith.constant 2 : index
    %c1_157 = arith.constant 1 : index
    %c0_158 = arith.constant 0 : index
    %162 = vector.load %arg7[%c2_156, %c1_157, %c0_158] : memref<18x18x32xf32, #tpu.memory_space<vmem>>, vector<16x16x32xf32>
    %163 = vector.shape_cast %162 : vector<16x16x32xf32> to vector<256x32xf32>
    %164 = arith.truncf %163 : vector<256x32xf32> to vector<256x32xbf16>
    %c7_159 = arith.constant 7 : index
    %c0_160 = arith.constant 0 : index
    %c0_161 = arith.constant 0 : index
    %165 = vector.load %arg4[%c7_159, %c0_160, %c0_161] : memref<9x32x32xbf16, #tpu.memory_space<vmem>>, vector<1x32x32xbf16>
    %166 = vector.shape_cast %165 : vector<1x32x32xbf16> to vector<32x32xbf16>
    %cst_162 = arith.constant dense<0.000000e+00> : vector<256x32xf32>
    %167 = tpu.matmul %164, %166, %cst_162 {dimension_numbers = #tpu.dot_dimension_numbers<[1], [0], [0], [1], [0, 0, 1, 1], [], []>} : vector<256x32xbf16>, vector<32x32xbf16>, vector<256x32xf32> -> vector<256x32xf32>
    %168 = arith.addf %161, %167 : vector<256x32xf32>
    %c2_163 = arith.constant 2 : index
    %c2_164 = arith.constant 2 : index
    %c0_165 = arith.constant 0 : index
    %169 = vector.load %arg7[%c2_163, %c2_164, %c0_165] : memref<18x18x32xf32, #tpu.memory_space<vmem>>, vector<16x16x32xf32>
    %170 = vector.shape_cast %169 : vector<16x16x32xf32> to vector<256x32xf32>
    %171 = arith.truncf %170 : vector<256x32xf32> to vector<256x32xbf16>
    %c8_166 = arith.constant 8 : index
    %c0_167 = arith.constant 0 : index
    %c0_168 = arith.constant 0 : index
    %172 = vector.load %arg4[%c8_166, %c0_167, %c0_168] : memref<9x32x32xbf16, #tpu.memory_space<vmem>>, vector<1x32x32xbf16>
    %173 = vector.shape_cast %172 : vector<1x32x32xbf16> to vector<32x32xbf16>
    %cst_169 = arith.constant dense<0.000000e+00> : vector<256x32xf32>
    %174 = tpu.matmul %171, %173, %cst_169 {dimension_numbers = #tpu.dot_dimension_numbers<[1], [0], [0], [1], [0, 0, 1, 1], [], []>} : vector<256x32xbf16>, vector<32x32xbf16>, vector<256x32xf32> -> vector<256x32xf32>
    %175 = arith.addf %168, %174 : vector<256x32xf32>
    %c0_170 = arith.constant 0 : index
    %c0_171 = arith.constant 0 : index
    %176 = vector.load %arg5[%c0_170, %c0_171] : memref<1x32xf32, #tpu.memory_space<vmem>>, vector<1x32xf32>
    %177 = vector.broadcast %176 : vector<1x32xf32> to vector<256x32xf32>
    %178 = arith.addf %175, %177 : vector<256x32xf32>
    %cst_172 = arith.constant dense<0.000000e+00> : vector<32xf32>
    %179 = vector.multi_reduction <add>, %178, %cst_172 [0] : vector<256x32xf32> to vector<32xf32>
    %180 = vector.shape_cast %179 : vector<32xf32> to vector<1x32xf32>
    %181 = arith.mulf %178, %178 : vector<256x32xf32>
    %cst_173 = arith.constant dense<0.000000e+00> : vector<32xf32>
    %182 = vector.multi_reduction <add>, %181, %cst_173 [0] : vector<256x32xf32> to vector<32xf32>
    %183 = vector.shape_cast %182 : vector<32xf32> to vector<1x32xf32>
    %cst_174 = arith.constant 3.906250e-03 : f32
    %184 = vector.broadcast %cst_174 : f32 to vector<1x32xf32>
    %185 = arith.mulf %180, %184 : vector<1x32xf32>
    %cst_175 = arith.constant 3.906250e-03 : f32
    %186 = vector.broadcast %cst_175 : f32 to vector<1x32xf32>
    %187 = arith.mulf %183, %186 : vector<1x32xf32>
    %188 = arith.mulf %185, %185 : vector<1x32xf32>
    %189 = arith.subf %187, %188 : vector<1x32xf32>
    %cst_176 = arith.constant 0.000000e+00 : f32
    %190 = vector.broadcast %cst_176 : f32 to vector<1x32xf32>
    %191 = arith.maximumf %189, %190 : vector<1x32xf32>
    %192 = vector.broadcast %185 : vector<1x32xf32> to vector<256x32xf32>
    %193 = arith.subf %178, %192 : vector<256x32xf32>
    %cst_177 = arith.constant 9.99999974E-6 : f32
    %194 = vector.broadcast %cst_177 : f32 to vector<1x32xf32>
    %195 = arith.addf %191, %194 : vector<1x32xf32>
    %196 = math.rsqrt %195 : vector<1x32xf32>
    %197 = vector.broadcast %196 : vector<1x32xf32> to vector<256x32xf32>
    %198 = arith.mulf %193, %197 : vector<256x32xf32>
    %199 = arith.addf %2, %198 : vector<256x32xf32>
    %200 = tpu.transpose %199, [1, 0] : vector<256x32xf32> -> vector<32x256xf32>
    %c0_178 = arith.constant 0 : index
    %c0_179 = arith.constant 0 : index
    %c0_180 = arith.constant 0 : index
    %201 = vector.load %arg6[%c0_178, %c0_179, %c0_180] : memref<1x32x256xf32, #tpu.memory_space<vmem>>, vector<1x32x256xf32>
    %202 = vector.shape_cast %201 : vector<1x32x256xf32> to vector<32x256xf32>
    %203 = vector.shape_cast %200 : vector<32x256xf32> to vector<1x32x256xf32>
    tpu.vector_store %arg6[%c0_178, %c0_179, %c0_180], %203 {strides = array<i32>} : memref<1x32x256xf32, #tpu.memory_space<vmem>>, vector<1x32x256xf32>,
    return
  }
  func.func @transform_0(%arg0: i32) -> (i32, i32, i32) {
    %c0_i32 = arith.constant 0 : i32
    %c0_i32_0 = arith.constant 0 : i32
    %c0_i32_1 = arith.constant 0 : i32
    return %arg0, %c0_i32, %c0_i32_0 : i32, i32, i32
  }
  func.func @transform_1(%arg0: i32) -> (i32, i32, i32) {
    %c0_i32 = arith.constant 0 : i32
    %c0_i32_0 = arith.constant 0 : i32
    %c0_i32_1 = arith.constant 0 : i32
    %c0_i32_2 = arith.constant 0 : i32
    return %c0_i32, %c0_i32_0, %c0_i32_1 : i32, i32, i32
  }
  func.func @transform_2(%arg0: i32) -> (i32, i32) {
    %c0_i32 = arith.constant 0 : i32
    %c0_i32_0 = arith.constant 0 : i32
    %c0_i32_1 = arith.constant 0 : i32
    return %c0_i32, %c0_i32_0 : i32, i32
  }
  func.func @transform_3(%arg0: i32) -> (i32, i32, i32) {
    %c0_i32 = arith.constant 0 : i32
    %c0_i32_0 = arith.constant 0 : i32
    %c0_i32_1 = arith.constant 0 : i32
    %c0_i32_2 = arith.constant 0 : i32
    return %c0_i32, %c0_i32_0, %c0_i32_1 : i32, i32, i32
  }
  func.func @transform_4(%arg0: i32) -> (i32, i32) {
    %c0_i32 = arith.constant 0 : i32
    %c0_i32_0 = arith.constant 0 : i32
    %c0_i32_1 = arith.constant 0 : i32
    return %c0_i32, %c0_i32_0 : i32, i32
  }
  func.func @transform_5(%arg0: i32) -> (i32, i32, i32) {
    %c0_i32 = arith.constant 0 : i32
    %c0_i32_0 = arith.constant 0 : i32
    %c0_i32_1 = arith.constant 0 : i32
    return %arg0, %c0_i32, %c0_i32_0 : i32, i32, i32
  }
}

</mosaic_0001>

<bundles_post_ra>
// kernel: resnet_block_forward.1
= control target key start
LH: loop header
LB: loop body
LE: loop exit
PB: predicated region body
PF: predicated region fallthrough
CT: control target
= control target key end

     0   :  { %s5966_s18 = smov 0   ;;  %s8682_s0 = inlined_call_operand.vmem [shape: f32[2,32,256], index: 0, kind: input, shape index: {}]   ;;  %s8683_s1 = inlined_call_operand.vmem [shape: bf16[9,32,32], index: 1, kind: input, shape index: {}]   ;;  %s8684_s2 = inlined_call_operand.vmem [shape: f32[1,32], index: 2, kind: input, shape index: {}]   ;;  %s8685_s3 = inlined_call_operand.vmem [shape: bf16[9,32,32], index: 3, kind: input, shape index: {}]   ;;  %s8686_s4 = inlined_call_operand.vmem [shape: f32[1,32], index: 4, kind: input, shape index: {}]   ;;  %s8687_s5 = inlined_call_operand.vmem [shape: f32[2,32,256], index: 5, kind: output, shape index: {}]  }
   0x1 LB: > { %s5364_s19 = sadd.s32 4294967295, %s5934_s18   ;;  %p5368_p0 = scmp.ge.s32.totalorder %s5934_s18, 1  ;;  %s5934_s18 = sphi %s5966_s18, %s15_s18  }
   0x2   : > { %p187_p1 = scmp.lt.s32.totalorder %s5934_s18, 3 }
   0x4   : > { %p188_p2 = pnand %p5368_p0, %p187_p1 }
   0x6   : > { %191 = sbr.rel (%p188_p2) target bundleno = 2309 (0x905), region = 40 }
   0xb   : > { %p215_p3 = scmp.lt.s32.totalorder %s5364_s19, 1  ;;  %v5876_v8 = vld [vmem:[%s8683_s1 + $0x18] sm:$0xff]  ;;  %v5874_v9 = vld [vmem:[%s8683_s1 + $0x8] sm:$0xff]  ;;  %vm299_vm0 = vcmask 261120   ;;  %v5875_v11 = vld [vmem:[%s8683_s1 + $0x10] sm:$0xff]  ;;  %vm355_vm1 = vcmask 253952  }
   0xc   : > { %581 = vmatpush.bf16.msra.mxu0 %v5876_v8  ;;  %730 = vmatpush.bf16.msra.mxu1 %v5874_v9  ;;  %v5873_v12 = vld [vmem:[%s8683_s1] sm:$0xff] }
   0xd   : > { %s8947_s19 = smov (!%p215_p3, %s5364_s19), 1  ;;  %5909 = vmatpush.bf16.msra.mxu2 %v5876_v8  ;;  %5911 = vmatpush.bf16.msra.mxu3 %v5874_v9 }
   0xe   : > { %s5871_s20 = sshll.u32 %s8947_s19, 6 }
   0xf   : > { %s219_s23 = scalar_lea.vmem %s8682_s0, %s5871_s20  ;;  %s224_s11 = scalar_lea.vmem %s8687_s5, %s5871_s20 }
  0x10   : > { %v226_v0 = vld [vmem:[%s219_s23] sm:$0xff]  ;;  %v227_v1 = vld [vmem:[%s219_s23 + $0x8] sm:$0xff]  ;;  %v228_v2 = vld [vmem:[%s219_s23 + $0x10] sm:$0xff]  ;;  %582 = vmatpush.bf16.msra.mxu0 %v5875_v11  ;;  %731 = vmatpush.bf16.msra.mxu1 %v5873_v12 }
  0x11   : > { %234 = vxpose.xlu0.b32.start [1/4] (short) %v226_v0, 128  ;;  %266 = vxpose.xlu1.b32.start [1/4] (short) %v227_v1, 128  ;;  %v229_v3 = vld [vmem:[%s219_s23 + $0x18] sm:$0xff]  ;;  %v230_v4 = vld [vmem:[%s219_s23 + $0x20] sm:$0xff]  ;;  %v231_v5 = vld [vmem:[%s219_s23 + $0x28] sm:$0xff] }
  0x12   : > { %v232_v6 = vld [vmem:[%s219_s23 + $0x30] sm:$0xff]  ;;  %v233_v7 = vld [vmem:[%s219_s23 + $0x38] sm:$0xff]  ;;  %5910 = vmatpush.bf16.msra.mxu2 %v5875_v11  ;;  %5912 = vmatpush.bf16.msra.mxu3 %v5873_v12  ;;  %v5878_v11 = vld [vmem:[%s8683_s1 + $0x28] sm:$0xff] }
  0x13   : > { %v5880_v12 = vld [vmem:[%s8683_s1 + $0x38] sm:$0xff] }
  0x16   : > { %932 = vmatpush.bf16.msrb.mxu2 %v5878_v11  ;;  %1166 = vmatpush.bf16.msrb.mxu3 %v5880_v12 }
  0x19   : > { %235 = vxpose.xlu0.b32.cont [2/4] (short) %v228_v2, 128  ;;  %267 = vxpose.xlu1.b32.cont [2/4] (short) %v229_v3, 128 }
  0x21   : > { %236 = vxpose.xlu0.b32.cont [3/4] (short) %v230_v4, 128  ;;  %268 = vxpose.xlu1.b32.cont [3/4] (short) %v231_v5, 128 }
  0x29   : > { %237 = vxpose.xlu0.b32.end [4/4] (short) %v232_v6, 128  ;;  %269 = vxpose.xlu1.b32.end [4/4] (short) %v233_v7, 128 }
  0xb5   : > { %v5988_v10 = vpop.trf.xlu0  ;;  %v6072_v56 = vpop.trf.xlu1 }
  0xb6   : > { %8730 = vst [vmem:[#allocation3_spill] sm:$0xff] %v5988_v10 }
  0xb7   : > { %300 = vst.msk [vmem:[#allocation2 + $0x19] sm:$0xff] %vm299_vm0, %v5988_v10 }
  0xb8   : > { %8741 = vst [vmem:[#allocation14_spill] sm:$0xff] %v6072_v56 }
  0xb9   : > { %316 = vst.msk [vmem:[#allocation2 + $0xd9] sm:$0xff] %vm299_vm0, %v6072_v56 }
  0xbd   : > { %v5998_v14 = vpop.trf.xlu0  ;;  %v6089_v63 = vpop.trf.xlu1 }
  0xbe   : > { %v338_v13 = vld [vmem:[#allocation2 + $0x1a] sm:$0x1]  ;;  %8731 = vst [vmem:[#allocation4_spill] sm:$0xff] %v5998_v14 }
  0xbf   : > { %357 = vst.msk [vmem:[#allocation2 + $0x18] sm:$0x1] %vm355_vm1, %v338_v13  ;;  %v464_v36 = vld [vmem:[#allocation2 + $0x19] sm:$0xff]  ;;  %v5882_v13 = vld [vmem:[%s8683_s1 + $0x48] sm:$0xff] }
  0xc0   : > { %301 = vst.msk [vmem:[#allocation2 + $0x21] sm:$0xff] %vm299_vm0, %v5998_v14  ;;  %v346_v62 = vld [vmem:[#allocation2 + $0xda] sm:$0x1]  ;;  %1400 = vmatpush.bf16.msrb.mxu0 %v5882_v13 }
  0xc1   : > { %8743 = vst [vmem:[#allocation16_spill] sm:$0xff] %v6089_v63  ;;  %v480_v12 = vld [vmem:[#allocation2 + $0xd9] sm:$0xff] }
  0xc2   : > { %365 = vst.msk [vmem:[#allocation2 + $0xd8] sm:$0x1] %vm355_vm1, %v346_v62 }
  0xc3   : > { %317 = vst.msk [vmem:[#allocation2 + $0xe1] sm:$0xff] %vm299_vm0, %v6089_v63 }
  0xc5   : > { %v6003_v15 = vpop.trf.xlu0  ;;  %v6099_v5 = vpop.trf.xlu1 }
  0xc6   : > { %8732 = vst [vmem:[#allocation5_spill] sm:$0xff] %v6003_v15  ;;  %v412_v32 = vld [vmem:[#allocation2 + $0x18] sm:$0xff] }
  0xc7   : > { %v375_v16 = vld [vmem:[#allocation2 + $0x27] sm:$0x1]  ;;  %302 = vst.msk [vmem:[#allocation2 + $0x31] sm:$0xff] %vm299_vm0, %v6003_v15 }
  0xc8   : > { %393 = vst.msk [vmem:[#allocation2 + $0x29] sm:$0x1] %vm355_vm1, %v375_v16  ;;  %v465_v34 = vld [vmem:[#allocation2 + $0x21] sm:$0xff] }
  0xc9   : > { %332 = vst.msk [vmem:[#allocation2 + $0x1] sm:$0xff] %vm299_vm0, %v6003_v15  ;;  %v413_v35 = vld [vmem:[#allocation2 + $0x20] sm:$0xff]  ;;  %v6036_v37 = vpack.c.bf16 %v465_v34, %v464_v36  ;;  %v5884_v34 = vld [vmem:[%s8683_s1 + $0x58] sm:$0xff] }
  0xca   : > { %v6038_v38 = vpack.c.bf16 %v413_v35, %v412_v32  ;;  %8745 = vst [vmem:[#allocation18_spill] sm:$0xff] %v6099_v5  ;;  %v383_v7 = vld [vmem:[#allocation2 + $0xe7] sm:$0x1]  ;;  %1634 = vmatpush.bf16.msrb.mxu1 %v5884_v34 }
  0xcb   : > { %318 = vst.msk [vmem:[#allocation2 + $0xf1] sm:$0xff] %vm299_vm0, %v6099_v5  ;;  %v5881_v35 = vld [vmem:[%s8683_s1 + $0x40] sm:$0xff] }
  0xcc   : > { %401 = vst.msk [vmem:[#allocation2 + $0xe9] sm:$0x1] %vm355_vm1, %v383_v7  ;;  %1401 = vmatpush.bf16.msrb.mxu0 %v5881_v35  ;;  %v481_v13 = vld [vmem:[#allocation2 + $0xe1] sm:$0xff] }
  0xcd   : > { %v6010_v18 = vpop.trf.xlu0 }
  0xce   : > { %v339_v17 = vld [vmem:[#allocation2 + $0x32] sm:$0x1]  ;;  %8733 = vst [vmem:[#allocation6_spill] sm:$0xff] %v6010_v18 }
  0xcf   : > { %358 = vst.msk [vmem:[#allocation2 + $0x30] sm:$0x1] %vm355_vm1, %v339_v17  ;;  %v466_v46 = vld [vmem:[#allocation2 + $0x31] sm:$0xff] }
  0xd0   : > { %v337_v19 = vld [vmem:[#allocation2 + $0x2] sm:$0x1]  ;;  %303 = vst.msk [vmem:[#allocation2 + $0x39] sm:$0xff] %vm299_vm0, %v6010_v18 }
  0xd1   : > { %356 = vst.msk [vmem:[#allocation2] sm:$0x1] %vm355_vm1, %v337_v19  ;;  %v462_v22 = vld [vmem:[#allocation2 + $0x1] sm:$0xff] }
  0xd2   : > { %333 = vst.msk [vmem:[#allocation2 + $0x9] sm:$0xff] %vm299_vm0, %v6010_v18  ;;  %v347_v19 = vld [vmem:[#allocation2 + $0xf2] sm:$0x1] }
  0xd3   : > { %366 = vst.msk [vmem:[#allocation2 + $0xf0] sm:$0x1] %vm355_vm1, %v347_v19  ;;  %v429_v19 = vld [vmem:[#allocation2 + $0xe0] sm:$0xff] }
  0xd5   : > { %v6018_v20 = vpop.trf.xlu0 }
  0xd6   : > { %8734 = vst [vmem:[#allocation7_spill] sm:$0xff] %v6018_v20  ;;  %v414_v42 = vld [vmem:[#allocation2 + $0x30] sm:$0xff] }
  0xd7   : > { %v376_v21 = vld [vmem:[#allocation2 + $0x3f] sm:$0x1]  ;;  %304 = vst.msk [vmem:[#allocation2 + $0x49] sm:$0xff] %vm299_vm0, %v6018_v20 }
  0xd8   : > { %394 = vst.msk [vmem:[#allocation2 + $0x41] sm:$0x1] %vm355_vm1, %v376_v21  ;;  %v410_v23 = vld [vmem:[#allocation2] sm:$0xff]  ;;  %v415_v45 = vld [vmem:[#allocation2 + $0x38] sm:$0xff]  ;;  %v6126_v21 = vpop.trf.xlu1 }
  0xd9   : > { %v374_v24 = vld [vmem:[#allocation2 + $0xf] sm:$0x1]  ;;  %v467_v44 = vld [vmem:[#allocation2 + $0x39] sm:$0xff]  ;;  %v6056_v48 = vpack.c.bf16 %v415_v45, %v414_v42  ;;  %8747 = vst [vmem:[#allocation20_spill] sm:$0xff] %v6126_v21  ;;  %v5883_v42 = vld [vmem:[%s8683_s1 + $0x50] sm:$0xff] }
  0xda   : > { %v463_v25 = vld [vmem:[#allocation2 + $0x9] sm:$0xff]  ;;  %392 = vst.msk [vmem:[#allocation2 + $0x11] sm:$0x1] %vm355_vm1, %v374_v24  ;;  %v6054_v47 = vpack.c.bf16 %v467_v44, %v466_v46  ;;  %1635 = vmatpush.bf16.msrb.mxu1 %v5883_v42 }
  0xdb   : > { %v411_v26 = vld [vmem:[#allocation2 + $0x8] sm:$0xff]  ;;  %v494_v27 = vpack.c.bf16 %v463_v25, %v462_v22  ;;  %319 = vst.msk [vmem:[#allocation2 + $0xf9] sm:$0xff] %vm299_vm0, %v6126_v21 }
  0xdc   : > { %v442_v28 = vpack.c.bf16 %v411_v26, %v410_v23 }
  0xdd   : > { %5385 = vmatmul.msk.bf16.vlgmr.msra.gmra.mxu0 %vm299_vm0, %v494_v27  ;;  %v6026_v30 = vpop.trf.xlu0 }
  0xde   : > { %5409 = vmatmul.msk.bf16.vlgmr.msra.gmra.mxu1 %vm299_vm0, %v442_v28  ;;  %v340_v29 = vld [vmem:[#allocation2 + $0x4a] sm:$0x1]  ;;  %8735 = vst [vmem:[#allocation8_spill] sm:$0xff] %v6026_v30 }
  0xdf   : > { %359 = vst.msk [vmem:[#allocation2 + $0x48] sm:$0x1] %vm355_vm1, %v340_v29  ;;  %v468_v57 = vld [vmem:[#allocation2 + $0x49] sm:$0xff] }
  0xe0   : > { %305 = vst.msk [vmem:[#allocation2 + $0x51] sm:$0xff] %vm299_vm0, %v6026_v30  ;;  %v6136_v27 = vpop.trf.xlu1 }
  0xe1   : > { %8749 = vst [vmem:[#allocation22_spill] sm:$0xff] %v6136_v27 }
  0xe2   : > { %v384_v29 = vld [vmem:[#allocation2 + $0xff] sm:$0x1]  ;;  %320 = vst.msk [vmem:[#allocation2 + $0x109] sm:$0xff] %vm299_vm0, %v6136_v27  ;;  %v1533_v15 = vld [vmem:[#allocation2 + $0xf2] sm:$0xff] }
  0xe3   : > { %402 = vst.msk [vmem:[#allocation2 + $0x101] sm:$0x1] %vm355_vm1, %v384_v29 }
  0xe5   : > { %v6031_v31 = vpop.trf.xlu0 }
  0xe6   : > { %8736 = vst [vmem:[#allocation9_spill] sm:$0xff] %v6031_v31  ;;  %v416_v52 = vld [vmem:[#allocation2 + $0x48] sm:$0xff] }
  0xe7   : > { %v377_v33 = vld [vmem:[#allocation2 + $0x57] sm:$0x1]  ;;  %306 = vst.msk [vmem:[#allocation2 + $0x61] sm:$0xff] %vm299_vm0, %v6031_v31 }
  0xe8   : > { %395 = vst.msk [vmem:[#allocation2 + $0x59] sm:$0x1] %vm355_vm1, %v377_v33  ;;  %v469_v54 = vld [vmem:[#allocation2 + $0x51] sm:$0xff]  ;;  %v6163_v44 = vpop.trf.xlu1 }
  0xe9   : > { %v417_v55 = vld [vmem:[#allocation2 + $0x50] sm:$0xff]  ;;  %v6076_v58 = vpack.c.bf16 %v469_v54, %v468_v57  ;;  %8751 = vst [vmem:[#allocation24_spill] sm:$0xff] %v6163_v44 }
  0xea   : > { %v6078_v59 = vpack.c.bf16 %v417_v55, %v416_v52  ;;  %321 = vst.msk [vmem:[#allocation2 + $0x111] sm:$0xff] %vm299_vm0, %v6163_v44 }
  0xed   : > { %5386 = vmatmul.msk.bf16.gmra.mxu0 %vm299_vm0, %v6036_v37  ;;  %v6044_v40 = vpop.trf.xlu0 }
  0xee   : > { %5410 = vmatmul.msk.bf16.gmra.mxu1 %vm299_vm0, %v6038_v38  ;;  %v341_v39 = vld [vmem:[#allocation2 + $0x62] sm:$0x1]  ;;  %8737 = vst [vmem:[#allocation10_spill] sm:$0xff] %v6044_v40 }
  0xef   : > { %360 = vst.msk [vmem:[#allocation2 + $0x60] sm:$0x1] %vm355_vm1, %v341_v39  ;;  %v470_v6 = vld [vmem:[#allocation2 + $0x61] sm:$0xff] }
  0xf0   : > { %307 = vst.msk [vmem:[#allocation2 + $0x69] sm:$0xff] %vm299_vm0, %v6044_v40 }
  0xf1   : > { %v1535_v63 = vld [vmem:[#allocation2 + $0x10a] sm:$0xff] }
  0xf5   : > { %v6049_v41 = vpop.trf.xlu0 }
  0xf6   : > { %8738 = vst [vmem:[#allocation11_spill] sm:$0xff] %v6049_v41  ;;  %v418_v1 = vld [vmem:[#allocation2 + $0x60] sm:$0xff] }
  0xf7   : > { %v378_v43 = vld [vmem:[#allocation2 + $0x6f] sm:$0x1]  ;;  %308 = vst.msk [vmem:[#allocation2 + $0x79] sm:$0xff] %vm299_vm0, %v6049_v41 }
  0xf8   : > { %396 = vst.msk [vmem:[#allocation2 + $0x71] sm:$0x1] %vm355_vm1, %v378_v43  ;;  %v471_v3 = vld [vmem:[#allocation2 + $0x69] sm:$0xff] }
  0xf9   : > { %v419_v4 = vld [vmem:[#allocation2 + $0x68] sm:$0xff]  ;;  %v6103_v8 = vpack.c.bf16 %v471_v3, %v470_v6  ;;  %v385_v3 = vld [vmem:[#allocation2 + $0x117] sm:$0x1] }
  0xfa   : > { %v6105_v9 = vpack.c.bf16 %v419_v4, %v418_v1  ;;  %v348_v43 = vld [vmem:[#allocation2 + $0x10a] sm:$0x1]  ;;  %v6173_v1 = vpop.trf.xlu1  ;;  %403 = vst.msk [vmem:[#allocation2 + $0x119] sm:$0x1] %vm355_vm1, %v385_v3 }
  0xfb   : > { %367 = vst.msk [vmem:[#allocation2 + $0x108] sm:$0x1] %vm355_vm1, %v348_v43 }
  0xfc   : > { %8752 = vst [vmem:[#allocation25_spill] sm:$0xff] %v6173_v1 }
  0xfd   : > { %5387 = vmatmul.msk.bf16.gmra.mxu0 %vm299_vm0, %v6054_v47  ;;  %v6062_v50 = vpop.trf.xlu0  ;;  %322 = vst.msk [vmem:[#allocation2 + $0x121] sm:$0xff] %vm299_vm0, %v6173_v1 }
  0xfe   : > { %5411 = vmatmul.msk.bf16.gmra.mxu1 %vm299_vm0, %v6056_v48  ;;  %v342_v49 = vld [vmem:[#allocation2 + $0x7a] sm:$0x1]  ;;  %8739 = vst [vmem:[#allocation12_spill] sm:$0xff] %v6062_v50 }
  0xff   : > { %361 = vst.msk [vmem:[#allocation2 + $0x78] sm:$0x1] %vm355_vm1, %v342_v49  ;;  %v472_v28 = vld [vmem:[#allocation2 + $0x79] sm:$0xff] }
 0x100   : > { %309 = vst.msk [vmem:[#allocation2 + $0x81] sm:$0xff] %vm299_vm0, %v6062_v50 }
 0x102   : > { %v6190_v11 = vpop.trf.xlu1 }
 0x103   : > { %8753 = vst [vmem:[#allocation26_spill] sm:$0xff] %v6190_v11 }
 0x104   : > { %v349_v7 = vld [vmem:[#allocation2 + $0x122] sm:$0x1]  ;;  %323 = vst.msk [vmem:[#allocation2 + $0x129] sm:$0xff] %vm299_vm0, %v6190_v11 }
 0x105   : > { %v6067_v51 = vpop.trf.xlu0  ;;  %368 = vst.msk [vmem:[#allocation2 + $0x120] sm:$0x1] %vm355_vm1, %v349_v7 }
 0x106   : > { %8740 = vst [vmem:[#allocation13_spill] sm:$0xff] %v6067_v51  ;;  %v420_v23 = vld [vmem:[#allocation2 + $0x78] sm:$0xff] }
 0x107   : > { %v379_v53 = vld [vmem:[#allocation2 + $0x87] sm:$0x1]  ;;  %310 = vst.msk [vmem:[#allocation2 + $0x91] sm:$0xff] %vm299_vm0, %v6067_v51  ;;  %v1523_v41 = vld [vmem:[#allocation2 + $0x7a] sm:$0xff] }
 0x108   : > { %397 = vst.msk [vmem:[#allocation2 + $0x89] sm:$0x1] %vm355_vm1, %v379_v53  ;;  %v473_v25 = vld [vmem:[#allocation2 + $0x81] sm:$0xff] }
 0x109   : > { %v421_v26 = vld [vmem:[#allocation2 + $0x80] sm:$0xff]  ;;  %v6140_v32 = vpack.c.bf16 %v473_v25, %v472_v28 }
 0x10a   : > { %v6142_v33 = vpack.c.bf16 %v421_v26, %v420_v23  ;;  %v6195_v26 = vpack.c.bf16 %v481_v13, %v480_v12  ;;  %v6199_v29 = vpop.trf.xlu1  ;;  %v1515_v12 = vld [vmem:[#allocation2 + $0x1a] sm:$0xff]  ;;  %v1521_v51 = vld [vmem:[#allocation2 + $0x62] sm:$0xff] }
 0x10b   : > { %8754 = vst [vmem:[#allocation27_spill] sm:$0xff] %v6199_v29  ;;  %v386_v35 = vld [vmem:[#allocation2 + $0x12f] sm:$0x1] }
 0x10c   : > { %324 = vst.msk [vmem:[#allocation2 + $0x139] sm:$0xff] %vm299_vm0, %v6199_v29 }
 0x10d   : > { %5388 = vmatmul.msk.bf16.gmra.mxu0 %vm299_vm0, %v6076_v58  ;;  %v6084_v61 = vpop.trf.xlu0  ;;  %404 = vst.msk [vmem:[#allocation2 + $0x131] sm:$0x1] %vm355_vm1, %v386_v35 }
 0x10e   : > { %5412 = vmatmul.msk.bf16.gmra.mxu1 %vm299_vm0, %v6078_v59  ;;  %v343_v60 = vld [vmem:[#allocation2 + $0x92] sm:$0x1]  ;;  %8742 = vst [vmem:[#allocation15_spill] sm:$0xff] %v6084_v61 }
 0x10f   : > { %362 = vst.msk [vmem:[#allocation2 + $0x90] sm:$0x1] %vm355_vm1, %v343_v60 }
 0x110   : > { %311 = vst.msk [vmem:[#allocation2 + $0x99] sm:$0xff] %vm299_vm0, %v6084_v61 }
 0x113   : > { %v350_v43 = vld [vmem:[#allocation2 + $0x13a] sm:$0x1] }
 0x114   : > { %369 = vst.msk [vmem:[#allocation2 + $0x138] sm:$0x1] %vm355_vm1, %v350_v43 }
 0x115   : > { %v6094_v0 = vpop.trf.xlu0 }
 0x116   : > { %8744 = vst [vmem:[#allocation17_spill] sm:$0xff] %v6094_v0  ;;  %v422_v46 = vld [vmem:[#allocation2 + $0x90] sm:$0xff] }
 0x117   : > { %v380_v2 = vld [vmem:[#allocation2 + $0x9f] sm:$0x1]  ;;  %312 = vst.msk [vmem:[#allocation2 + $0xa9] sm:$0xff] %vm299_vm0, %v6094_v0  ;;  %v1525_v31 = vld [vmem:[#allocation2 + $0x92] sm:$0xff] }
 0x118   : > { %398 = vst.msk [vmem:[#allocation2 + $0xa1] sm:$0x1] %vm355_vm1, %v380_v2  ;;  %v475_v45 = vld [vmem:[#allocation2 + $0x99] sm:$0xff]  ;;  %v474_v2 = vld [vmem:[#allocation2 + $0x91] sm:$0xff] }
 0x119   : > { %v423_v52 = vld [vmem:[#allocation2 + $0x98] sm:$0xff]  ;;  %v6177_v4 = vpack.c.bf16 %v475_v45, %v474_v2  ;;  %v6216_v45 = vpop.trf.xlu1 }
 0x11a   : > { %v6181_v6 = vpack.c.bf16 %v423_v52, %v422_v46  ;;  %8755 = vst [vmem:[#allocation28_spill] sm:$0xff] %v6216_v45  ;;  %v482_v46 = vld [vmem:[#allocation2 + $0xf1] sm:$0xff] }
 0x11b   : > { %325 = vst.msk [vmem:[#allocation2 + $0x141] sm:$0xff] %vm299_vm0, %v6216_v45  ;;  %v430_v52 = vld [vmem:[#allocation2 + $0xf0] sm:$0xff] }
 0x11d   : > { %5389 = vmatmul.msk.bf16.gmra.mxu0 %vm299_vm0, %v6103_v8  ;;  %v6121_v17 = vpop.trf.xlu0 }
 0x11e   : > { %5413 = vmatmul.msk.bf16.gmra.mxu1 %vm299_vm0, %v6105_v9  ;;  %v344_v16 = vld [vmem:[#allocation2 + $0xaa] sm:$0x1]  ;;  %8746 = vst [vmem:[#allocation19_spill] sm:$0xff] %v6121_v17 }
 0x11f   : > { %363 = vst.msk [vmem:[#allocation2 + $0xa8] sm:$0x1] %vm355_vm1, %v344_v16  ;;  %v428_v16 = vld [vmem:[#allocation2 + $0xd8] sm:$0xff]  ;;  %v476_v34 = vld [vmem:[#allocation2 + $0xa9] sm:$0xff] }
 0x120   : > { %313 = vst.msk [vmem:[#allocation2 + $0xb1] sm:$0xff] %vm299_vm0, %v6121_v17  ;;  %v6197_v28 = vpack.c.bf16 %v429_v19, %v428_v16  ;;  %v1526_v29 = vld [vmem:[#allocation2 + $0x9a] sm:$0xff] }
 0x121   : > { %v6225_v2 = vpop.trf.xlu1 }
 0x122   : > { %8756 = vst [vmem:[#allocation29_spill] sm:$0xff] %v6225_v2  ;;  %v387_v13 = vld [vmem:[#allocation2 + $0x147] sm:$0x1] }
 0x123   : > { %326 = vst.msk [vmem:[#allocation2 + $0x151] sm:$0xff] %vm299_vm0, %v6225_v2 }
 0x124   : > { %405 = vst.msk [vmem:[#allocation2 + $0x149] sm:$0x1] %vm355_vm1, %v387_v13 }
 0x125   : > { %v6131_v22 = vpop.trf.xlu0 }
 0x126   : > { %8748 = vst [vmem:[#allocation21_spill] sm:$0xff] %v6131_v22 }
 0x127   : > { %v381_v24 = vld [vmem:[#allocation2 + $0xb7] sm:$0x1]  ;;  %314 = vst.msk [vmem:[#allocation2 + $0xc1] sm:$0xff] %vm299_vm0, %v6131_v22  ;;  %v1527_v44 = vld [vmem:[#allocation2 + $0xaa] sm:$0xff] }
 0x128   : > { %399 = vst.msk [vmem:[#allocation2 + $0xb9] sm:$0x1] %vm355_vm1, %v381_v24  ;;  %v477_v23 = vld [vmem:[#allocation2 + $0xb1] sm:$0xff]  ;;  %v424_v24 = vld [vmem:[#allocation2 + $0xa8] sm:$0xff] }
 0x129   : > { %v425_v25 = vld [vmem:[#allocation2 + $0xb0] sm:$0xff] }
 0x12a   : > { %v6207_v42 = vpack.c.bf16 %v425_v25, %v424_v24  ;;  %v5879_v24 = vld [vmem:[%s8683_s1 + $0x30] sm:$0xff] }
 0x12b   : > { %1167 = vmatpush.bf16.msrb.mxu3 %v5879_v24  ;;  %v351_v25 = vld [vmem:[#allocation2 + $0x152] sm:$0x1] }
 0x12c   : > { %370 = vst.msk [vmem:[#allocation2 + $0x150] sm:$0x1] %vm355_vm1, %v351_v25  ;;  %v1517_v24 = vld [vmem:[#allocation2 + $0x32] sm:$0xff] }
 0x12d   : > { %5390 = vmatmul.msk.bf16.gmra.mxu0 %vm299_vm0, %v6140_v32  ;;  %v6155_v39 = vpop.trf.xlu0 }
 0x12e   : > { %5414 = vmatmul.msk.bf16.gmra.mxu1 %vm299_vm0, %v6142_v33  ;;  %v345_v36 = vld [vmem:[#allocation2 + $0xc2] sm:$0x1]  ;;  %8750 = vst [vmem:[#allocation23_spill] sm:$0xff] %v6155_v39 }
 0x12f   : > { %364 = vst.msk [vmem:[#allocation2 + $0xc0] sm:$0x1] %vm355_vm1, %v345_v36  ;;  %v478_v49 = vld [vmem:[#allocation2 + $0xc1] sm:$0xff]  ;;  %v6203_v36 = vpack.c.bf16 %v477_v23, %v476_v34  ;;  %v6248_v34 = vpop.trf.xlu1 }
 0x130   : > { %315 = vst.msk [vmem:[#allocation2 + $0xc9] sm:$0xff] %vm299_vm0, %v6155_v39  ;;  %v5877_v23 = vld [vmem:[%s8683_s1 + $0x20] sm:$0xff]  ;;  %v1520_v39 = vld [vmem:[#allocation2 + $0x52] sm:$0xff] }
 0x131   : > { %933 = vmatpush.bf16.msrb.mxu2 %v5877_v23  ;;  %8757 = vst [vmem:[#allocation30_spill] sm:$0xff] %v6248_v34 }
 0x132   : > { %327 = vst.msk [vmem:[#allocation2 + $0x159] sm:$0xff] %vm299_vm0, %v6248_v34 }
 0x136   : > { %v426_v53 = vld [vmem:[#allocation2 + $0xc0] sm:$0xff] }
 0x137   : > { %v382_v54 = vld [vmem:[#allocation2 + $0xcf] sm:$0x1]  ;;  %v1529_v27 = vld [vmem:[#allocation2 + $0xc2] sm:$0xff] }
 0x138   : > { %v479_v55 = vld [vmem:[#allocation2 + $0xc9] sm:$0xff]  ;;  %400 = vst.msk [vmem:[#allocation2 + $0xd1] sm:$0x1] %vm355_vm1, %v382_v54 }
 0x139   : > { %v427_v57 = vld [vmem:[#allocation2 + $0xc8] sm:$0xff]  ;;  %v6169_v60 = vpack.c.bf16 %v479_v55, %v478_v49  ;;  %v483_v49 = vld [vmem:[#allocation2 + $0xf9] sm:$0xff] }
 0x13a   : > { %v6171_v62 = vpack.c.bf16 %v427_v57, %v426_v53  ;;  %v431_v53 = vld [vmem:[#allocation2 + $0xf8] sm:$0xff]  ;;  %v1516_v54 = vld [vmem:[#allocation2 + $0x22] sm:$0xff]  ;;  %v6221_v55 = vpack.c.bf16 %v483_v49, %v482_v46 }
 0x13b   : > { %5393 = vmatmul.msk.bf16.vlgmr.msra.gmra.mxu2 %vm299_vm0, %v6169_v60  ;;  %v6223_v57 = vpack.c.bf16 %v431_v53, %v430_v52  ;;  %v6235_v19 = vpack.c.bf16 %v1516_v54, %v1515_v12  ;;  %v485_v49 = vld [vmem:[#allocation2 + $0x111] sm:$0xff]  ;;  %v432_v52 = vld [vmem:[#allocation2 + $0x108] sm:$0xff]  ;;  %v1518_v54 = vld [vmem:[#allocation2 + $0x3a] sm:$0xff]  ;;  %v6259_v12 = vpop.trf.xlu1 }
 0x13c   : > { %5417 = vmatmul.msk.bf16.vlgmr.msra.gmra.mxu3 %vm299_vm0, %v6171_v62  ;;  %v433_v53 = vld [vmem:[#allocation2 + $0x110] sm:$0xff]  ;;  %8758 = vst [vmem:[#allocation31_spill] sm:$0xff] %v6259_v12  ;;  %v388_v25 = vld [vmem:[#allocation2 + $0x15f] sm:$0x1] }
 0x13d   : > { %5391 = vmatmul.msk.bf16.gmra.mxu0 %vm299_vm0, %v6177_v4  ;;  %328 = vst.msk [vmem:[#allocation2 + $0x169] sm:$0xff] %vm299_vm0, %v6259_v12 }
 0x13e   : > { %5415 = vmatmul.msk.bf16.gmra.mxu1 %vm299_vm0, %v6181_v6  ;;  %406 = vst.msk [vmem:[#allocation2 + $0x161] sm:$0x1] %vm355_vm1, %v388_v25  ;;  %v435_v25 = vld [vmem:[#allocation2 + $0x128] sm:$0xff] }
 0x13f   : > { %335 = vst.msk [vmem:[#allocation2 + $0x199] sm:$0xff] %vm299_vm0, %v6259_v12 }
 0x14b   : > { %5394 = vmatmul.msk.bf16.gmra.mxu2 %vm299_vm0, %v6195_v26 }
 0x14c   : > { %5418 = vmatmul.msk.bf16.gmra.mxu3 %vm299_vm0, %v6197_v28 }
 0x14d   : > { %5392 = vmatmul.msk.bf16.gmra.mxu0 %vm299_vm0, %v6203_v36 }
 0x14e   : > { %5416 = vmatmul.msk.bf16.gmra.mxu1 %vm299_vm0, %v6207_v42 }
 0x15a   : > { %v584_v3 = vpop.f32.mrf.mxu0 }
 0x15b   : > { %v733_v7 = vpop.f32.mrf.mxu1  ;;  %5395 = vmatmul.msk.bf16.gmra.mxu2 %vm299_vm0, %v6221_v55 }
 0x15c   : > { %v6229_v16 = vadd.f32 %v733_v7, %v584_v3  ;;  %5419 = vmatmul.msk.bf16.gmra.mxu3 %vm299_vm0, %v6223_v57  ;;  %v6257_v7 = vpack.c.bf16 %v433_v53, %v432_v52 }
 0x15d   : > { %5493 = vmatmul.msk.bf16.vlgmr.msrb.gmra.mxu0 %vm299_vm0, %v6036_v37  ;;  %v484_v37 = vld [vmem:[#allocation2 + $0x109] sm:$0xff] }
 0x15e   : > { %5521 = vmatmul.msk.bf16.vlgmr.msrb.gmra.mxu1 %vm299_vm0, %v6235_v19  ;;  %v6255_v3 = vpack.c.bf16 %v485_v49, %v484_v37  ;;  %v352_v37 = vld [vmem:[#allocation2 + $0x16a] sm:$0x1]  ;;  %v6278_v49 = vpop.trf.xlu1 }
 0x15f   : > { %8759 = vst [vmem:[#allocation32_spill] sm:$0xff] %v6278_v49 }
 0x160   : > { %371 = vst.msk [vmem:[#allocation2 + $0x168] sm:$0x1] %vm355_vm1, %v352_v37 }
 0x161   : > { %329 = vst.msk [vmem:[#allocation2 + $0x171] sm:$0xff] %vm299_vm0, %v6278_v49 }
 0x162   : > { %v586_v35 = vpop.f32.mrf.mxu0  ;;  %336 = vst.msk [vmem:[#allocation2 + $0x1a1] sm:$0xff] %vm299_vm0, %v6278_v49  ;;  %v436_v49 = vld [vmem:[#allocation2 + $0x138] sm:$0xff] }
 0x163   : > { %v735_v43 = vpop.f32.mrf.mxu1 }
 0x164   : > { %v6251_v46 = vadd.f32 %v735_v43, %v586_v35  ;;  %v6269_v43 = vpack.c.bf16 %v1518_v54, %v1517_v24  ;;  %v434_v24 = vld [vmem:[#allocation2 + $0x120] sm:$0xff] }
 0x165   : > { %v6290_v17 = vpack.c.bf16 %v435_v25, %v434_v24 }
 0x168   : > { %v389_v0 = vld [vmem:[#allocation2 + $0x177] sm:$0x1] }
 0x169   : > { %407 = vst.msk [vmem:[#allocation2 + $0x179] sm:$0x1] %vm355_vm1, %v389_v0 }
 0x16a   : > { %v589_v13 = vpop.f32.mrf.mxu0 }
 0x16b   : > { %v738_v23 = vpop.f32.mrf.mxu1  ;;  %5396 = vmatmul.msk.bf16.gmra.mxu2 %vm299_vm0, %v6255_v3 }
 0x16c   : > { %v6263_v35 = vadd.f32 %v738_v23, %v589_v13  ;;  %5420 = vmatmul.msk.bf16.gmra.mxu3 %vm299_vm0, %v6257_v7  ;;  %v354_v13 = vld [vmem:[#allocation2 + $0x19a] sm:$0x1]  ;;  %v486_v23 = vld [vmem:[#allocation2 + $0x121] sm:$0xff] }
 0x16d   : > { %5494 = vmatmul.msk.bf16.gmra.mxu0 %vm299_vm0, %v6054_v47  ;;  %373 = vst.msk [vmem:[#allocation2 + $0x198] sm:$0x1] %vm355_vm1, %v354_v13  ;;  %v487_v47 = vld [vmem:[#allocation2 + $0x129] sm:$0xff] }
 0x16e   : > { %5522 = vmatmul.msk.bf16.gmra.mxu1 %vm299_vm0, %v6269_v43  ;;  %v6288_v22 = vpack.c.bf16 %v487_v47, %v486_v23  ;;  %v391_v23 = vld [vmem:[#allocation2 + $0x1a7] sm:$0x1] }
 0x16f   : > { %409 = vst.msk [vmem:[#allocation2 + $0x1a9] sm:$0x1] %vm355_vm1, %v391_v23 }
 0x172   : > { %v591_v52 = vpop.f32.mrf.mxu0 }
 0x173   : > { %v740_v53 = vpop.f32.mrf.mxu1 }
 0x174   : > { %v6281_v54 = vadd.f32 %v740_v53, %v591_v52  ;;  %v1519_v53 = vld [vmem:[#allocation2 + $0x4a] sm:$0xff] }
 0x175   : > { %v6298_v13 = vpack.c.bf16 %v1520_v39, %v1519_v53  ;;  %v437_v39 = vld [vmem:[#allocation2 + $0x140] sm:$0xff]  ;;  %v1522_v53 = vld [vmem:[#allocation2 + $0x6a] sm:$0xff] }
 0x176   : > { %v6310_v0 = vpack.c.bf16 %v437_v39, %v436_v49  ;;  %v6318_v23 = vpack.c.bf16 %v1522_v53, %v1521_v51  ;;  %v439_v39 = vld [vmem:[#allocation2 + $0x158] sm:$0xff] }
 0x17a   : > { %v594_v37 = vpop.f32.mrf.mxu0 }
 0x17b   : > { %v743_v52 = vpop.f32.mrf.mxu1  ;;  %5397 = vmatmul.msk.bf16.gmra.mxu2 %vm299_vm0, %v6288_v22 }
 0x17c   : > { %v6292_v12 = vadd.f32 %v743_v52, %v594_v37  ;;  %5421 = vmatmul.msk.bf16.gmra.mxu3 %vm299_vm0, %v6290_v17  ;;  %v488_v37 = vld [vmem:[#allocation2 + $0x139] sm:$0xff]  ;;  %v489_v52 = vld [vmem:[#allocation2 + $0x141] sm:$0xff] }
 0x17d   : > { %5495 = vmatmul.msk.bf16.gmra.mxu0 %vm299_vm0, %v6076_v58  ;;  %v6308_v61 = vpack.c.bf16 %v489_v52, %v488_v37  ;;  %v491_v37 = vld [vmem:[#allocation2 + $0x159] sm:$0xff]  ;;  %v438_v52 = vld [vmem:[#allocation2 + $0x150] sm:$0xff] }
 0x17e   : > { %5523 = vmatmul.msk.bf16.gmra.mxu1 %vm299_vm0, %v6298_v13  ;;  %v6328_v45 = vpack.c.bf16 %v439_v39, %v438_v52  ;;  %v492_v39 = vld [vmem:[#allocation2 + $0x169] sm:$0xff] }
 0x182   : > { %v596_v47 = vpop.f32.mrf.mxu0 }
 0x183   : > { %v745_v24 = vpop.f32.mrf.mxu1 }
 0x184   : > { %v6306_v25 = vadd.f32 %v745_v24, %v596_v47 }
 0x18a   : > { %v599_v34 = vpop.f32.mrf.mxu0 }
 0x18b   : > { %v748_v58 = vpop.f32.mrf.mxu1  ;;  %5398 = vmatmul.msk.bf16.gmra.mxu2 %vm299_vm0, %v6308_v61 }
 0x18c   : > { %v6312_v2 = vadd.f32 %v748_v58, %v599_v34  ;;  %5422 = vmatmul.msk.bf16.gmra.mxu3 %vm299_vm0, %v6310_v0  ;;  %v490_v34 = vld [vmem:[#allocation2 + $0x151] sm:$0xff]  ;;  %v1524_v58 = vld [vmem:[#allocation2 + $0x82] sm:$0xff] }
 0x18d   : > { %5496 = vmatmul.msk.bf16.gmra.mxu0 %vm299_vm0, %v6103_v8  ;;  %v6326_v50 = vpack.c.bf16 %v491_v37, %v490_v34  ;;  %v5888_v34 = vld [vmem:[%s8683_s1 + $0x78] sm:$0xff] }
 0x18e   : > { %5524 = vmatmul.msk.bf16.gmra.mxu1 %vm299_vm0, %v6318_v23  ;;  %2103 = vmatpush.bf16.msra.mxu3 %v5888_v34 }
 0x192   : > { %v601_v49 = vpop.f32.mrf.mxu0 }
 0x193   : > { %v750_v47 = vpop.f32.mrf.mxu1 }
 0x194   : > { %v6324_v24 = vadd.f32 %v750_v47, %v601_v49  ;;  %v6336_v49 = vpack.c.bf16 %v1524_v58, %v1523_v41  ;;  %v5886_v47 = vld [vmem:[%s8683_s1 + $0x68] sm:$0xff]  ;;  %v493_v58 = vld [vmem:[#allocation2 + $0x171] sm:$0xff] }
 0x195   : > { %1869 = vmatpush.bf16.msra.mxu2 %v5886_v47  ;;  %v6353_v40 = vpack.c.bf16 %v493_v58, %v492_v39  ;;  %v814_v58 = vld [vmem:[#allocation2 + $0xa] sm:$0xff] }
 0x19a   : > { %v604_v51 = vpop.f32.mrf.mxu0 }
 0x19b   : > { %v753_v53 = vpop.f32.mrf.mxu1  ;;  %5399 = vmatmul.msk.bf16.gmra.mxu2 %vm299_vm0, %v6326_v50 }
 0x19c   : > { %v6330_v8 = vadd.f32 %v753_v53, %v604_v51  ;;  %5423 = vmatmul.msk.bf16.gmra.mxu3 %vm299_vm0, %v6328_v45  ;;  %v440_v51 = vld [vmem:[#allocation2 + $0x168] sm:$0xff]  ;;  %v441_v53 = vld [vmem:[#allocation2 + $0x170] sm:$0xff] }
 0x19d   : > { %5497 = vmatmul.msk.bf16.gmra.mxu0 %vm299_vm0, %v6140_v32  ;;  %v5890_v32 = vld [vmem:[%s8683_s1 + $0x88] sm:$0xff]  ;;  %v6355_v11 = vpack.c.bf16 %v441_v53, %v440_v51  ;;  %v1528_v53 = vld [vmem:[#allocation2 + $0xb2] sm:$0xff] }
 0x19e   : > { %5525 = vmatmul.msk.bf16.gmra.mxu1 %vm299_vm0, %v6336_v49  ;;  %2337 = vmatpush.bf16.msra.mxu0 %v5890_v32  ;;  %v813_v51 = vld [vmem:[#allocation2 + $0x2] sm:$0xff] }
 0x1a2   : > { %v606_v37 = vpop.f32.mrf.mxu0 }
 0x1a3   : > { %v755_v52 = vpop.f32.mrf.mxu1 }
 0x1a4   : > { %v6348_v41 = vadd.f32 %v755_v52, %v606_v37  ;;  %v6363_v37 = vpack.c.bf16 %v1526_v29, %v1525_v31  ;;  %v6376_v31 = vpack.c.bf16 %v1528_v53, %v1527_v44 }
 0x1aa   : > { %v609_v47 = vpop.f32.mrf.mxu0 }
 0x1ab   : > { %v758_v34 = vpop.f32.mrf.mxu1  ;;  %5400 = vmatmul.msk.bf16.gmra.mxu2 %vm299_vm0, %v6353_v40 }
 0x1ac   : > { %v6357_v1 = vadd.f32 %v758_v34, %v609_v47  ;;  %5424 = vmatmul.msk.bf16.gmra.mxu3 %vm299_vm0, %v6355_v11  ;;  %v845_v47 = vpack.c.bf16 %v814_v58, %v813_v51 }
 0x1ad   : > { %5498 = vmatmul.msk.bf16.gmra.mxu0 %vm299_vm0, %v6177_v4 }
 0x1ae   : > { %5526 = vmatmul.msk.bf16.gmra.mxu1 %vm299_vm0, %v6363_v37 }
 0x1b2   : > { %v611_v52 = vpop.f32.mrf.mxu0 }
 0x1b3   : > { %v760_v32 = vpop.f32.mrf.mxu1 }
 0x1b4   : > { %v6369_v39 = vadd.f32 %v760_v32, %v611_v52 }
 0x1ba   : > { %v614_v34 = vpop.f32.mrf.mxu0 }
 0x1bb   : > { %v763_v30 = vpop.f32.mrf.mxu1  ;;  %5437 = vmatmul.msk.bf16.vlgmr.msrb.gmra.mxu2 %vm299_vm0, %v845_v47 }
 0x1bc   : > { %v6371_v20 = vadd.f32 %v763_v30, %v614_v34  ;;  %5465 = vmatmul.msk.bf16.vlgmr.msrb.gmra.mxu3 %vm299_vm0, %v6038_v38  ;;  %v1530_v38 = vld [vmem:[#allocation2 + $0xca] sm:$0xff] }
 0x1bd   : > { %5499 = vmatmul.msk.bf16.gmra.mxu0 %vm299_vm0, %v6203_v36 }
 0x1be   : > { %5527 = vmatmul.msk.bf16.gmra.mxu1 %vm299_vm0, %v6376_v31  ;;  %v624_v4 = vpop.f32.mrf.mxu2 }
 0x1bf   : > { %v773_v29 = vpop.f32.mrf.mxu3 }
 0x1c0   : > { %v6382_v52 = vadd.f32 %v773_v29, %v624_v4  ;;  %v6394_v4 = vpack.c.bf16 %v1530_v38, %v1529_v27  ;;  %v1532_v27 = vld [vmem:[#allocation2 + $0xe2] sm:$0xff] }
 0x1c2   : > { %v616_v32 = vpop.f32.mrf.mxu0 }
 0x1c3   : > { %v765_v30 = vpop.f32.mrf.mxu1 }
 0x1c4   : > { %v6384_v58 = vadd.f32 %v765_v30, %v616_v32 }
 0x1c6   : > { %v626_v51 = vpop.f32.mrf.mxu2 }
 0x1c7   : > { %v775_v47 = vpop.f32.mrf.mxu3 }
 0x1c8   : > { %v6386_v34 = vadd.f32 %v775_v47, %v626_v51 }
 0x1ca   : > { %v619_v44 = vpop.f32.mrf.mxu0 }
 0x1cb   : > { %v768_v53 = vpop.f32.mrf.mxu1  ;;  %5438 = vmatmul.msk.bf16.gmra.mxu2 %vm299_vm0, %v6235_v19 }
 0x1cc   : > { %v6388_v36 = vadd.f32 %v768_v53, %v619_v44  ;;  %5466 = vmatmul.msk.bf16.gmra.mxu3 %vm299_vm0, %v6056_v48  ;;  %v1531_v48 = vld [vmem:[#allocation2 + $0xda] sm:$0xff] }
 0x1cd   : > { %5500 = vmatmul.msk.bf16.gmra.mxu0 %vm299_vm0, %v6169_v60  ;;  %v6412_v60 = vpack.c.bf16 %v1532_v27, %v1531_v48 }
 0x1ce   : > { %5528 = vmatmul.msk.bf16.gmra.mxu1 %vm299_vm0, %v6394_v4  ;;  %v629_v29 = vpop.f32.mrf.mxu2 }
 0x1cf   : > { %v778_v32 = vpop.f32.mrf.mxu3 }
 0x1d0   : > { %v6400_v30 = vadd.f32 %v778_v32, %v629_v29 }
 0x1d2   : > { %v621_v51 = vpop.f32.mrf.mxu0 }
 0x1d3   : > { %v770_v47 = vpop.f32.mrf.mxu1 }
 0x1d4   : > { %v6402_v44 = vadd.f32 %v770_v47, %v621_v51 }
 0x1d6   : > { %v631_v19 = vpop.f32.mrf.mxu2 }
 0x1d7   : > { %v780_v53 = vpop.f32.mrf.mxu3 }
 0x1d8   : > { %v6404_v18 = vadd.f32 %v780_v53, %v631_v19 }
 0x1da   : > { %v6406_v38 = vpop.f32.mrf.mxu0 }
 0x1db   : > { %8760 = vst [vmem:[#allocation33_spill] sm:$0xff] %v6406_v38  ;;  %5439 = vmatmul.msk.bf16.gmra.mxu2 %vm299_vm0, %v6269_v43 }
 0x1dc   : > { %5467 = vmatmul.msk.bf16.gmra.mxu3 %vm299_vm0, %v6078_v59  ;;  %v1534_v59 = vld [vmem:[#allocation2 + $0xfa] sm:$0xff] }
 0x1dd   : > { %5501 = vmatmul.msk.bf16.gmra.mxu0 %vm299_vm0, %v6195_v26  ;;  %v6430_v26 = vpack.c.bf16 %v1534_v59, %v1533_v15 }
 0x1de   : > { %5529 = vmatmul.msk.bf16.gmra.mxu1 %vm299_vm0, %v6412_v60  ;;  %v634_v29 = vpop.f32.mrf.mxu2 }
 0x1df   : > { %v783_v32 = vpop.f32.mrf.mxu3 }
 0x1e0   : > { %v6418_v51 = vadd.f32 %v783_v32, %v634_v29 }
 0x1e2   : > { %v6420_v47 = vpop.f32.mrf.mxu0 }
 0x1e3   : > { %8761 = vst [vmem:[#allocation34_spill] sm:$0xff] %v6420_v47  ;;  %v1543_v47 = vld [vmem:[#allocation2 + $0x16a] sm:$0xff] }
 0x1e6   : > { %v636_v19 = vpop.f32.mrf.mxu2 }
 0x1e7   : > { %v785_v53 = vpop.f32.mrf.mxu3 }
 0x1e8   : > { %v6422_v21 = vadd.f32 %v785_v53, %v636_v19 }
 0x1ea   : > { %v6424_v48 = vpop.f32.mrf.mxu0 }
 0x1eb   : > { %8762 = vst [vmem:[#allocation35_spill] sm:$0xff] %v6424_v48  ;;  %5440 = vmatmul.msk.bf16.gmra.mxu2 %vm299_vm0, %v6298_v13 }
 0x1ec   : > { %5468 = vmatmul.msk.bf16.gmra.mxu3 %vm299_vm0, %v6105_v9  ;;  %v1536_v9 = vld [vmem:[#allocation2 + $0x112] sm:$0xff] }
 0x1ed   : > { %5502 = vmatmul.msk.bf16.gmra.mxu0 %vm299_vm0, %v6221_v55  ;;  %v6448_v55 = vpack.c.bf16 %v1536_v9, %v1535_v63  ;;  %v6462_v9 = vpop.f32.mrf.mxu1 }
 0x1ee   : > { %5530 = vmatmul.msk.bf16.gmra.mxu1 %vm299_vm0, %v6430_v26  ;;  %v639_v27 = vpop.f32.mrf.mxu2  ;;  %8767 = vst [vmem:[#allocation40_spill] sm:$0xff] %v6462_v9 }
 0x1ef   : > { %v788_v29 = vpop.f32.mrf.mxu3 }
 0x1f0   : > { %v6436_v32 = vadd.f32 %v788_v29, %v639_v27 }
 0x1f2   : > { %v6438_v19 = vpop.f32.mrf.mxu0 }
 0x1f3   : > { %8763 = vst [vmem:[#allocation36_spill] sm:$0xff] %v6438_v19 }
 0x1f6   : > { %v641_v53 = vpop.f32.mrf.mxu2 }
 0x1f7   : > { %v790_v5 = vpop.f32.mrf.mxu3 }
 0x1f8   : > { %v6440_v14 = vadd.f32 %v790_v5, %v641_v53 }
 0x1fa   : > { %v6442_v15 = vpop.f32.mrf.mxu0 }
 0x1fb   : > { %8764 = vst [vmem:[#allocation37_spill] sm:$0xff] %v6442_v15  ;;  %5441 = vmatmul.msk.bf16.gmra.mxu2 %vm299_vm0, %v6318_v23  ;;  %v1537_v15 = vld [vmem:[#allocation2 + $0x122] sm:$0xff] }
 0x1fc   : > { %5469 = vmatmul.msk.bf16.gmra.mxu3 %vm299_vm0, %v6142_v33  ;;  %v1538_v33 = vld [vmem:[#allocation2 + $0x12a] sm:$0xff] }
 0x1fd   : > { %5503 = vmatmul.msk.bf16.gmra.mxu0 %vm299_vm0, %v6255_v3  ;;  %v6468_v3 = vpack.c.bf16 %v1538_v33, %v1537_v15  ;;  %v1539_v15 = vld [vmem:[#allocation2 + $0x13a] sm:$0xff]  ;;  %v1540_v33 = vld [vmem:[#allocation2 + $0x142] sm:$0xff] }
 0x1fe   : > { %5531 = vmatmul.msk.bf16.gmra.mxu1 %vm299_vm0, %v6448_v55  ;;  %v644_v5 = vpop.f32.mrf.mxu2 }
 0x1ff   : > { %v793_v59 = vpop.f32.mrf.mxu3 }
 0x200   : > { %v6454_v27 = vadd.f32 %v793_v59, %v644_v5 }
 0x202   : > { %v6456_v29 = vpop.f32.mrf.mxu0 }
 0x203   : > { %8765 = vst [vmem:[#allocation38_spill] sm:$0xff] %v6456_v29 }
 0x206   : > { %v646_v53 = vpop.f32.mrf.mxu2 }
 0x207   : > { %v795_v10 = vpop.f32.mrf.mxu3 }
 0x208   : > { %v6458_v56 = vadd.f32 %v795_v10, %v646_v53 }
 0x20a   : > { %v6460_v63 = vpop.f32.mrf.mxu0 }
 0x20b   : > { %8766 = vst [vmem:[#allocation39_spill] sm:$0xff] %v6460_v63  ;;  %5442 = vmatmul.msk.bf16.gmra.mxu2 %vm299_vm0, %v6336_v49  ;;  %v6478_v63 = vpop.f32.mrf.mxu1 }
 0x20c   : > { %5470 = vmatmul.msk.bf16.gmra.mxu3 %vm299_vm0, %v6181_v6  ;;  %8769 = vst [vmem:[#allocation42_spill] sm:$0xff] %v6478_v63  ;;  %v6482_v6 = vpop.trf.xlu1 }
 0x20d   : > { %5504 = vmatmul.msk.bf16.gmra.mxu0 %vm299_vm0, %v6288_v22  ;;  %8770 = vst [vmem:[#allocation43_spill] sm:$0xff] %v6482_v6 }
 0x20e   : > { %5532 = vmatmul.msk.bf16.gmra.mxu1 %vm299_vm0, %v6468_v3  ;;  %v649_v10 = vpop.f32.mrf.mxu2  ;;  %330 = vst.msk [vmem:[#allocation2 + $0x181] sm:$0xff] %vm299_vm0, %v6482_v6 }
 0x20f   : > { %v798_v5 = vpop.f32.mrf.mxu3 }
 0x210   : > { %v6474_v59 = vadd.f32 %v798_v5, %v649_v10  ;;  %v6492_v10 = vpack.c.bf16 %v1540_v33, %v1539_v15 }
 0x212   : > { %v6476_v53 = vpop.f32.mrf.mxu0 }
 0x213   : > { %8768 = vst [vmem:[#allocation41_spill] sm:$0xff] %v6476_v53  ;;  %v5889_v53 = vld [vmem:[%s8683_s1 + $0x80] sm:$0xff] }
 0x214   : > { %v6511_v33 = vpop.trf.xlu1  ;;  %2338 = vmatpush.bf16.msra.mxu0 %v5889_v53 }
 0x215   : > { %v353_v15 = vld [vmem:[#allocation2 + $0x182] sm:$0x1]  ;;  %8774 = vst [vmem:[#allocation47_spill] sm:$0xff] %v6511_v33 }
 0x216   : > { %v651_v29 = vpop.f32.mrf.mxu2  ;;  %372 = vst.msk [vmem:[#allocation2 + $0x180] sm:$0x1] %vm355_vm1, %v353_v15 }
 0x217   : > { %v800_v19 = vpop.f32.mrf.mxu3  ;;  %331 = vst.msk [vmem:[#allocation2 + $0x189] sm:$0xff] %vm299_vm0, %v6511_v33 }
 0x218   : > { %v6480_v48 = vadd.f32 %v800_v19, %v651_v29  ;;  %v5885_v19 = vld [vmem:[%s8683_s1 + $0x60] sm:$0xff]  ;;  %v5887_v29 = vld [vmem:[%s8683_s1 + $0x70] sm:$0xff] }
 0x219   : > { %1870 = vmatpush.bf16.msra.mxu2 %v5885_v19  ;;  %2104 = vmatpush.bf16.msra.mxu3 %v5887_v29  ;;  %v1541_v19 = vld [vmem:[#allocation2 + $0x152] sm:$0xff]  ;;  %v1542_v29 = vld [vmem:[#allocation2 + $0x15a] sm:$0xff] }
 0x21a   : > { %v6486_v22 = vpop.f32.mrf.mxu0 }
 0x21b   : > { %8771 = vst [vmem:[#allocation44_spill] sm:$0xff] %v6486_v22  ;;  %5443 = vmatmul.msk.bf16.gmra.mxu2 %vm299_vm0, %v6363_v37  ;;  %v6504_v22 = vpop.f32.mrf.mxu1 }
 0x21c   : > { %5471 = vmatmul.msk.bf16.gmra.mxu3 %vm299_vm0, %v6207_v42  ;;  %8772 = vst [vmem:[#allocation45_spill] sm:$0xff] %v6504_v22 }
 0x21d   : > { %5505 = vmatmul.msk.bf16.gmra.mxu0 %vm299_vm0, %v6308_v61 }
 0x21e   : > { %5533 = vmatmul.msk.bf16.gmra.mxu1 %vm299_vm0, %v6492_v10  ;;  %v654_v5 = vpop.f32.mrf.mxu2  ;;  %v390_v33 = vld [vmem:[#allocation2 + $0x18f] sm:$0x1] }
 0x21f   : > { %v803_v6 = vpop.f32.mrf.mxu3  ;;  %408 = vst.msk [vmem:[#allocation2 + $0x191] sm:$0x1] %vm355_vm1, %v390_v33  ;;  %v1544_v33 = vld [vmem:[#allocation2 + $0x172] sm:$0xff] }
 0x220   : > { %v6506_v42 = vadd.f32 %v803_v6, %v654_v5 }
 0x222   : > { %v6509_v61 = vpop.f32.mrf.mxu0 }
 0x223   : > { %8773 = vst [vmem:[#allocation46_spill] sm:$0xff] %v6509_v61  ;;  %v6520_v63 = vpop.f32.mrf.mxu1  ;;  %v6528_v61 = vpack.c.bf16 %v1542_v29, %v1541_v19 }
 0x224   : > { %8775 = vst [vmem:[#allocation48_spill] sm:$0xff] %v6520_v63 }
 0x226   : > { %v656_v22 = vpop.f32.mrf.mxu2 }
 0x227   : > { %v805_v6 = vpop.f32.mrf.mxu3 }
 0x228   : > { %v6518_v5 = vadd.f32 %v805_v6, %v656_v22 }
 0x22a   : > { %v6522_v15 = vpop.f32.mrf.mxu0 }
 0x22b   : > { %8776 = vst [vmem:[#allocation49_spill] sm:$0xff] %v6522_v15  ;;  %5444 = vmatmul.msk.bf16.gmra.mxu2 %vm299_vm0, %v6376_v31  ;;  %v6539_v63 = vpop.f32.mrf.mxu1 }
 0x22c   : > { %5472 = vmatmul.msk.bf16.gmra.mxu3 %vm299_vm0, %v6171_v62  ;;  %8778 = vst [vmem:[#allocation51_spill] sm:$0xff] %v6539_v63 }
 0x22d   : > { %5506 = vmatmul.msk.bf16.gmra.mxu0 %vm299_vm0, %v6326_v50  ;;  %v6549_v50 = vpack.c.bf16 %v1544_v33, %v1543_v47  ;;  %v1311_v47 = vld [vmem:[#allocation2 + $0x181] sm:$0xff]  ;;  %v1312_v33 = vld [vmem:[#allocation2 + $0x189] sm:$0xff] }
 0x22e   : > { %5534 = vmatmul.msk.bf16.gmra.mxu1 %vm299_vm0, %v6528_v61  ;;  %v659_v53 = vpop.f32.mrf.mxu2 }
 0x22f   : > { %v808_v22 = vpop.f32.mrf.mxu3 }
 0x230   : > { %v6535_v6 = vadd.f32 %v808_v22, %v659_v53 }
 0x232   : > { %v6537_v15 = vpop.f32.mrf.mxu0 }
 0x233   : > { %8777 = vst [vmem:[#allocation50_spill] sm:$0xff] %v6537_v15  ;;  %v6551_v53 = vpop.f32.mrf.mxu1 }
 0x234   : > { %8780 = vst [vmem:[#allocation53_spill] sm:$0xff] %v6551_v53 }
 0x236   : > { %v661_v62 = vpop.f32.mrf.mxu2 }
 0x237   : > { %v810_v19 = vpop.f32.mrf.mxu3 }
 0x238   : > { %v6541_v29 = vadd.f32 %v810_v19, %v661_v62 }
 0x23a   : > { %v6543_v9 = vpop.f32.mrf.mxu0 }
 0x23b   : > { %8779 = vst [vmem:[#allocation52_spill] sm:$0xff] %v6543_v9  ;;  %5445 = vmatmul.msk.bf16.gmra.mxu2 %vm299_vm0, %v6394_v4 }
 0x23c   : > { %5473 = vmatmul.msk.bf16.gmra.mxu3 %vm299_vm0, %v6197_v28 }
 0x23d   : > { %5507 = vmatmul.msk.bf16.gmra.mxu0 %vm299_vm0, %v6353_v40  ;;  %v1328_v40 = vpack.c.bf16 %v1312_v33, %v1311_v47 }
 0x23e   : > { %5535 = vmatmul.msk.bf16.gmra.mxu1 %vm299_vm0, %v6549_v50  ;;  %v935_v22 = vpop.f32.mrf.mxu2 }
 0x23f   : > { %v1169_v62 = vpop.f32.mrf.mxu3  ;;  %v1015_v19 = vadd.f32 %v935_v22, %v6229_v16 }
 0x241   : > { %v6558_v15 = vadd.f32 %v1169_v62, %v1015_v19 }
 0x242   : > { %v6560_v9 = vpop.f32.mrf.mxu0 }
 0x243   : > { %8781 = vst [vmem:[#allocation54_spill] sm:$0xff] %v6560_v9 }
 0x246   : > { %v937_v63 = vpop.f32.mrf.mxu2 }
 0x247   : > { %v1171_v28 = vpop.f32.mrf.mxu3  ;;  %v1016_v53 = vadd.f32 %v937_v63, %v6251_v46 }
 0x249   : > { %v6563_v38 = vadd.f32 %v1171_v28, %v1016_v53  ;;  %v6575_v53 = vpop.f32.mrf.mxu1 }
 0x24a   : > { %v6570_v62 = vpop.f32.mrf.mxu0 }
 0x24b   : > { %5446 = vmatmul.msk.bf16.gmra.mxu2 %vm299_vm0, %v6412_v60 }
 0x24c   : > { %5474 = vmatmul.msk.bf16.gmra.mxu3 %vm299_vm0, %v6223_v57 }
 0x24d   : > { %5508 = vmatmul.msk.bf16.gmra.mxu0 %vm299_vm0, %v1328_v40 }
 0x24e   : > { %v940_v16 = vpop.f32.mrf.mxu2 }
 0x24f   : > { %v1174_v22 = vpop.f32.mrf.mxu3  ;;  %v1017_v19 = vadd.f32 %v940_v16, %v6263_v35 }
 0x251   : > { %v6573_v9 = vadd.f32 %v1174_v22, %v1017_v19  ;;  %v6589_v16 = vpop.f32.mrf.mxu1 }
 0x252   : > { %v6578_v47 = vpop.f32.mrf.mxu0 }
 0x253   : > { %8782 = vst [vmem:[#allocation55_spill] sm:$0xff] %v6578_v47 }
 0x256   : > { %v942_v46 = vpop.f32.mrf.mxu2 }
 0x257   : > { %v1176_v63 = vpop.f32.mrf.mxu3  ;;  %v1018_v28 = vadd.f32 %v942_v46, %v6281_v54 }
 0x259   : > { %v6580_v33 = vadd.f32 %v1176_v63, %v1018_v28 }
 0x25a   : > { %v6593_v22 = vpop.f32.mrf.mxu0 }
 0x25b   : > { %5447 = vmatmul.msk.bf16.gmra.mxu2 %vm299_vm0, %v6430_v26  ;;  %8783 = vst [vmem:[#allocation56_spill] sm:$0xff] %v6593_v22 }
 0x25c   : > { %5475 = vmatmul.msk.bf16.gmra.mxu3 %vm299_vm0, %v6257_v7  ;;  %v6598_v7 = vpop.f32.mrf.mxu1 }
 0x25d   : > { %5605 = vmatmul.msk.bf16.vlgmr.msra.gmra.mxu0 %vm299_vm0, %v6269_v43 }
 0x25e   : > { %v945_v57 = vpop.f32.mrf.mxu2 }
 0x25f   : > { %v1179_v35 = vpop.f32.mrf.mxu3  ;;  %v1019_v40 = vadd.f32 %v945_v57, %v6292_v12 }
 0x261   : > { %v6591_v54 = vadd.f32 %v1179_v35, %v1019_v40 }
 0x262   : > { %v6604_v12 = vpop.f32.mrf.mxu0 }
 0x263   : > { %8784 = vst [vmem:[#allocation57_spill] sm:$0xff] %v6604_v12 }
 0x264   : > { %v6611_v40 = vpop.f32.mrf.mxu1 }
 0x265   : > { %8785 = vst [vmem:[#allocation58_spill] sm:$0xff] %v6611_v40 }
 0x266   : > { %v947_v19 = vpop.f32.mrf.mxu2 }
 0x267   : > { %v1181_v46 = vpop.f32.mrf.mxu3  ;;  %v1020_v63 = vadd.f32 %v947_v19, %v6306_v25 }
 0x269   : > { %v6596_v28 = vadd.f32 %v1181_v46, %v1020_v63 }
 0x26a   : > { %v6613_v63 = vpop.f32.mrf.mxu0 }
 0x26b   : > { %5448 = vmatmul.msk.bf16.gmra.mxu2 %vm299_vm0, %v6448_v55  ;;  %8786 = vst [vmem:[#allocation59_spill] sm:$0xff] %v6613_v63 }
 0x26c   : > { %5476 = vmatmul.msk.bf16.gmra.mxu3 %vm299_vm0, %v6290_v17  ;;  %v6626_v40 = vpop.f32.mrf.mxu1 }
 0x26d   : > { %5606 = vmatmul.msk.bf16.gmra.mxu0 %vm299_vm0, %v6298_v13  ;;  %v1546_v13 = vld [vmem:[#allocation2 + $0x18a] sm:$0xff] }
 0x26e   : > { %v950_v43 = vpop.f32.mrf.mxu2 }
 0x26f   : > { %v1184_v57 = vpop.f32.mrf.mxu3  ;;  %v1021_v35 = vadd.f32 %v950_v43, %v6312_v2  ;;  %v1545_v2 = vld [vmem:[#allocation2 + $0x182] sm:$0xff] }
 0x271   : > { %v6609_v25 = vadd.f32 %v1184_v57, %v1021_v35  ;;  %v6624_v35 = vpack.c.bf16 %v1546_v13, %v1545_v2 }
 0x273   : > { %5536 = vmatmul.msk.bf16.gmra.mxu1 %vm299_vm0, %v6624_v35 }
 0x274   : > { %v6636_v12 = vpop.f32.mrf.mxu1 }
 0x275   : > { %8788 = vst [vmem:[#allocation61_spill] sm:$0xff] %v6636_v12 }
 0x276   : > { %v952_v19 = vpop.f32.mrf.mxu2 }
 0x277   : > { %v1186_v46 = vpop.f32.mrf.mxu3  ;;  %v1022_v47 = vadd.f32 %v952_v19, %v6324_v24 }
 0x279   : > { %v6616_v17 = vadd.f32 %v1186_v46, %v1022_v47  ;;  %v6631_v47 = vpop.f32.mrf.mxu0 }
 0x27a   : > { %8787 = vst [vmem:[#allocation60_spill] sm:$0xff] %v6631_v47 }
 0x27b   : > { %5449 = vmatmul.msk.bf16.gmra.mxu2 %vm299_vm0, %v6468_v3 }
 0x27c   : > { %5477 = vmatmul.msk.bf16.gmra.mxu3 %vm299_vm0, %v6310_v0 }
 0x27d   : > { %5607 = vmatmul.msk.bf16.gmra.mxu0 %vm299_vm0, %v6318_v23 }
 0x27e   : > { %v955_v43 = vpop.f32.mrf.mxu2 }
 0x27f   : > { %v1189_v57 = vpop.f32.mrf.mxu3  ;;  %v1023_v24 = vadd.f32 %v955_v43, %v6330_v8 }
 0x281   : > { %v6633_v19 = vadd.f32 %v1189_v57, %v1023_v24  ;;  %v6640_v2 = vpop.f32.mrf.mxu0  ;;  %v6651_v57 = vpop.f32.mrf.mxu1 }
 0x286   : > { %v957_v0 = vpop.f32.mrf.mxu2 }
 0x287   : > { %v1191_v46 = vpop.f32.mrf.mxu3  ;;  %v1024_v23 = vadd.f32 %v957_v0, %v6348_v41 }
 0x289   : > { %v6638_v63 = vadd.f32 %v1191_v46, %v1024_v23  ;;  %v6653_v24 = vpop.f32.mrf.mxu0 }
 0x28a   : > { %8790 = vst [vmem:[#allocation63_spill] sm:$0xff] %v6653_v24 }
 0x28b   : > { %8789 = vst [vmem:[#allocation62_spill] sm:$0xff] %v6638_v63  ;;  %5450 = vmatmul.msk.bf16.gmra.mxu2 %vm299_vm0, %v6492_v10 }
 0x28c   : > { %5478 = vmatmul.msk.bf16.gmra.mxu3 %vm299_vm0, %v6328_v45  ;;  %v6662_v45 = vpop.f32.mrf.mxu1 }
 0x28d   : > { %5608 = vmatmul.msk.bf16.gmra.mxu0 %vm299_vm0, %v6336_v49  ;;  %8792 = vst [vmem:[#allocation65_spill] sm:$0xff] %v6662_v45 }
 0x28e   : > { %v960_v8 = vpop.f32.mrf.mxu2 }
 0x28f   : > { %v1194_v13 = vpop.f32.mrf.mxu3  ;;  %v1025_v43 = vadd.f32 %v960_v8, %v6357_v1 }
 0x291   : > { %v6649_v41 = vadd.f32 %v1194_v13, %v1025_v43  ;;  %v6666_v8 = vpop.f32.mrf.mxu0 }
 0x292   : > { %8793 = vst [vmem:[#allocation66_spill] sm:$0xff] %v6666_v8 }
 0x294   : > { %v6671_v24 = vpop.f32.mrf.mxu1 }
 0x296   : > { %v962_v0 = vpop.f32.mrf.mxu2 }
 0x297   : > { %v1196_v46 = vpop.f32.mrf.mxu3  ;;  %v1026_v23 = vadd.f32 %v962_v0, %v6369_v39 }
 0x299   : > { %v6656_v12 = vadd.f32 %v1196_v46, %v1026_v23  ;;  %v1077_v46 = vld [vmem:[#allocation2 + $0x180] sm:$0xff]  ;;  %v1078_v23 = vld [vmem:[#allocation2 + $0x188] sm:$0xff]  ;;  %v6674_v45 = vpop.f32.mrf.mxu0 }
 0x29a   : > { %8794 = vst [vmem:[#allocation67_spill] sm:$0xff] %v6674_v45  ;;  %v1985_v45 = vld [vmem:[#allocation2 + $0x39] sm:$0xff] }
 0x29b   : > { %8791 = vst [vmem:[#allocation64_spill] sm:$0xff] %v6656_v12  ;;  %5451 = vmatmul.msk.bf16.gmra.mxu2 %vm299_vm0, %v6528_v61 }
 0x29c   : > { %5479 = vmatmul.msk.bf16.gmra.mxu3 %vm299_vm0, %v6355_v11 }
 0x29d   : > { %5609 = vmatmul.msk.bf16.gmra.mxu0 %vm299_vm0, %v6363_v37  ;;  %v6678_v37 = vpack.c.bf16 %v1078_v23, %v1077_v46  ;;  %v1750_v23 = vld [vmem:[#allocation2 + $0x30] sm:$0xff] }
 0x29e   : > { %v965_v1 = vpop.f32.mrf.mxu2 }
 0x29f   : > { %v1199_v49 = vpop.f32.mrf.mxu3  ;;  %v1027_v13 = vadd.f32 %v965_v1, %v6371_v20 }
 0x2a1   : > { %v6669_v39 = vadd.f32 %v1199_v49, %v1027_v13 }
 0x2a6   : > { %v967_v43 = vpop.f32.mrf.mxu2 }
 0x2a7   : > { %v1201_v0 = vpop.f32.mrf.mxu3  ;;  %v1028_v11 = vadd.f32 %v967_v43, %v6384_v58  ;;  %v6687_v58 = vpop.f32.mrf.mxu1 }
 0x2a8   : > { %v6691_v43 = vpop.f32.mrf.mxu0 }
 0x2a9   : > { %v6676_v47 = vadd.f32 %v1201_v0, %v1028_v11  ;;  %8796 = vst [vmem:[#allocation69_spill] sm:$0xff] %v6691_v43  ;;  %v1751_v11 = vld [vmem:[#allocation2 + $0x38] sm:$0xff] }
 0x2ab   : > { %8795 = vst [vmem:[#allocation68_spill] sm:$0xff] %v6676_v47  ;;  %5452 = vmatmul.msk.bf16.gmra.mxu2 %vm299_vm0, %v6549_v50  ;;  %v1984_v47 = vld [vmem:[#allocation2 + $0x31] sm:$0xff] }
 0x2ac   : > { %5480 = vmatmul.msk.bf16.gmra.mxu3 %vm299_vm0, %v6678_v37  ;;  %v2016_v63 = vpack.c.bf16 %v1985_v45, %v1984_v47 }
 0x2ad   : > { %5610 = vmatmul.msk.bf16.gmra.mxu0 %vm299_vm0, %v6376_v31  ;;  %v1782_v31 = vpack.c.bf16 %v1751_v11, %v1750_v23  ;;  %v1987_v23 = vld [vmem:[#allocation2 + $0x51] sm:$0xff] }
 0x2ae   : > { %v970_v20 = vpop.f32.mrf.mxu2 }
 0x2af   : > { %v1204_v1 = vpop.f32.mrf.mxu3  ;;  %v1029_v49 = vadd.f32 %v970_v20, %v6388_v36  ;;  %v6696_v22 = vpop.f32.mrf.mxu1 }
 0x2b0   : > { %v6700_v36 = vpop.f32.mrf.mxu0 }
 0x2b1   : > { %v6689_v13 = vadd.f32 %v1204_v1, %v1029_v49  ;;  %8797 = vst [vmem:[#allocation70_spill] sm:$0xff] %v6700_v36 }
 0x2b6   : > { %v972_v0 = vpop.f32.mrf.mxu2 }
 0x2b7   : > { %v1206_v46 = vpop.f32.mrf.mxu3  ;;  %v1030_v8 = vadd.f32 %v972_v0, %v6402_v44  ;;  %v1752_v0 = vld [vmem:[#allocation2 + $0x48] sm:$0xff] }
 0x2b8   : > { %v6709_v11 = vpop.f32.mrf.mxu0 }
 0x2b9   : > { %v6694_v12 = vadd.f32 %v1206_v46, %v1030_v8  ;;  %v6707_v8 = vpop.f32.mrf.mxu1  ;;  %v1753_v46 = vld [vmem:[#allocation2 + $0x50] sm:$0xff]  ;;  %8799 = vst [vmem:[#allocation72_spill] sm:$0xff] %v6709_v11 }
 0x2ba   : > { %8798 = vst [vmem:[#allocation71_spill] sm:$0xff] %v6707_v8 }
 0x2bb   : > { %5549 = vmatmul.msk.bf16.vlgmr.msra.gmra.mxu2 %vm299_vm0, %v1782_v31  ;;  %v1986_v31 = vld [vmem:[#allocation2 + $0x49] sm:$0xff] }
 0x2bc   : > { %5577 = vmatmul.msk.bf16.vlgmr.msra.gmra.mxu3 %vm299_vm0, %v2016_v63  ;;  %v2017_v43 = vpack.c.bf16 %v1987_v23, %v1986_v31  ;;  %v1989_v23 = vld [vmem:[#allocation2 + $0x69] sm:$0xff] }
 0x2bd   : > { %5611 = vmatmul.msk.bf16.gmra.mxu0 %vm299_vm0, %v6394_v4  ;;  %v1783_v4 = vpack.c.bf16 %v1753_v46, %v1752_v0  ;;  %v1754_v0 = vld [vmem:[#allocation2 + $0x60] sm:$0xff]  ;;  %v1755_v46 = vld [vmem:[#allocation2 + $0x68] sm:$0xff] }
 0x2be   : > { %v975_v20 = vpop.f32.mrf.mxu2 }
 0x2bf   : > { %v1209_v1 = vpop.f32.mrf.mxu3  ;;  %v1031_v44 = vadd.f32 %v975_v20, %v6382_v52 }
 0x2c0   : > { %v6721_v11 = vpop.f32.mrf.mxu0 }
 0x2c1   : > { %v6705_v49 = vadd.f32 %v1209_v1, %v1031_v44  ;;  %v6719_v44 = vpop.f32.mrf.mxu1  ;;  %8800 = vst [vmem:[#allocation73_spill] sm:$0xff] %v6721_v11 }
 0x2c6   : > { %v977_v47 = vpop.f32.mrf.mxu2 }
 0x2c7   : > { %v1211_v45 = vpop.f32.mrf.mxu3  ;;  %v1032_v63 = vadd.f32 %v977_v47, %v6386_v34 }
 0x2c9   : > { %v6712_v36 = vadd.f32 %v1211_v45, %v1032_v63  ;;  %v1988_v63 = vld [vmem:[#allocation2 + $0x61] sm:$0xff]  ;;  %v6728_v8 = vpop.f32.mrf.mxu1 }
 0x2ca   : > { %8801 = vst [vmem:[#allocation74_spill] sm:$0xff] %v6728_v8 }
 0x2cb   : > { %5550 = vmatmul.msk.bf16.gmra.mxu2 %vm299_vm0, %v1783_v4  ;;  %v2018_v4 = vpack.c.bf16 %v1989_v23, %v1988_v63  ;;  %v1756_v63 = vld [vmem:[#allocation2 + $0x78] sm:$0xff] }
 0x2cc   : > { %5578 = vmatmul.msk.bf16.gmra.mxu3 %vm299_vm0, %v2017_v43 }
 0x2cd   : > { %5612 = vmatmul.msk.bf16.gmra.mxu0 %vm299_vm0, %v6412_v60  ;;  %v1784_v60 = vpack.c.bf16 %v1755_v46, %v1754_v0 }
 0x2ce   : > { %v980_v52 = vpop.f32.mrf.mxu2 }
 0x2cf   : > { %v1214_v20 = vpop.f32.mrf.mxu3  ;;  %v1033_v1 = vadd.f32 %v980_v52, %v6400_v30  ;;  %v6730_v30 = vpop.f32.mrf.mxu0 }
 0x2d0   : > { %8802 = vst [vmem:[#allocation75_spill] sm:$0xff] %v6730_v30 }
 0x2d1   : > { %v6723_v34 = vadd.f32 %v1214_v20, %v1033_v1 }
 0x2d6   : > { %v982_v47 = vpop.f32.mrf.mxu2 }
 0x2d7   : > { %v1216_v45 = vpop.f32.mrf.mxu3  ;;  %v1034_v43 = vadd.f32 %v982_v47, %v6404_v18  ;;  %v6738_v0 = vpop.f32.mrf.mxu0 }
 0x2d8   : > { %8803 = vst [vmem:[#allocation76_spill] sm:$0xff] %v6738_v0 }
 0x2d9   : > { %v6726_v31 = vadd.f32 %v1216_v45, %v1034_v43  ;;  %v1687_v45 = vpop.f32.mrf.mxu1 }
 0x2db   : > { %5551 = vmatmul.msk.bf16.gmra.mxu2 %vm299_vm0, %v1784_v60  ;;  %v1757_v60 = vld [vmem:[#allocation2 + $0x80] sm:$0xff] }
 0x2dc   : > { %5579 = vmatmul.msk.bf16.gmra.mxu3 %vm299_vm0, %v2018_v4  ;;  %v1991_v4 = vld [vmem:[#allocation2 + $0x81] sm:$0xff]  ;;  %v1785_v8 = vpack.c.bf16 %v1757_v60, %v1756_v63 }
 0x2dd   : > { %5613 = vmatmul.msk.bf16.gmra.mxu0 %vm299_vm0, %v6430_v26  ;;  %v1990_v26 = vld [vmem:[#allocation2 + $0x79] sm:$0xff] }
 0x2de   : > { %v985_v52 = vpop.f32.mrf.mxu2 }
 0x2df   : > { %v1219_v20 = vpop.f32.mrf.mxu3  ;;  %v1035_v18 = vadd.f32 %v985_v52, %v6418_v51  ;;  %v2019_v51 = vpack.c.bf16 %v1991_v4, %v1990_v26 }
 0x2e1   : > { %v1269_v1 = vadd.f32 %v1219_v20, %v1035_v18  ;;  %v6749_v20 = vpop.f32.mrf.mxu0 }
 0x2e2   : > { %8804 = vst [vmem:[#allocation77_spill] sm:$0xff] %v6749_v20 }
 0x2e3   : > { %v1503_v47 = vadd.f32 %v6640_v2, %v1269_v1 }
 0x2e5   : > { %v6740_v46 = vadd.f32 %v1687_v45, %v1503_v47  ;;  %v1758_v47 = vld [vmem:[#allocation2 + $0x90] sm:$0xff]  ;;  %v1759_v45 = vld [vmem:[#allocation2 + $0x98] sm:$0xff] }
 0x2e6   : > { %v987_v23 = vpop.f32.mrf.mxu2 }
 0x2e7   : > { %v1221_v43 = vpop.f32.mrf.mxu3  ;;  %v1036_v30 = vadd.f32 %v987_v23, %v6422_v21  ;;  %v1993_v23 = vld [vmem:[#allocation2 + $0x99] sm:$0xff] }
 0x2e9   : > { %v6743_v11 = vadd.f32 %v1221_v43, %v1036_v30  ;;  %v1992_v43 = vld [vmem:[#allocation2 + $0x91] sm:$0xff]  ;;  %v6755_v63 = vpop.f32.mrf.mxu0 }
 0x2ea   : > { %8805 = vst [vmem:[#allocation78_spill] sm:$0xff] %v6755_v63  ;;  %v2020_v4 = vpack.c.bf16 %v1993_v23, %v1992_v43  ;;  %v1994_v23 = vld [vmem:[#allocation2 + $0xa9] sm:$0xff] }
 0x2eb   : > { %5552 = vmatmul.msk.bf16.gmra.mxu2 %vm299_vm0, %v1785_v8 }
 0x2ec   : > { %5580 = vmatmul.msk.bf16.gmra.mxu3 %vm299_vm0, %v2019_v51 }
 0x2ed   : > { %5614 = vmatmul.msk.bf16.gmra.mxu0 %vm299_vm0, %v6448_v55  ;;  %v1786_v55 = vpack.c.bf16 %v1759_v45, %v1758_v47  ;;  %v1995_v47 = vld [vmem:[#allocation2 + $0xb1] sm:$0xff] }
 0x2ee   : > { %v990_v2 = vpop.f32.mrf.mxu2 }
 0x2ef   : > { %v1224_v52 = vpop.f32.mrf.mxu3  ;;  %v1037_v18 = vadd.f32 %v990_v2, %v6436_v32 }
 0x2f1   : > { %v6752_v1 = vadd.f32 %v1224_v52, %v1037_v18 }
 0x2f6   : > { %v992_v21 = vpop.f32.mrf.mxu2 }
 0x2f7   : > { %v1226_v30 = vpop.f32.mrf.mxu3  ;;  %v1038_v8 = vadd.f32 %v992_v21, %v6440_v14  ;;  %v6766_v14 = vpop.f32.mrf.mxu0  ;;  %v1760_v21 = vld [vmem:[#allocation2 + $0xa8] sm:$0xff] }
 0x2f9   : > { %v6757_v60 = vadd.f32 %v1226_v30, %v1038_v8  ;;  %v1761_v30 = vld [vmem:[#allocation2 + $0xb0] sm:$0xff] }
 0x2fa   : > { %v1787_v43 = vpack.c.bf16 %v1761_v30, %v1760_v21  ;;  %v1997_v21 = vld [vmem:[#allocation2 + $0xc9] sm:$0xff] }
 0x2fb   : > { %5553 = vmatmul.msk.bf16.gmra.mxu2 %vm299_vm0, %v1786_v55 }
 0x2fc   : > { %5581 = vmatmul.msk.bf16.gmra.mxu3 %vm299_vm0, %v2020_v4 }
 0x2fd   : > { %5615 = vmatmul.msk.bf16.gmra.mxu0 %vm299_vm0, %v6468_v3  ;;  %v2021_v3 = vpack.c.bf16 %v1995_v47, %v1994_v23 }
 0x2fe   : > { %v995_v32 = vpop.f32.mrf.mxu2 }
 0x2ff   : > { %v1229_v26 = vpop.f32.mrf.mxu3  ;;  %v1039_v51 = vadd.f32 %v995_v32, %v6454_v27  ;;  %v6773_v27 = vpop.f32.mrf.mxu0 }
 0x301   : > { %v6764_v2 = vadd.f32 %v1229_v26, %v1039_v51 }
 0x306   : > { %v997_v52 = vpop.f32.mrf.mxu2 }
 0x307   : > { %v1231_v18 = vpop.f32.mrf.mxu3  ;;  %v1040_v45 = vadd.f32 %v997_v52, %v6458_v56  ;;  %v1762_v52 = vld [vmem:[#allocation2 + $0xc0] sm:$0xff]  ;;  %v6780_v30 = vpop.f32.mrf.mxu0 }
 0x309   : > { %v6769_v8 = vadd.f32 %v1231_v18, %v1040_v45  ;;  %v1763_v18 = vld [vmem:[#allocation2 + $0xc8] sm:$0xff] }
 0x30a   : > { %v1996_v45 = vld [vmem:[#allocation2 + $0xc1] sm:$0xff] }
 0x30b   : > { %5554 = vmatmul.msk.bf16.gmra.mxu2 %vm299_vm0, %v1787_v43  ;;  %v1788_v43 = vpack.c.bf16 %v1763_v18, %v1762_v52  ;;  %v1765_v52 = vld [vmem:[#allocation2 + $0xe0] sm:$0xff] }
 0x30c   : > { %5582 = vmatmul.msk.bf16.gmra.mxu3 %vm299_vm0, %v2021_v3  ;;  %v1998_v18 = vld [vmem:[#allocation2 + $0xd9] sm:$0xff] }
 0x30d   : > { %5616 = vmatmul.msk.bf16.gmra.mxu0 %vm299_vm0, %v6492_v10  ;;  %v2022_v10 = vpack.c.bf16 %v1997_v21, %v1996_v45  ;;  %v1999_v21 = vld [vmem:[#allocation2 + $0xe1] sm:$0xff] }
 0x30e   : > { %v1000_v55 = vpop.f32.mrf.mxu2 }
 0x30f   : > { %v1234_v4 = vpop.f32.mrf.mxu3  ;;  %v1041_v32 = vadd.f32 %v1000_v55, %v6474_v59 }
 0x311   : > { %v6778_v26 = vadd.f32 %v1234_v4, %v1041_v32  ;;  %v6790_v4 = vpop.f32.mrf.mxu0 }
 0x313   : > { %8806 = vst [vmem:[#allocation79_spill] sm:$0xff] %v6778_v26 }
 0x316   : > { %v1002_v56 = vpop.f32.mrf.mxu2 }
 0x317   : > { %v1236_v51 = vpop.f32.mrf.mxu3  ;;  %v1042_v47 = vadd.f32 %v1002_v56, %v6480_v48  ;;  %v1764_v48 = vld [vmem:[#allocation2 + $0xd8] sm:$0xff] }
 0x319   : > { %v6783_v23 = vadd.f32 %v1236_v51, %v1042_v47 }
 0x31b   : > { %8807 = vst [vmem:[#allocation80_spill] sm:$0xff] %v6783_v23  ;;  %5555 = vmatmul.msk.bf16.gmra.mxu2 %vm299_vm0, %v1788_v43  ;;  %v1789_v43 = vpack.c.bf16 %v1765_v52, %v1764_v48  ;;  %v1767_v52 = vld [vmem:[#allocation2 + $0xf8] sm:$0xff] }
 0x31c   : > { %5583 = vmatmul.msk.bf16.gmra.mxu3 %vm299_vm0, %v2022_v10  ;;  %v6797_v10 = vpop.f32.mrf.mxu0 }
 0x31d   : > { %5617 = vmatmul.msk.bf16.gmra.mxu0 %vm299_vm0, %v6528_v61  ;;  %v2023_v61 = vpack.c.bf16 %v1999_v21, %v1998_v18  ;;  %v2000_v18 = vld [vmem:[#allocation2 + $0xf1] sm:$0xff]  ;;  %v2001_v21 = vld [vmem:[#allocation2 + $0xf9] sm:$0xff] }
 0x31e   : > { %v1005_v59 = vpop.f32.mrf.mxu2  ;;  %v2024_v20 = vpack.c.bf16 %v2001_v21, %v2000_v18  ;;  %v1769_v21 = vld [vmem:[#allocation2 + $0x110] sm:$0xff] }
 0x31f   : > { %v1239_v3 = vpop.f32.mrf.mxu3  ;;  %v1043_v55 = vadd.f32 %v1005_v59, %v6506_v42 }
 0x321   : > { %v6792_v32 = vadd.f32 %v1239_v3, %v1043_v55 }
 0x323   : > { %8808 = vst [vmem:[#allocation81_spill] sm:$0xff] %v6792_v32 }
 0x326   : > { %v1007_v56 = vpop.f32.mrf.mxu2 }
 0x327   : > { %v1241_v51 = vpop.f32.mrf.mxu3  ;;  %v1044_v47 = vadd.f32 %v1007_v56, %v6518_v5  ;;  %v6806_v5 = vpop.f32.mrf.mxu0  ;;  %v1766_v56 = vld [vmem:[#allocation2 + $0xf0] sm:$0xff] }
 0x328   : > { %v1790_v63 = vpack.c.bf16 %v1767_v52, %v1766_v56  ;;  %v8815_v56 = vld [vmem:[#allocation42_spill] sm:$0xff] }
 0x329   : > { %v6795_v45 = vadd.f32 %v1241_v51, %v1044_v47 }
 0x32b   : > { %8809 = vst [vmem:[#allocation82_spill] sm:$0xff] %v6795_v45  ;;  %5556 = vmatmul.msk.bf16.gmra.mxu2 %vm299_vm0, %v1789_v43  ;;  %v8811_v43 = vld [vmem:[#allocation33_spill] sm:$0xff] }
 0x32c   : > { %5584 = vmatmul.msk.bf16.gmra.mxu3 %vm299_vm0, %v2023_v61  ;;  %v1483_v61 = vadd.f32 %v8811_v43, %v6558_v15  ;;  %v8814_v15 = vld [vmem:[#allocation34_spill] sm:$0xff] }
 0x32d   : > { %5618 = vmatmul.msk.bf16.gmra.mxu0 %vm299_vm0, %v6549_v50 }
 0x32e   : > { %v1010_v42 = vpop.f32.mrf.mxu2 }
 0x32f   : > { %v1244_v59 = vpop.f32.mrf.mxu3  ;;  %v1045_v3 = vadd.f32 %v1010_v42, %v6535_v6  ;;  %v8813_v6 = vld [vmem:[#allocation40_spill] sm:$0xff] }
 0x330   : > { %v1717_v42 = vadd.f32 %v8813_v6, %v1483_v61  ;;  %v2248_v61 = vld [vmem:[#allocation2 + $0x19a] sm:$0xff]  ;;  %v2249_v6 = vld [vmem:[#allocation2 + $0x1a2] sm:$0xff] }
 0x331   : > { %v6804_v55 = vadd.f32 %v1244_v59, %v1045_v3 }
 0x333   : > { %8810 = vst [vmem:[#allocation83_spill] sm:$0xff] %v6804_v55  ;;  %v6818_v55 = vpop.f32.mrf.mxu0 }
 0x336   : > { %v1012_v48 = vpop.f32.mrf.mxu2 }
 0x337   : > { %v1246_v51 = vpop.f32.mrf.mxu3  ;;  %v1046_v47 = vadd.f32 %v1012_v48, %v6541_v29  ;;  %v1484_v48 = vadd.f32 %v8814_v15, %v6563_v38  ;;  %v8817_v15 = vld [vmem:[#allocation45_spill] sm:$0xff] }
 0x339   : > { %v6811_v50 = vadd.f32 %v1246_v51, %v1046_v47  ;;  %v1718_v52 = vadd.f32 %v8815_v56, %v1484_v48  ;;  %v2002_v47 = vld [vmem:[#allocation2 + $0x109] sm:$0xff] }
 0x33b   : > { %8812 = vst [vmem:[#allocation33_spill] sm:$0xff] %v6811_v50  ;;  %5557 = vmatmul.msk.bf16.gmra.mxu2 %vm299_vm0, %v1790_v63  ;;  %v1768_v63 = vld [vmem:[#allocation2 + $0x108] sm:$0xff]  ;;  %v8816_v50 = vld [vmem:[#allocation35_spill] sm:$0xff] }
 0x33c   : > { %5585 = vmatmul.msk.bf16.gmra.mxu3 %vm299_vm0, %v2024_v20  ;;  %v1485_v0 = vadd.f32 %v8816_v50, %v6573_v9  ;;  %v1791_v38 = vpack.c.bf16 %v1769_v21, %v1768_v63  ;;  %v8818_v9 = vld [vmem:[#allocation36_spill] sm:$0xff] }
 0x33d   : > { %5619 = vmatmul.msk.bf16.gmra.mxu0 %vm299_vm0, %v6624_v35  ;;  %v2003_v35 = vld [vmem:[#allocation2 + $0x111] sm:$0xff]  ;;  %v1486_v50 = vadd.f32 %v8818_v9, %v6580_v33 }
 0x33e   : > { %v1872_v59 = vpop.f32.mrf.mxu2  ;;  %v1719_v48 = vadd.f32 %v8817_v15, %v1485_v0  ;;  %v8819_v63 = vld [vmem:[#allocation48_spill] sm:$0xff]  ;;  %v8820_v0 = vld [vmem:[#allocation37_spill] sm:$0xff] }
 0x33f   : > { %v2106_v3 = vpop.f32.mrf.mxu3  ;;  %v1952_v29 = vadd.f32 %v1872_v59, %v1717_v42  ;;  %v6827_v42 = vpop.f32.mrf.mxu0  ;;  %v1720_v21 = vadd.f32 %v8819_v63, %v1486_v50 }
 0x341   : > { %v6822_v51 = vadd.f32 %v2106_v3, %v1952_v29  ;;  %v2025_v3 = vpack.c.bf16 %v2003_v35, %v2002_v47  ;;  %v2265_v29 = vpack.c.bf16 %v2249_v6, %v2248_v61  ;;  %v1770_v47 = vld [vmem:[#allocation2 + $0x120] sm:$0xff]  ;;  %v1771_v61 = vld [vmem:[#allocation2 + $0x128] sm:$0xff] }
 0x342   : > { %v2004_v6 = vld [vmem:[#allocation2 + $0x121] sm:$0xff] }
 0x346   : > { %v1874_v18 = vpop.f32.mrf.mxu2 }
 0x347   : > { %v2108_v20 = vpop.f32.mrf.mxu3  ;;  %v1953_v43 = vadd.f32 %v1874_v18, %v1718_v52 }
 0x349   : > { %v6829_v59 = vadd.f32 %v2108_v20, %v1953_v43  ;;  %v6839_v20 = vpop.f32.mrf.mxu0 }
 0x34b   : > { %5558 = vmatmul.msk.bf16.gmra.mxu2 %vm299_vm0, %v1791_v38  ;;  %v2005_v38 = vld [vmem:[#allocation2 + $0x129] sm:$0xff] }
 0x34c   : > { %5586 = vmatmul.msk.bf16.gmra.mxu3 %vm299_vm0, %v2025_v3  ;;  %v2026_v33 = vpack.c.bf16 %v2005_v38, %v2004_v6 }
 0x34d   : > { %5620 = vmatmul.msk.bf16.gmra.mxu0 %vm299_vm0, %v2265_v29  ;;  %v1487_v29 = vadd.f32 %v8820_v0, %v6591_v54  ;;  %v5894_v54 = vld [vmem:[%s8685_s3 + $0x18] sm:$0xff] }
 0x34e   : > { %v1877_v56 = vpop.f32.mrf.mxu2  ;;  %3049 = vmatpush.bf16.msra.mxu1 %v5894_v54  ;;  %v2006_v0 = vld [vmem:[#allocation2 + $0x139] sm:$0xff] }
 0x34f   : > { %v2111_v52 = vpop.f32.mrf.mxu3  ;;  %v1954_v18 = vadd.f32 %v1877_v56, %v1719_v48  ;;  %v1792_v48 = vpack.c.bf16 %v1771_v61, %v1770_v47  ;;  %v8823_v47 = vld [vmem:[#allocation53_spill] sm:$0xff]  ;;  %v1772_v61 = vld [vmem:[#allocation2 + $0x138] sm:$0xff] }
 0x351   : > { %v6837_v45 = vadd.f32 %v2111_v52, %v1954_v18  ;;  %v6848_v56 = vpop.f32.mrf.mxu0  ;;  %v8821_v52 = vld [vmem:[#allocation51_spill] sm:$0xff] }
 0x352   : > { %v1721_v18 = vadd.f32 %v8821_v52, %v1487_v29  ;;  %v2007_v29 = vld [vmem:[#allocation2 + $0x141] sm:$0xff] }
 0x356   : > { %v1879_v35 = vpop.f32.mrf.mxu2 }
 0x357   : > { %v2113_v43 = vpop.f32.mrf.mxu3  ;;  %v1955_v3 = vadd.f32 %v1879_v35, %v1720_v21  ;;  %v8822_v21 = vld [vmem:[#allocation38_spill] sm:$0xff] }
 0x358   : > { %v1488_v35 = vadd.f32 %v8822_v21, %v6596_v28  ;;  %v8824_v28 = vld [vmem:[#allocation39_spill] sm:$0xff] }
 0x359   : > { %v6844_v15 = vadd.f32 %v2113_v43, %v1955_v3  ;;  %v1773_v3 = vld [vmem:[#allocation2 + $0x140] sm:$0xff]  ;;  %v1489_v52 = vadd.f32 %v8824_v28, %v6609_v25 }
 0x35a   : > { %v1722_v43 = vadd.f32 %v8823_v47, %v1488_v35  ;;  %v8825_v47 = vld [vmem:[#allocation41_spill] sm:$0xff] }
 0x35b   : > { %5559 = vmatmul.msk.bf16.gmra.mxu2 %vm299_vm0, %v1792_v48  ;;  %v6859_v48 = vpop.f32.mrf.mxu0  ;;  %v1490_v23 = vadd.f32 %v8825_v47, %v6616_v17 }
 0x35c   : > { %5587 = vmatmul.msk.bf16.gmra.mxu3 %vm299_vm0, %v2026_v33 }
 0x35d   : > { %v1724_v25 = vadd.f32 %v6589_v16, %v1490_v23 }
 0x35e   : > { %v1882_v9 = vpop.f32.mrf.mxu2 }
 0x35f   : > { %v2116_v50 = vpop.f32.mrf.mxu3  ;;  %v1956_v63 = vadd.f32 %v1882_v9, %v1721_v18  ;;  %v1793_v9 = vpack.c.bf16 %v1773_v3, %v1772_v61  ;;  %v1774_v61 = vld [vmem:[#allocation2 + $0x150] sm:$0xff] }
 0x361   : > { %v6853_v32 = vadd.f32 %v2116_v50, %v1956_v63  ;;  %v2027_v50 = vpack.c.bf16 %v2007_v29, %v2006_v0  ;;  %v1723_v63 = vadd.f32 %v6575_v53, %v1489_v52  ;;  %v1775_v0 = vld [vmem:[#allocation2 + $0x158] sm:$0xff] }
 0x362   : > { %v2008_v29 = vld [vmem:[#allocation2 + $0x151] sm:$0xff] }
 0x363   : > { %v8826_v53 = vld [vmem:[#allocation44_spill] sm:$0xff] }
 0x364   : > { %v1491_v52 = vadd.f32 %v8826_v53, %v6633_v19  ;;  %v1776_v19 = vld [vmem:[#allocation2 + $0x168] sm:$0xff] }
 0x366   : > { %v1884_v6 = vpop.f32.mrf.mxu2  ;;  %v1725_v16 = vadd.f32 %v6598_v7, %v1491_v52 }
 0x367   : > { %v2118_v38 = vpop.f32.mrf.mxu3  ;;  %v1957_v33 = vadd.f32 %v1884_v6, %v1722_v43  ;;  %v6870_v43 = vpop.f32.mrf.mxu0 }
 0x369   : > { %v6863_v18 = vadd.f32 %v2118_v38, %v1957_v33  ;;  %v2009_v33 = vld [vmem:[#allocation2 + $0x159] sm:$0xff] }
 0x36a   : > { %v2028_v17 = vpack.c.bf16 %v2009_v33, %v2008_v29  ;;  %v8827_v29 = vld [vmem:[#allocation49_spill] sm:$0xff] }
 0x36b   : > { %5560 = vmatmul.msk.bf16.gmra.mxu2 %vm299_vm0, %v1793_v9  ;;  %v1493_v33 = vadd.f32 %v8827_v29, %v6649_v41  ;;  %v2012_v41 = vld [vmem:[#allocation2 + $0x181] sm:$0xff] }
 0x36c   : > { %5588 = vmatmul.msk.bf16.gmra.mxu3 %vm299_vm0, %v2027_v50  ;;  %v1794_v50 = vpack.c.bf16 %v1775_v0, %v1774_v61  ;;  %v2011_v0 = vld [vmem:[#allocation2 + $0x171] sm:$0xff] }
 0x36d   : > { %v1727_v53 = vadd.f32 %v6626_v40, %v1493_v33 }
 0x36e   : > { %v1887_v21 = vpop.f32.mrf.mxu2 }
 0x36f   : > { %v2121_v35 = vpop.f32.mrf.mxu3  ;;  %v1958_v54 = vadd.f32 %v1887_v21, %v1723_v63  ;;  %v6879_v63 = vpop.f32.mrf.mxu0 }
 0x371   : > { %v6872_v6 = vadd.f32 %v2121_v35, %v1958_v54 }
 0x376   : > { %v1889_v38 = vpop.f32.mrf.mxu2 }
 0x377   : > { %v2123_v3 = vpop.f32.mrf.mxu3  ;;  %v1959_v28 = vadd.f32 %v1889_v38, %v1724_v25  ;;  %v6886_v47 = vpop.f32.mrf.mxu0  ;;  %v1777_v38 = vld [vmem:[#allocation2 + $0x170] sm:$0xff] }
 0x379   : > { %v6877_v9 = vadd.f32 %v2123_v3, %v1959_v28  ;;  %v2010_v3 = vld [vmem:[#allocation2 + $0x169] sm:$0xff]  ;;  %v1795_v28 = vpack.c.bf16 %v1777_v38, %v1776_v19  ;;  %v8828_v38 = vld [vmem:[#allocation52_spill] sm:$0xff] }
 0x37a   : > { %v2029_v7 = vpack.c.bf16 %v2011_v0, %v2010_v3  ;;  %v2013_v19 = vld [vmem:[#allocation2 + $0x189] sm:$0xff]  ;;  %v1495_v3 = vadd.f32 %v8828_v38, %v6669_v39  ;;  %v2015_v38 = vld [vmem:[#allocation2 + $0x1a1] sm:$0xff] }
 0x37b   : > { %5561 = vmatmul.msk.bf16.gmra.mxu2 %vm299_vm0, %v1794_v50  ;;  %v2030_v29 = vpack.c.bf16 %v2013_v19, %v2012_v41  ;;  %v1781_v41 = vld [vmem:[#allocation2 + $0x1a0] sm:$0xff] }
 0x37c   : > { %5589 = vmatmul.msk.bf16.gmra.mxu3 %vm299_vm0, %v2028_v17  ;;  %v1729_v40 = vadd.f32 %v6651_v57, %v1495_v3  ;;  %v2014_v19 = vld [vmem:[#allocation2 + $0x199] sm:$0xff] }
 0x37d   : > { %v2031_v57 = vpack.c.bf16 %v2015_v38, %v2014_v19 }
 0x37e   : > { %v1892_v23 = vpop.f32.mrf.mxu2 }
 0x37f   : > { %v2126_v21 = vpop.f32.mrf.mxu3  ;;  %v1960_v35 = vadd.f32 %v1892_v23, %v1725_v16  ;;  %v6897_v17 = vpop.f32.mrf.mxu0 }
 0x381   : > { %v6884_v54 = vadd.f32 %v2126_v21, %v1960_v35 }
 0x386   : > { %v6888_v25 = vpop.f32.mrf.mxu2 }
 0x387   : > { %v6890_v61 = vpop.f32.mrf.mxu3  ;;  %v6907_v0 = vpop.f32.mrf.mxu0 }
 0x388   : > { %8829 = vst [vmem:[#allocation40_spill] sm:$0xff] %v6907_v0 }
 0x38b   : > { %5562 = vmatmul.msk.bf16.gmra.mxu2 %vm299_vm0, %v1795_v28 }
 0x38c   : > { %5590 = vmatmul.msk.bf16.gmra.mxu3 %vm299_vm0, %v2029_v7 }
 0x38e   : > { %v1897_v52 = vpop.f32.mrf.mxu2 }
 0x38f   : > { %v2131_v50 = vpop.f32.mrf.mxu3  ;;  %v1962_v16 = vadd.f32 %v1897_v52, %v1727_v53  ;;  %v6915_v52 = vpop.f32.mrf.mxu0 }
 0x390   : > { %8830 = vst [vmem:[#allocation34_spill] sm:$0xff] %v6915_v52 }
 0x391   : > { %v6899_v23 = vadd.f32 %v2131_v50, %v1962_v16  ;;  %v1780_v50 = vld [vmem:[#allocation2 + $0x198] sm:$0xff] }
 0x396   : > { %v6901_v21 = vpop.f32.mrf.mxu2 }
 0x397   : > { %v6903_v35 = vpop.f32.mrf.mxu3  ;;  %v6925_v3 = vpop.f32.mrf.mxu0 }
 0x398   : > { %8831 = vst [vmem:[#allocation42_spill] sm:$0xff] %v6925_v3 }
 0x39b   : > { %5563 = vmatmul.msk.bf16.gmra.mxu2 %vm299_vm0, %v6678_v37  ;;  %v1497_v37 = vadd.f32 %v6570_v62, %v6689_v13  ;;  %v8833_v13 = vld [vmem:[#allocation56_spill] sm:$0xff] }
 0x39c   : > { %5591 = vmatmul.msk.bf16.gmra.mxu3 %vm299_vm0, %v2030_v29  ;;  %v1797_v29 = vpack.c.bf16 %v1781_v41, %v1780_v50  ;;  %v1499_v50 = vadd.f32 %v8833_v13, %v6705_v49 }
 0x39e   : > { %v1902_v33 = vpop.f32.mrf.mxu2  ;;  %v1733_v41 = vadd.f32 %v6696_v22, %v1499_v50  ;;  %v1689_v50 = vpop.f32.mrf.mxu1 }
 0x39f   : > { %v2136_v28 = vpop.f32.mrf.mxu3  ;;  %v1964_v7 = vadd.f32 %v1902_v33, %v1729_v40  ;;  %v1731_v40 = vadd.f32 %v6671_v24, %v1497_v37  ;;  %v6934_v62 = vpop.f32.mrf.mxu0 }
 0x3a0   : > { %8832 = vst [vmem:[#allocation35_spill] sm:$0xff] %v6934_v62 }
 0x3a1   : > { %v6913_v53 = vadd.f32 %v2136_v28, %v1964_v7 }
 0x3a6   : > { %v6917_v16 = vpop.f32.mrf.mxu2 }
 0x3a7   : > { %v6919_v39 = vpop.f32.mrf.mxu3  ;;  %v6939_v24 = vpop.f32.mrf.mxu0 }
 0x3a8   : > { %8834 = vst [vmem:[#allocation45_spill] sm:$0xff] %v6939_v24 }
 0x3ab   : > { %5564 = vmatmul.msk.bf16.gmra.mxu2 %vm299_vm0, %v1797_v29 }
 0x3ac   : > { %5592 = vmatmul.msk.bf16.gmra.mxu3 %vm299_vm0, %v2031_v57 }
 0x3ae   : > { %v1907_v33 = vpop.f32.mrf.mxu2 }
 0x3af   : > { %v2141_v28 = vpop.f32.mrf.mxu3  ;;  %v1966_v7 = vadd.f32 %v1907_v33, %v1731_v40  ;;  %v8837_v33 = vld [vmem:[#allocation59_spill] sm:$0xff] }
 0x3b1   : > { %v6928_v52 = vadd.f32 %v2141_v28, %v1966_v7  ;;  %v1501_v28 = vadd.f32 %v8837_v33, %v6723_v34  ;;  %v2390_v7 = vpop.f32.mrf.mxu0  ;;  %v5893_v33 = vld [vmem:[%s8685_s3 + $0x10] sm:$0xff] }
 0x3b2   : > { %3050 = vmatpush.bf16.msra.mxu1 %v5893_v33 }
 0x3b3   : > { %v1735_v62 = vadd.f32 %v6719_v44, %v1501_v28  ;;  %v2421_v44 = vadd.f32 %v6773_v27, %v6829_v59  ;;  %v2420_v28 = vadd.f32 %v6766_v14, %v6822_v51  ;;  %v2422_v27 = vadd.f32 %v6780_v30, %v6837_v45  ;;  %v8849_v30 = vld [vmem:[#allocation57_spill] sm:$0xff] }
 0x3b4   : > { %v2423_v51 = vadd.f32 %v6790_v4, %v6844_v15  ;;  %v1500_v45 = vadd.f32 %v8849_v30, %v6712_v36  ;;  %v8853_v4 = vld [vmem:[#allocation66_spill] sm:$0xff]  ;;  %v2424_v36 = vadd.f32 %v6797_v10, %v6853_v32  ;;  %v8857_v10 = vld [vmem:[#allocation71_spill] sm:$0xff] }
 0x3b5   : > { %v1505_v15 = vadd.f32 %v8853_v4, %v6752_v1 }
 0x3b6   : > { %v6930_v26 = vpop.f32.mrf.mxu2 }
 0x3b7   : > { %v6932_v0 = vpop.f32.mrf.mxu3 }
 0x3be   : > { %v1912_v19 = vpop.f32.mrf.mxu2 }
 0x3bf   : > { %v2146_v38 = vpop.f32.mrf.mxu3  ;;  %v1968_v29 = vadd.f32 %v1912_v19, %v1733_v41  ;;  %v6952_v41 = vpop.f32.mrf.mxu0 }
 0x3c0   : > { %8839 = vst [vmem:[#allocation51_spill] sm:$0xff] %v6952_v41 }
 0x3c1   : > { %v6941_v37 = vadd.f32 %v2146_v38, %v1968_v29  ;;  %v1692_v29 = vpop.f32.mrf.mxu1 }
 0x3c3   : > { %8835 = vst [vmem:[#allocation36_spill] sm:$0xff] %v6941_v37 }
 0x3c6   : > { %v6943_v57 = vpop.f32.mrf.mxu2 }
 0x3c7   : > { %v6945_v40 = vpop.f32.mrf.mxu3 }
 0x3c8   : > { %8836 = vst [vmem:[#allocation48_spill] sm:$0xff] %v6945_v40  ;;  %v6958_v40 = vpop.f32.mrf.mxu0 }
 0x3c9   : > { %8840 = vst [vmem:[#allocation38_spill] sm:$0xff] %v6958_v40  ;;  %v6979_v59 = vpop.f32.mrf.mxu1 }
 0x3ce   : > { %v1917_v49 = vpop.f32.mrf.mxu2 }
 0x3cf   : > { %v2151_v13 = vpop.f32.mrf.mxu3  ;;  %v1970_v22 = vadd.f32 %v1917_v49, %v1735_v62  ;;  %v6971_v49 = vld [vmem:[%s8684_s2] ss:$0 sm:$0xff] }
 0x3d0   : > { %v6984_v14 = vadd.f32 %v6971_v49, %v2421_v44  ;;  %v7016_v30 = vadd.f32 %v6971_v49, %v2423_v51  ;;  %v7020_v1 = vpop.f32.mrf.mxu0 }
 0x3d1   : > { %v6950_v3 = vadd.f32 %v2151_v13, %v1970_v22  ;;  %v8842_v22 = vld [vmem:[#allocation62_spill] sm:$0xff] }
 0x3d3   : > { %8838 = vst [vmem:[#allocation37_spill] sm:$0xff] %v6950_v3 }
 0x3d6   : > { %v6954_v19 = vpop.f32.mrf.mxu2 }
 0x3d7   : > { %v6956_v38 = vpop.f32.mrf.mxu3 }
 0x3de   : > { %v1922_v24 = vpop.f32.mrf.mxu2 }
 0x3df   : > { %v2156_v37 = vpop.f32.mrf.mxu3  ;;  %v1972_v34 = vadd.f32 %v1922_v24, %v6740_v46  ;;  %v8843_v46 = vld [vmem:[#allocation46_spill] sm:$0xff] }
 0x3e0   : > { %v1492_v24 = vadd.f32 %v8843_v46, %v8842_v22  ;;  %v8848_v22 = vld [vmem:[#allocation55_spill] sm:$0xff] }
 0x3e1   : > { %v2206_v62 = vadd.f32 %v2156_v37, %v1972_v34  ;;  %v8844_v37 = vld [vmem:[#allocation64_spill] sm:$0xff]  ;;  %v8845_v34 = vld [vmem:[#allocation50_spill] sm:$0xff]  ;;  %v1498_v46 = vadd.f32 %v8848_v22, %v6694_v12  ;;  %v7008_v12 = vadd.f32 %v6971_v49, %v2422_v27 }
 0x3e2   : > { %v1494_v40 = vadd.f32 %v8845_v34, %v8844_v37  ;;  %v8851_v37 = vld [vmem:[#allocation60_spill] sm:$0xff]  ;;  %v8852_v34 = vld [vmem:[#allocation63_spill] sm:$0xff] }
 0x3e3   : > { %v6973_v13 = vadd.f32 %v2390_v7, %v2206_v62  ;;  %v8846_v7 = vld [vmem:[#allocation68_spill] sm:$0xff]  ;;  %v8847_v62 = vld [vmem:[#allocation54_spill] sm:$0xff]  ;;  %v1502_v44 = vadd.f32 %v8851_v37, %v6726_v31  ;;  %v1504_v3 = vadd.f32 %v8852_v34, %v6743_v11  ;;  %v2558_v31 = vmul.f32 %v6984_v14, %v6984_v14  ;;  %v8856_v34 = vld [vmem:[#allocation65_spill] sm:$0xff] }
 0x3e4   : > { %v2425_v11 = vadd.f32 %v6806_v5, %v6863_v18  ;;  %v7026_v32 = vadd.f32 %v6687_v58, %v1498_v46  ;;  %v7038_v18 = vadd.f32 %v1692_v29, %v1505_v15  ;;  %v2559_v58 = vmul.f32 %v7008_v12, %v7008_v12 }
 0x3e5   : > { %8841 = vst [vmem:[#allocation53_spill] sm:$0xff] %v6973_v13  ;;  %v1496_v13 = vadd.f32 %v8847_v62, %v8846_v7  ;;  %v7005_v7 = vadd.f32 %v6971_v49, %v2420_v28  ;;  %v8854_v62 = vld [vmem:[#allocation58_spill] sm:$0xff]  ;;  %v8855_v28 = vld [vmem:[#allocation61_spill] sm:$0xff]  ;;  %v7036_v5 = vadd.f32 %v1689_v50, %v1504_v3  ;;  %v2590_v3 = vsel %vm299_vm0, %v2558_v31, 0.0  ;;  %v8859_v31 = vld [vmem:[#allocation67_spill] sm:$0xff] }
 0x3e6   : > { %v6994_v33 = vpop.f32.mrf.mxu2  ;;  %v1726_v22 = vadd.f32 %v8854_v62, %v1492_v24  ;;  %v1728_v37 = vadd.f32 %v8855_v28, %v1494_v40  ;;  %v7029_v24 = vadd.f32 %v8857_v10, %v1500_v45  ;;  %v8858_v62 = vld [vmem:[#allocation74_spill] sm:$0xff]  ;;  %v7045_v40 = vadd.f32 %v6971_v49, %v2424_v36 }
 0x3e7   : > { %v6996_v41 = vpop.f32.mrf.mxu3  ;;  %v1730_v4 = vadd.f32 %v8856_v34, %v1496_v13  ;;  %v2557_v51 = vmul.f32 %v7005_v7, %v7005_v7  ;;  %v2426_v13 = vadd.f32 %v6818_v55, %v6872_v6  ;;  %v2488_v46 = vsel %vm299_vm0, %v7005_v7, 0.0 }
 0x3e8   : > { %8850 = vst [vmem:[#allocation39_spill] sm:$0xff] %v6996_v41  ;;  %v1961_v27 = vadd.f32 %v6888_v25, %v1726_v22  ;;  %v7034_v41 = vadd.f32 %v8858_v62, %v1502_v44  ;;  %v2489_v25 = vsel %vm299_vm0, %v6984_v14, 0.0  ;;  %v2560_v50 = vmul.f32 %v7016_v30, %v7016_v30  ;;  %v7067_v22 = vpop.f32.mrf.mxu1 }
 0x3e9   : > { %v7055_v29 = vadd.f32 %v6971_v49, %v2425_v11  ;;  %v2491_v45 = vsel %vm299_vm0, %v7008_v12, 0.0  ;;  %v2427_v44 = vadd.f32 %v6827_v42, %v6877_v9  ;;  %v1963_v55 = vadd.f32 %v6901_v21, %v1728_v37 }
 0x3ea   : > { %v2195_v15 = vadd.f32 %v6890_v61, %v1961_v27  ;;  %v1506_v11 = vadd.f32 %v8859_v31, %v6757_v60  ;;  %v2589_v28 = vsel %vm299_vm0, %v2557_v51, 0.0  ;;  %v2490_v34 = vadd.f32 %v2489_v25, %v2488_v46 }
 0x3eb   : > { %v2428_v10 = vadd.f32 %v6839_v20, %v6884_v54  ;;  %v2592_v42 = vsel %vm299_vm0, %v2559_v58, 0.0  ;;  %v2493_v9 = vsel %vm299_vm0, %v7016_v30, 0.0  ;;  %v2561_v61 = vmul.f32 %v7045_v40, %v7045_v40 }
 0x3ec   : > { %v7080_v21 = vadd.f32 %v6971_v49, %v2426_v13  ;;  %v2591_v37 = vadd.f32 %v2590_v3, %v2589_v28  ;;  %v2492_v27 = vadd.f32 %v2491_v45, %v2490_v34  ;;  %v2594_v60 = vsel %vm299_vm0, %v2560_v50, 0.0  ;;  %v7095_v3 = vpop.f32.mrf.mxu0 }
 0x3ed   : > { %v2562_v51 = vmul.f32 %v7055_v29, %v7055_v29  ;;  %v2495_v20 = vsel %vm299_vm0, %v7045_v40, 0.0  ;;  %v7088_v54 = vadd.f32 %v6971_v49, %v2427_v44  ;;  %v2429_v62 = vadd.f32 %v6848_v56, %v2195_v15 }
 0x3ee   : > { %v7063_v6 = vpop.f32.mrf.mxu2  ;;  %v2197_v25 = vadd.f32 %v6903_v35, %v1963_v55  ;;  %v2593_v58 = vadd.f32 %v2592_v42, %v2591_v37  ;;  %v2494_v13 = vadd.f32 %v2493_v9, %v2492_v27  ;;  %v7093_v46 = vadd.f32 %v6971_v49, %v2428_v10 }
 0x3ef   : > { %v7065_v36 = vpop.f32.mrf.mxu3  ;;  %v1965_v50 = vadd.f32 %v6917_v16, %v1730_v4  ;;  %v2596_v45 = vsel %vm299_vm0, %v2561_v61, 0.0  ;;  %v2497_v31 = vsel %vm299_vm0, %v7055_v29, 0.0  ;;  %v2563_v44 = vmul.f32 %v7080_v21, %v7080_v21 }
 0x3f0   : > { %v2430_v56 = vadd.f32 %v6859_v48, %v6899_v23  ;;  %v2595_v35 = vadd.f32 %v2594_v60, %v2593_v58  ;;  %v2496_v15 = vadd.f32 %v2495_v20, %v2494_v13  ;;  %v2598_v55 = vsel %vm299_vm0, %v2562_v51, 0.0  ;;  %v1699_v60 = vpop.f32.mrf.mxu1  ;;  %v8860_v51 = vld [vmem:[#allocation69_spill] sm:$0xff] }
 0x3f1   : > { %v7107_v28 = vadd.f32 %v6979_v59, %v1506_v11  ;;  %v2499_v16 = vsel %vm299_vm0, %v7080_v21, 0.0  ;;  %v2564_v4 = vmul.f32 %v7088_v54, %v7088_v54  ;;  %v7114_v34 = vadd.f32 %v6971_v49, %v2429_v62  ;;  %v8861_v62 = vld [vmem:[#allocation70_spill] sm:$0xff] }
 0x3f2   : > { %v2431_v10 = vadd.f32 %v6870_v43, %v2197_v25  ;;  %v2597_v23 = vadd.f32 %v2596_v45, %v2595_v35  ;;  %v2498_v9 = vadd.f32 %v2497_v31, %v2496_v15  ;;  %v2565_v59 = vmul.f32 %v7093_v46, %v7093_v46 }
 0x3f3   : > { %v2199_v11 = vadd.f32 %v6919_v39, %v1965_v50  ;;  %v2600_v61 = vsel %vm299_vm0, %v2563_v44, 0.0  ;;  %v7126_v37 = vadd.f32 %v6971_v49, %v2430_v56  ;;  %v2432_v27 = vadd.f32 %v6879_v63, %v6913_v53 }
 0x3f4   : > { %v1967_v43 = vadd.f32 %v6930_v26, %v7026_v32  ;;  %v1507_v20 = vadd.f32 %v8860_v51, %v6764_v2  ;;  %v1508_v25 = vadd.f32 %v8861_v62, %v6769_v8  ;;  %v2599_v58 = vadd.f32 %v2598_v55, %v2597_v23  ;;  %v7156_v55 = vpop.f32.mrf.mxu0 }
 0x3f5   : > { %v2500_v39 = vadd.f32 %v2499_v16, %v2498_v9  ;;  %v2501_v13 = vsel %vm299_vm0, %v7088_v54, 0.0  ;;  %v2602_v50 = vsel %vm299_vm0, %v2564_v4, 0.0  ;;  %v2566_v63 = vmul.f32 %v7114_v34, %v7114_v34 }
 0x3f6   : > { %v7117_v42 = vpop.f32.mrf.mxu2  ;;  %v7142_v53 = vadd.f32 %v6971_v49, %v2431_v10  ;;  %v2601_v26 = vadd.f32 %v2600_v61, %v2599_v58  ;;  %v2503_v2 = vsel %vm299_vm0, %v7093_v46, 0.0  ;;  %v2604_v32 = vsel %vm299_vm0, %v2565_v59, 0.0  ;;  %v8862_v61 = vld [vmem:[#allocation40_spill] sm:$0xff]  ;;  %v8864_v58 = vld [vmem:[#allocation79_spill] sm:$0xff] }
 0x3f7   : > { %v7119_v48 = vpop.f32.mrf.mxu3  ;;  %v2433_v8 = vadd.f32 %v6886_v47, %v2199_v11  ;;  %v2567_v45 = vmul.f32 %v7126_v37, %v7126_v37  ;;  %v7151_v31 = vadd.f32 %v6971_v49, %v2432_v27  ;;  %v2201_v44 = vadd.f32 %v6932_v0, %v1967_v43  ;;  %v8863_v43 = vld [vmem:[#allocation48_spill] sm:$0xff] }
 0x3f8   : > { %v1969_v56 = vadd.f32 %v6943_v57, %v7029_v24  ;;  %v2502_v35 = vadd.f32 %v2501_v13, %v2500_v39  ;;  %v2603_v15 = vadd.f32 %v2602_v50, %v2601_v26  ;;  %v2434_v16 = vadd.f32 %v6897_v17, %v6928_v52  ;;  %v8865_v39 = vld [vmem:[#allocation72_spill] sm:$0xff] }
 0x3f9   : > { %v1741_v47 = vadd.f32 %v7067_v22, %v1507_v20  ;;  %v2505_v4 = vsel %vm299_vm0, %v7114_v34, 0.0  ;;  %v2606_v10 = vsel %vm299_vm0, %v2566_v63, 0.0  ;;  %v2568_v0 = vmul.f32 %v7142_v53, %v7142_v53  ;;  %v8866_v26 = vld [vmem:[#allocation36_spill] sm:$0xff] }
 0x3fa   : > { %v7168_v57 = vadd.f32 %v1699_v60, %v1508_v25  ;;  %v2504_v24 = vadd.f32 %v2503_v2, %v2502_v35  ;;  %v2605_v59 = vadd.f32 %v2604_v32, %v2603_v15  ;;  %v2507_v17 = vsel %vm299_vm0, %v7126_v37, 0.0  ;;  %v8867_v2 = vld [vmem:[#allocation34_spill] sm:$0xff] }
 0x3fb   : > { %v7173_v52 = vadd.f32 %v6971_v49, %v2433_v8  ;;  %v2608_v22 = vsel %vm299_vm0, %v2567_v45, 0.0  ;;  %v2569_v11 = vmul.f32 %v7151_v31, %v7151_v31  ;;  %v2435_v27 = vadd.f32 %v8862_v61, %v2201_v44  ;;  %v1702_v8 = vpop.f32.mrf.mxu1  ;;  %v8868_v15 = vld [vmem:[#allocation42_spill] sm:$0xff] }
 0x3fc   : > { %v2203_v51 = vadd.f32 %v8863_v43, %v1969_v56  ;;  %v2506_v20 = vadd.f32 %v2505_v4, %v2504_v24  ;;  %v2607_v60 = vadd.f32 %v2606_v10, %v2605_v59  ;;  %v7181_v62 = vadd.f32 %v6971_v49, %v2434_v16 }
 0x3fd   : > { %v1971_v25 = vadd.f32 %v6954_v19, %v7034_v41  ;;  %v1509_v13 = vadd.f32 %v8865_v39, %v8864_v58  ;;  %v2509_v50 = vsel %vm299_vm0, %v7142_v53, 0.0  ;;  %v2610_v63 = vsel %vm299_vm0, %v2568_v0, 0.0 }
 0x3fe   : > { %v1932_v23 = vpop.f32.mrf.mxu2  ;;  %v2436_v32 = vadd.f32 %v8867_v2, %v8866_v26  ;;  %v2508_v45 = vadd.f32 %v2507_v17, %v2506_v20  ;;  %v2609_v44 = vadd.f32 %v2608_v22, %v2607_v60  ;;  %v2511_v56 = vsel %vm299_vm0, %v7151_v31, 0.0  ;;  %v7214_v20 = vpop.f32.mrf.mxu0  ;;  %v8869_v60 = vld [vmem:[#allocation37_spill] sm:$0xff] }
 0x3ff   : > { %v7166_v9 = vpop.f32.mrf.mxu3  ;;  %v2570_v41 = vmul.f32 %v7173_v52, %v7173_v52  ;;  %v2612_v19 = vsel %vm299_vm0, %v2569_v11, 0.0  ;;  %v7198_v35 = vadd.f32 %v6971_v49, %v2435_v27  ;;  %v2437_v16 = vadd.f32 %v8868_v15, %v2203_v51  ;;  %v8872_v26 = vld [vmem:[#allocation45_spill] sm:$0xff] }
 0x400   : > { %v1973_v4 = vadd.f32 %v6994_v33, %v7036_v5  ;;  %v2510_v10 = vadd.f32 %v2509_v50, %v2508_v45  ;;  %v2611_v0 = vadd.f32 %v2610_v63, %v2609_v44  ;;  %v2571_v24 = vmul.f32 %v7181_v62, %v7181_v62  ;;  %v8874_v45 = vld [vmem:[#allocation73_spill] sm:$0xff] }
 0x401   : > { %v2205_v59 = vadd.f32 %v6956_v38, %v1971_v25  ;;  %v2513_v17 = vsel %vm299_vm0, %v7173_v52, 0.0  ;;  %v7209_v22 = vadd.f32 %v6971_v49, %v2436_v32  ;;  %v1974_v11 = vadd.f32 %v7063_v6, %v7038_v18  ;;  %v8870_v38 = vld [vmem:[#allocation35_spill] sm:$0xff] }
 0x402   : > { %v1743_v43 = vadd.f32 %v1702_v8, %v1509_v13  ;;  %v2512_v33 = vadd.f32 %v2511_v56, %v2510_v10  ;;  %v2613_v5 = vadd.f32 %v2612_v19, %v2611_v0  ;;  %v2614_v51 = vsel %vm299_vm0, %v2570_v41, 0.0  ;;  %v8871_v6 = vld [vmem:[#allocation39_spill] sm:$0xff]  ;;  %v8873_v8 = vld [vmem:[#allocation80_spill] sm:$0xff] }
 0x403   : > { %v2438_v25 = vadd.f32 %v8870_v38, %v8869_v60  ;;  %v2515_v58 = vsel %vm299_vm0, %v7181_v62, 0.0  ;;  %v2572_v39 = vmul.f32 %v7198_v35, %v7198_v35  ;;  %v7223_v18 = vadd.f32 %v6971_v49, %v2437_v16  ;;  %v8877_v38 = vld [vmem:[#allocation38_spill] sm:$0xff] }
 0x404   : > { %v2207_v13 = vadd.f32 %v8871_v6, %v1973_v4  ;;  %v2514_v50 = vadd.f32 %v2513_v17, %v2512_v33  ;;  %v2616_v63 = vsel %vm299_vm0, %v2571_v24, 0.0  ;;  %v2439_v2 = vadd.f32 %v8872_v26, %v2205_v59  ;;  %v8875_v24 = vld [vmem:[#allocation51_spill] sm:$0xff]  ;;  %v1704_v17 = vpop.f32.mrf.mxu1 }
 0x405   : > { %v1975_v32 = vadd.f32 %v7117_v42, %v7107_v28  ;;  %v1510_v44 = vadd.f32 %v8874_v45, %v8873_v8  ;;  %v2615_v56 = vadd.f32 %v2614_v51, %v2613_v5  ;;  %v2573_v41 = vmul.f32 %v7209_v22, %v7209_v22  ;;  %v8876_v51 = vld [vmem:[#allocation53_spill] sm:$0xff] }
 0x406   : > { %v1934_v61 = vpop.f32.mrf.mxu2  ;;  %v2208_v19 = vadd.f32 %v7065_v36, %v1974_v11  ;;  %v2516_v15 = vadd.f32 %v2515_v58, %v2514_v50  ;;  %v2517_v16 = vsel %vm299_vm0, %v7198_v35, 0.0  ;;  %v7238_v4 = vadd.f32 %v6971_v49, %v2438_v25 }
 0x407   : > { %v2168_v27 = vpop.f32.mrf.mxu3  ;;  %v1976_v10 = vadd.f32 %v1932_v23, %v1741_v47  ;;  %v2617_v0 = vadd.f32 %v2616_v63, %v2615_v56  ;;  %v2618_v28 = vsel %vm299_vm0, %v2572_v39, 0.0  ;;  %v2574_v42 = vmul.f32 %v7223_v18, %v7223_v18 }
 0x408   : > { %v2441_v59 = vadd.f32 %v8875_v24, %v2207_v13  ;;  %v2519_v36 = vsel %vm299_vm0, %v7209_v22, 0.0  ;;  %v7247_v11 = vadd.f32 %v6971_v49, %v2439_v2  ;;  %v2209_v33 = vadd.f32 %v7119_v48, %v1975_v32  ;;  %v2407_v2 = vpop.f32.mrf.mxu0 }
 0x409   : > { %v1977_v5 = vadd.f32 %v1934_v61, %v7168_v57  ;;  %v2518_v47 = vadd.f32 %v2517_v16, %v2516_v15  ;;  %v2620_v23 = vsel %vm299_vm0, %v2573_v41, 0.0  ;;  %v7254_v60 = vadd.f32 %v6971_v49, %v8876_v51 }
 0x40a   : > { %v2442_v25 = vadd.f32 %v8877_v38, %v2208_v19  ;;  %v2521_v6 = vsel %vm299_vm0, %v7223_v18, 0.0  ;;  %v2575_v13 = vmul.f32 %v7238_v4, %v7238_v4  ;;  %v2210_v48 = vadd.f32 %v7166_v9, %v1976_v10 }
 0x40b   : > { %v2619_v61 = vadd.f32 %v2618_v28, %v2617_v0  ;;  %v2520_v50 = vadd.f32 %v2519_v36, %v2518_v47  ;;  %v2622_v63 = vsel %vm299_vm0, %v2574_v42, 0.0  ;;  %v7264_v26 = vadd.f32 %v6971_v49, %v2441_v59 }
 0x40c   : > { %v2523_v32 = vsel %vm299_vm0, %v7238_v4, 0.0  ;;  %v2576_v8 = vmul.f32 %v7247_v11, %v7247_v11  ;;  %v2443_v45 = vadd.f32 %v7020_v1, %v2209_v33  ;;  %v2211_v56 = vadd.f32 %v2168_v27, %v1977_v5 }
 0x40d   : > { %v2621_v41 = vadd.f32 %v2620_v23, %v2619_v61  ;;  %v2522_v9 = vadd.f32 %v2521_v6, %v2520_v50  ;;  %v7274_v19 = vadd.f32 %v6971_v49, %v2442_v25  ;;  %v2624_v15 = vsel %vm299_vm0, %v2575_v13, 0.0  ;;  %v8879_v6 = vld [vmem:[#allocation75_spill] sm:$0xff] }
 0x40e   : > { %v1937_v58 = vpop.f32.mrf.mxu2  ;;  %v2525_v16 = vsel %vm299_vm0, %v7247_v11, 0.0  ;;  %v2444_v10 = vadd.f32 %v7095_v3, %v2210_v48  ;;  %v2578_v1 = vmul.f32 %v7264_v26, %v7264_v26  ;;  %v1744_v27 = vadd.f32 %v1704_v17, %v1510_v44 }
 0x40f   : > { %v2171_v39 = vpop.f32.mrf.mxu3  ;;  %v1978_v57 = vadd.f32 %v1937_v58, %v1743_v43  ;;  %v2577_v43 = vmul.f32 %v7254_v60, %v7254_v60  ;;  %v2623_v28 = vadd.f32 %v2622_v63, %v2621_v41  ;;  %v2524_v42 = vadd.f32 %v2523_v32, %v2522_v9 }
 0x410   : > { %v2626_v24 = vsel %vm299_vm0, %v2576_v8, 0.0  ;;  %v2527_v59 = vsel %vm299_vm0, %v7254_v60, 0.0  ;;  %v7286_v36 = vadd.f32 %v6971_v49, %v2443_v45  ;;  %v2445_v33 = vadd.f32 %v7156_v55, %v2211_v56  ;;  %v8878_v55 = vld [vmem:[#allocation81_spill] sm:$0xff]  ;;  %v2410_v41 = vpop.f32.mrf.mxu0 }
 0x411   : > { %v2212_v0 = vadd.f32 %v2171_v39, %v1978_v57  ;;  %v2625_v5 = vadd.f32 %v2624_v15, %v2623_v28  ;;  %v2526_v47 = vadd.f32 %v2525_v16, %v2524_v42  ;;  %v2628_v3 = vsel %vm299_vm0, %v2577_v43, 0.0  ;;  %v1707_v39 = vpop.f32.mrf.mxu1 }
 0x412   : > { %v2579_v23 = vmul.f32 %v7274_v19, %v7274_v19  ;;  %v2529_v44 = vsel %vm299_vm0, %v7264_v26, 0.0  ;;  %v7295_v17 = vadd.f32 %v6971_v49, %v2444_v10  ;;  %v1511_v13 = vadd.f32 %v8879_v6, %v8878_v55 }
 0x413   : > { %v2446_v25 = vadd.f32 %v7214_v20, %v2212_v0  ;;  %v2627_v48 = vadd.f32 %v2626_v24, %v2625_v5  ;;  %v2528_v57 = vadd.f32 %v2527_v59, %v2526_v47  ;;  %v2630_v61 = vsel %vm299_vm0, %v2578_v1, 0.0 }
 0x414   : > { %v2531_v50 = vsel %vm299_vm0, %v7274_v19, 0.0  ;;  %v2580_v63 = vmul.f32 %v7286_v36, %v7286_v36  ;;  %v7306_v32 = vadd.f32 %v6971_v49, %v2445_v33  ;;  %v2632_v56 = vsel %vm299_vm0, %v2579_v23, 0.0 }
 0x415   : > { %v2629_v20 = vadd.f32 %v2628_v3, %v2627_v48  ;;  %v2530_v45 = vadd.f32 %v2529_v44, %v2528_v57  ;;  %v2533_v9 = vsel %vm299_vm0, %v7286_v36, 0.0  ;;  %v2581_v43 = vmul.f32 %v7295_v17, %v7295_v17  ;;  %v8881_v44 = vld [vmem:[#allocation76_spill] sm:$0xff] }
 0x416   : > { %v1939_v51 = vpop.f32.mrf.mxu2  ;;  %v7314_v15 = vadd.f32 %v6971_v49, %v2446_v25  ;;  %v1745_v28 = vadd.f32 %v1707_v39, %v1511_v13  ;;  %v2634_v42 = vsel %vm299_vm0, %v2580_v63, 0.0  ;;  %v2535_v1 = vsel %vm299_vm0, %v7295_v17, 0.0 }
 0x417   : > { %v2173_v38 = vpop.f32.mrf.mxu3  ;;  %v1979_v58 = vadd.f32 %v1939_v51, %v1744_v27  ;;  %v2631_v10 = vadd.f32 %v2630_v61, %v2629_v20  ;;  %v2532_v0 = vadd.f32 %v2531_v50, %v2530_v45  ;;  %v2582_v27 = vmul.f32 %v7306_v32, %v7306_v32 }
 0x418   : > { %v2537_v3 = vsel %vm299_vm0, %v7306_v32, 0.0  ;;  %v2583_v23 = vmul.f32 %v7314_v15, %v7314_v15  ;;  %v2539_v6 = vsel %vm299_vm0, %v7314_v15, 0.0 }
 0x419   : > { %v2213_v8 = vadd.f32 %v2173_v38, %v1979_v58  ;;  %v2633_v59 = vadd.f32 %v2632_v56, %v2631_v10  ;;  %v2534_v33 = vadd.f32 %v2533_v9, %v2532_v0  ;;  %v8880_v38 = vld [vmem:[#allocation82_spill] sm:$0xff]  ;;  %v2638_v55 = vsel %vm299_vm0, %v2582_v27, 0.0  ;;  %v1709_v57 = vpop.f32.mrf.mxu1  ;;  %v2412_v9 = vpop.f32.mrf.mxu0 }
 0x41a   : > { %v1512_v25 = vadd.f32 %v8881_v44, %v8880_v38  ;;  %v2640_v63 = vsel %vm299_vm0, %v2583_v23, 0.0 }
 0x41b   : > { %v2447_v16 = vadd.f32 %v2407_v2, %v2213_v8  ;;  %v2636_v2 = vsel %vm299_vm0, %v2581_v43, 0.0  ;;  %v2635_v58 = vadd.f32 %v2634_v42, %v2633_v59  ;;  %v2536_v39 = vadd.f32 %v2535_v1, %v2534_v33 }
 0x41c   : > { %v1746_v10 = vadd.f32 %v1709_v57, %v1512_v25 }
 0x41d   : > { %v7322_v24 = vadd.f32 %v6971_v49, %v2447_v16  ;;  %v2637_v61 = vadd.f32 %v2636_v2, %v2635_v58  ;;  %v2538_v50 = vadd.f32 %v2537_v3, %v2536_v39  ;;  %v8883_v2 = vld [vmem:[#allocation77_spill] sm:$0xff] }
 0x41e   : > { %v1942_v5 = vpop.f32.mrf.mxu2 }
 0x41f   : > { %v2176_v47 = vpop.f32.mrf.mxu3  ;;  %v1980_v51 = vadd.f32 %v1942_v5, %v1745_v28  ;;  %v2584_v13 = vmul.f32 %v7322_v24, %v7322_v24  ;;  %v2541_v8 = vsel %vm299_vm0, %v7322_v24, 0.0  ;;  %v2639_v45 = vadd.f32 %v2638_v55, %v2637_v61 }
 0x420   : > { %v2540_v56 = vadd.f32 %v2539_v6, %v2538_v50 }
 0x421   : > { %v2214_v48 = vadd.f32 %v2176_v47, %v1980_v51  ;;  %v2642_v43 = vsel %vm299_vm0, %v2584_v13, 0.0  ;;  %v2641_v0 = vadd.f32 %v2640_v63, %v2639_v45  ;;  %v8882_v47 = vld [vmem:[#allocation83_spill] sm:$0xff]  ;;  %v1712_v38 = vpop.f32.mrf.mxu1  ;;  %v2415_v61 = vpop.f32.mrf.mxu0  ;;  %v8884_v63 = vld [vmem:[#allocation33_spill] sm:$0xff] }
 0x422   : > { %v2542_v28 = vadd.f32 %v2541_v8, %v2540_v56  ;;  %v1513_v3 = vadd.f32 %v8883_v2, %v8882_v47  ;;  %v8885_v8 = vld [vmem:[#allocation78_spill] sm:$0xff] }
 0x423   : > { %v2448_v20 = vadd.f32 %v2410_v41, %v2214_v48  ;;  %v2643_v33 = vadd.f32 %v2642_v43, %v2641_v0 }
 0x424   : > { %v1747_v39 = vadd.f32 %v1712_v38, %v1513_v3 }
 0x425   : > { %v7341_v16 = vadd.f32 %v6971_v49, %v2448_v20  ;;  %v1514_v20 = vadd.f32 %v8885_v8, %v8884_v63 }
 0x426   : > { %v1944_v42 = vpop.f32.mrf.mxu2 }
 0x427   : > { %v2178_v1 = vpop.f32.mrf.mxu3  ;;  %v2543_v27 = vsel %vm299_vm0, %v7341_v16, 0.0  ;;  %v2585_v59 = vmul.f32 %v7341_v16, %v7341_v16  ;;  %v1981_v41 = vadd.f32 %v1944_v42, %v1746_v10 }
 0x428   : > { %v2544_v5 = vadd.f32 %v2543_v27, %v2542_v28 }
 0x429   : > { %v2644_v23 = vsel %vm299_vm0, %v2585_v59, 0.0  ;;  %v2215_v51 = vadd.f32 %v2178_v1, %v1981_v41  ;;  %v1714_v10 = vpop.f32.mrf.mxu1  ;;  %v2417_v2 = vpop.f32.mrf.mxu0 }
 0x42a   : > { %v2645_v44 = vadd.f32 %v2644_v23, %v2643_v33  ;;  %v1748_v28 = vadd.f32 %v1714_v10, %v1514_v20 }
 0x42b   : > { %v2449_v25 = vadd.f32 %v2412_v9, %v2215_v51 }
 0x42d   : > { %v7351_v58 = vadd.f32 %v6971_v49, %v2449_v25 }
 0x42e   : > { %v1947_v55 = vpop.f32.mrf.mxu2 }
 0x42f   : > { %v2181_v6 = vpop.f32.mrf.mxu3  ;;  %v2545_v13 = vsel %vm299_vm0, %v7351_v58, 0.0  ;;  %v2586_v48 = vmul.f32 %v7351_v58, %v7351_v58  ;;  %v1982_v57 = vadd.f32 %v1947_v55, %v1747_v39 }
 0x430   : > { %v2546_v50 = vadd.f32 %v2545_v13, %v2544_v5 }
 0x431   : > { %v2646_v45 = vsel %vm299_vm0, %v2586_v48, 0.0  ;;  %v2216_v56 = vadd.f32 %v2181_v6, %v1982_v57 }
 0x432   : > { %v2647_v9 = vadd.f32 %v2646_v45, %v2645_v44 }
 0x433   : > { %v2450_v43 = vadd.f32 %v2415_v61, %v2216_v56 }
 0x435   : > { %v7361_v0 = vadd.f32 %v6971_v49, %v2450_v43  ;;  %v5892_v43 = vld [vmem:[%s8685_s3 + $0x8] sm:$0xff] }
 0x436   : > { %v1949_v42 = vpop.f32.mrf.mxu2  ;;  %3198 = vmatpush.bf16.msrb.mxu2 %v5892_v43 }
 0x437   : > { %v2547_v1 = vsel %vm299_vm0, %v7361_v0, 0.0  ;;  %v2587_v27 = vmul.f32 %v7361_v0, %v7361_v0  ;;  %v1983_v59 = vadd.f32 %v1949_v42, %v1748_v28  ;;  %v2183_v33 = vpop.f32.mrf.mxu3 }
 0x438   : > { %v2548_v41 = vadd.f32 %v2547_v1, %v2546_v50 }
 0x439   : > { %v2648_v5 = vsel %vm299_vm0, %v2587_v27, 0.0  ;;  %v2217_v47 = vadd.f32 %v2183_v33, %v1983_v59  ;;  %v5896_v27 = vld [vmem:[%s8685_s3 + $0x28] sm:$0xff] }
 0x43a   : > { %v2649_v3 = vadd.f32 %v2648_v5, %v2647_v9  ;;  %3400 = vmatpush.bf16.msrb.mxu3 %v5896_v27 }
 0x43b   : > { %v2451_v23 = vadd.f32 %v2417_v2, %v2217_v47 }
 0x43d   : > { %v7369_v51 = vadd.f32 %v6971_v49, %v2451_v23 }
 0x43f   : > { %v2549_v38 = vsel %vm299_vm0, %v7369_v51, 0.0  ;;  %v2588_v44 = vmul.f32 %v7369_v51, %v7369_v51 }
 0x440   : > { %v2550_v25 = vadd.f32 %v2549_v38, %v2548_v41 }
 0x441   : > { %v2650_v39 = vsel %vm299_vm0, %v2588_v44, 0.0 }
 0x442   : > { %v2551_v55 = vrot.slane %v2550_v25, 4  ;;  %v2651_v6 = vadd.f32 %v2650_v39, %v2649_v3  ;;  %v5898_v3 = vld [vmem:[%s8685_s3 + $0x38] sm:$0xff] }
 0x443   : > { %3634 = vmatpush.bf16.msrb.mxu0 %v5898_v3 }
 0x444   : > { %v2552_v13 = vadd.f32 %v2551_v55, %v2550_v25  ;;  %v2652_v48 = vrot.slane %v2651_v6, 4 }
 0x446   : > { %v2553_v57 = vrot.slane %v2552_v13, 2  ;;  %v2653_v61 = vadd.f32 %v2652_v48, %v2651_v6 }
 0x448   : > { %v2554_v50 = vadd.f32 %v2553_v57, %v2552_v13  ;;  %v2654_v63 = vrot.slane %v2653_v61, 2 }
 0x44a   : > { %v2555_v8 = vrot.slane %v2554_v50, 1  ;;  %v2655_v49 = vadd.f32 %v2654_v63, %v2653_v61 }
 0x44c   : > { %v2556_v20 = vadd.f32 %v2555_v8, %v2554_v50  ;;  %v2656_v45 = vrot.slane %v2655_v49, 1 }
 0x44e   : > { %v2657_v56 = vadd.f32 %v2656_v45, %v2655_v49  ;;  %v7376_v9 = vmul.f32 0.00390625, %v2556_v20 }
 0x450   : > { %v2659_v10 = vmul.f32 0.00390625, %v2657_v56  ;;  %v2660_v28 = vmul.f32 %v7376_v9, %v7376_v9  ;;  %v2694_v42 = vsub.f32 %v7369_v51, %v7376_v9  ;;  %v2690_v33 = vsub.f32 %v7322_v24, %v7376_v9 }
 0x451   : > { %v2691_v5 = vsub.f32 %v7341_v16, %v7376_v9  ;;  %v2692_v47 = vsub.f32 %v7351_v58, %v7376_v9  ;;  %v2693_v2 = vsub.f32 %v7361_v0, %v7376_v9  ;;  %v2663_v44 = vsub.f32 %v7005_v7, %v7376_v9 }
 0x452   : > { %v2661_v1 = vsub.f32 %v2659_v10, %v2660_v28  ;;  %v2664_v25 = vsub.f32 %v6984_v14, %v7376_v9  ;;  %v2665_v39 = vsub.f32 %v7008_v12, %v7376_v9  ;;  %v2666_v55 = vsub.f32 %v7016_v30, %v7376_v9 }
 0x453   : > { %v2667_v6 = vsub.f32 %v7045_v40, %v7376_v9  ;;  %v2668_v48 = vsub.f32 %v7055_v29, %v7376_v9  ;;  %v2669_v57 = vsub.f32 %v7080_v21, %v7376_v9  ;;  %v2670_v7 = vsub.f32 %v7088_v54, %v7376_v9 }
 0x454   : > { %v2662_v59 = vmax.f32 %v2661_v1, 0.0  ;;  %v2671_v14 = vsub.f32 %v7093_v46, %v7376_v9  ;;  %v2672_v12 = vsub.f32 %v7114_v34, %v7376_v9  ;;  %v2673_v30 = vsub.f32 %v7126_v37, %v7376_v9 }
 0x455   : > { %v2674_v40 = vsub.f32 %v7142_v53, %v7376_v9  ;;  %v2675_v29 = vsub.f32 %v7151_v31, %v7376_v9  ;;  %v2676_v21 = vsub.f32 %v7173_v52, %v7376_v9  ;;  %v2677_v54 = vsub.f32 %v7181_v62, %v7376_v9 }
 0x456   : > { %v2695_v41 = vadd.f32 1e-05, %v2662_v59  ;;  %v2678_v46 = vsub.f32 %v7198_v35, %v7376_v9  ;;  %v2679_v34 = vsub.f32 %v7209_v22, %v7376_v9  ;;  %v2680_v37 = vsub.f32 %v7223_v18, %v7376_v9 }
 0x457   : > { %v2681_v31 = vsub.f32 %v7238_v4, %v7376_v9  ;;  %v2682_v52 = vsub.f32 %v7247_v11, %v7376_v9  ;;  %v2683_v62 = vsub.f32 %v7254_v60, %v7376_v9  ;;  %v2684_v35 = vsub.f32 %v7264_v26, %v7376_v9 }
 0x458   : > { %5924 = vrsqrt.f32 %v2695_v41  ;;  %vm2702_vm3 = vweird.f32 %v2695_v41  ;;  %v2685_v22 = vsub.f32 %v7274_v19, %v7376_v9  ;;  %v2686_v18 = vsub.f32 %v7286_v36, %v7376_v9 }
 0x459   : > { %v2687_v4 = vsub.f32 %v7295_v17, %v7376_v9  ;;  %v2688_v11 = vsub.f32 %v7306_v32, %v7376_v9  ;;  %v2689_v63 = vsub.f32 %v7314_v15, %v7376_v9 }
 0x45e   : > { %v5925_v23 = vpop.eup %5924 }
 0x45f   : > { %v2697_v51 = vmul.f32 %v5925_v23, %v2695_v41  ;;  %vm2703_vm2 = vweird.f32 %v5925_v23 }
 0x460   : > { %vm2704_vm4 = vmor %vm2702_vm3, %vm2703_vm2 }
 0x461   : > { %v2698_v38 = vmul.f32 %v5925_v23, %v2697_v51 }
 0x463   : > { %v2699_v13 = vmul.f32 0.5, %v2698_v38 }
 0x465   : > { %v2700_v61 = vsub.f32 1.5, %v2699_v13 }
 0x467   : > { %v2701_v53 = vmul.f32 %v5925_v23, %v2700_v61 }
 0x469   : > { %v2705_v50 = vsel %vm2704_vm4, %v5925_v23, %v2701_v53 }
 0x46a   : > { %v2737_v60 = vmul.f32 %v2705_v50, %v2694_v42  ;;  %v2706_v8 = vmul.f32 %v2705_v50, %v2663_v44  ;;  %v2707_v49 = vmul.f32 %v2705_v50, %v2664_v25  ;;  %v7453_v26 = vmul.f32 %v2705_v50, %v2665_v39 }
 0x46b   : > { %v7455_v20 = vmul.f32 %v2705_v50, %v2666_v55  ;;  %v2710_v19 = vmul.f32 %v2705_v50, %v2667_v6  ;;  %v2711_v45 = vmul.f32 %v2705_v50, %v2668_v48  ;;  %v2712_v36 = vmul.f32 %v2705_v50, %v2669_v57 }
 0x46c   : > { %v2769_v56 = vmax.f32 %v2737_v60, 0.0  ;;  %v2713_v43 = vmul.f32 %v2705_v50, %v2670_v7  ;;  %v2714_v10 = vmul.f32 %v2705_v50, %v2671_v14  ;;  %v2715_v17 = vmul.f32 %v2705_v50, %v2672_v12 }
 0x46d   : > { %v2716_v28 = vmul.f32 %v2705_v50, %v2673_v30  ;;  %v2717_v1 = vmul.f32 %v2705_v50, %v2674_v40  ;;  %v2718_v32 = vmul.f32 %v2705_v50, %v2675_v29  ;;  %v2719_v27 = vmul.f32 %v2705_v50, %v2676_v21  ;;  %v5900_v21 = vld [vmem:[%s8685_s3 + $0x48] sm:$0xff] }
 0x46e   : > { %2801 = vst.msk [vmem:[#allocation2 + $0x189] sm:$0xff] %vm299_vm0, %v2769_v56  ;;  %v2720_v15 = vmul.f32 %v2705_v50, %v2677_v54  ;;  %v2721_v42 = vmul.f32 %v2705_v50, %v2678_v46  ;;  %v2722_v59 = vmul.f32 %v2705_v50, %v2679_v34  ;;  %v2723_v41 = vmul.f32 %v2705_v50, %v2680_v37  ;;  %v5891_v54 = vld [vmem:[%s8685_s3] sm:$0xff]  ;;  %v5897_v37 = vld [vmem:[%s8685_s3 + $0x30] sm:$0xff] }
 0x46f   : > { %v7458_v3 = vmul.f32 %v2705_v50, %v2681_v31  ;;  %v7460_v23 = vmul.f32 %v2705_v50, %v2682_v52  ;;  %v7462_v51 = vmul.f32 %v2705_v50, %v2683_v62  ;;  %v7464_v38 = vmul.f32 %v2705_v50, %v2684_v35  ;;  %v5895_v46 = vld [vmem:[%s8685_s3 + $0x20] sm:$0xff]  ;;  %3868 = vmatpush.bf16.msrb.mxu1 %v5900_v21 }
 0x470   : > { %v7466_v44 = vmul.f32 %v2705_v50, %v2685_v22  ;;  %v7468_v25 = vmul.f32 %v2705_v50, %v2686_v18  ;;  %v7470_v39 = vmul.f32 %v2705_v50, %v2687_v4  ;;  %v7472_v55 = vmul.f32 %v2705_v50, %v2688_v11  ;;  %3199 = vmatpush.bf16.msrb.mxu2 %v5891_v54 }
 0x471   : > { %v7474_v6 = vmul.f32 %v2705_v50, %v2689_v63  ;;  %v7479_v13 = vmul.f32 %v2705_v50, %v2690_v33  ;;  %v7484_v48 = vmul.f32 %v2705_v50, %v2691_v5  ;;  %v7489_v57 = vmul.f32 %v2705_v50, %v2692_v47  ;;  %3401 = vmatpush.bf16.msrb.mxu3 %v5895_v46 }
 0x472   : > { %v7494_v7 = vmul.f32 %v2705_v50, %v2693_v2  ;;  %v2738_v14 = vmax.f32 %v2706_v8, 0.0  ;;  %v2739_v12 = vmax.f32 %v2707_v49, 0.0  ;;  %v2740_v24 = vmax.f32 %v7453_v26, 0.0  ;;  %3635 = vmatpush.bf16.msrb.mxu0 %v5897_v37 }
 0x473   : > { %v2741_v33 = vmax.f32 %v7455_v20, 0.0  ;;  %v2742_v30 = vmax.f32 %v2710_v19, 0.0  ;;  %v2743_v16 = vmax.f32 %v2711_v45, 0.0  ;;  %v2744_v58 = vmax.f32 %v2712_v36, 0.0 }
 0x474   : > { %2770 = vst.msk [vmem:[#allocation2 + $0x19] sm:$0xff] %vm299_vm0, %v2738_v14  ;;  %v2745_v0 = vmax.f32 %v2713_v43, 0.0  ;;  %v2746_v9 = vmax.f32 %v2714_v10, 0.0  ;;  %v2747_v5 = vmax.f32 %v2715_v17, 0.0  ;;  %v2748_v47 = vmax.f32 %v2716_v28, 0.0 }
 0x475   : > { %2771 = vst.msk [vmem:[#allocation2 + $0x21] sm:$0xff] %vm299_vm0, %v2739_v12  ;;  %v2749_v2 = vmax.f32 %v2717_v1, 0.0  ;;  %v2750_v40 = vmax.f32 %v2718_v32, 0.0  ;;  %v2751_v61 = vmax.f32 %v2719_v27, 0.0  ;;  %v2752_v29 = vmax.f32 %v2720_v15, 0.0 }
 0x476   : > { %2772 = vst.msk [vmem:[#allocation2 + $0x31] sm:$0xff] %vm299_vm0, %v2740_v24  ;;  %v2753_v34 = vmax.f32 %v2721_v42, 0.0  ;;  %v2754_v53 = vmax.f32 %v2722_v59, 0.0  ;;  %v2755_v31 = vmax.f32 %v2723_v41, 0.0  ;;  %v2756_v52 = vmax.f32 %v7458_v3, 0.0 }
 0x477   : > { %2773 = vst.msk [vmem:[#allocation2 + $0x39] sm:$0xff] %vm299_vm0, %v2741_v33  ;;  %v2757_v62 = vmax.f32 %v7460_v23, 0.0  ;;  %v2758_v35 = vmax.f32 %v7462_v51, 0.0  ;;  %v2759_v22 = vmax.f32 %v7464_v38, 0.0  ;;  %v2760_v18 = vmax.f32 %v7466_v44, 0.0 }
 0x478   : > { %2774 = vst.msk [vmem:[#allocation2 + $0x49] sm:$0xff] %vm299_vm0, %v2742_v30  ;;  %v2761_v50 = vmax.f32 %v7468_v25, 0.0  ;;  %v2762_v4 = vmax.f32 %v7470_v39, 0.0  ;;  %v2763_v11 = vmax.f32 %v7472_v55, 0.0  ;;  %v2764_v63 = vmax.f32 %v7474_v6, 0.0 }
 0x479   : > { %2775 = vst.msk [vmem:[#allocation2 + $0x51] sm:$0xff] %vm299_vm0, %v2743_v16  ;;  %v2765_v60 = vmax.f32 %v7479_v13, 0.0  ;;  %v2766_v8 = vmax.f32 %v7484_v48, 0.0  ;;  %v2767_v49 = vmax.f32 %v7489_v57, 0.0  ;;  %v2768_v19 = vmax.f32 %v7494_v7, 0.0 }
 0x47a   : > { %2776 = vst.msk [vmem:[#allocation2 + $0x61] sm:$0xff] %vm299_vm0, %v2744_v58 }
 0x47b   : > { %2777 = vst.msk [vmem:[#allocation2 + $0x69] sm:$0xff] %vm299_vm0, %v2745_v0  ;;  %v2807_v45 = vld [vmem:[#allocation2 + $0x1a] sm:$0x1] }
 0x47c   : > { %2778 = vst.msk [vmem:[#allocation2 + $0x79] sm:$0xff] %vm299_vm0, %v2746_v9  ;;  %v2843_v36 = vld [vmem:[#allocation2 + $0x27] sm:$0x1]  ;;  %v2932_v30 = vld [vmem:[#allocation2 + $0x19] sm:$0xff] }
 0x47d   : > { %2779 = vst.msk [vmem:[#allocation2 + $0x81] sm:$0xff] %vm299_vm0, %v2747_v5  ;;  %v2808_v56 = vld [vmem:[#allocation2 + $0x32] sm:$0x1]  ;;  %v3516_v59 = vld [vmem:[#allocation2 + $0x20] sm:$0xff] }
 0x47e   : > { %2780 = vst.msk [vmem:[#allocation2 + $0x91] sm:$0xff] %vm299_vm0, %v2748_v47  ;;  %v2844_v43 = vld [vmem:[#allocation2 + $0x3f] sm:$0x1]  ;;  %v2933_v16 = vld [vmem:[#allocation2 + $0x21] sm:$0xff] }
 0x47f   : > { %2781 = vst.msk [vmem:[#allocation2 + $0x99] sm:$0xff] %vm299_vm0, %v2749_v2  ;;  %v2809_v26 = vld [vmem:[#allocation2 + $0x4a] sm:$0x1]  ;;  %v7594_v5 = vpack.c.bf16 %v2933_v16, %v2932_v30  ;;  %v5899_v16 = vld [vmem:[%s8685_s3 + $0x40] sm:$0xff] }
 0x480   : > { %2782 = vst.msk [vmem:[#allocation2 + $0xa9] sm:$0xff] %vm299_vm0, %v2750_v40  ;;  %v2845_v10 = vld [vmem:[#allocation2 + $0x57] sm:$0x1]  ;;  %3869 = vmatpush.bf16.msrb.mxu1 %v5899_v16 }
 0x481   : > { %2783 = vst.msk [vmem:[#allocation2 + $0xb1] sm:$0xff] %vm299_vm0, %v2751_v61  ;;  %v2810_v27 = vld [vmem:[#allocation2 + $0x62] sm:$0x1]  ;;  %v3518_v61 = vld [vmem:[#allocation2 + $0x38] sm:$0xff] }
 0x482   : > { %2784 = vst.msk [vmem:[#allocation2 + $0xc1] sm:$0xff] %vm299_vm0, %v2752_v29  ;;  %v2846_v15 = vld [vmem:[#allocation2 + $0x6f] sm:$0x1] }
 0x483   : > { %2785 = vst.msk [vmem:[#allocation2 + $0xc9] sm:$0xff] %vm299_vm0, %v2753_v34  ;;  %v2811_v41 = vld [vmem:[#allocation2 + $0x7a] sm:$0x1] }
 0x484   : > { %2786 = vst.msk [vmem:[#allocation2 + $0xd9] sm:$0xff] %vm299_vm0, %v2754_v53  ;;  %v2847_v23 = vld [vmem:[#allocation2 + $0x87] sm:$0x1] }
 0x485   : > { %2787 = vst.msk [vmem:[#allocation2 + $0xe1] sm:$0xff] %vm299_vm0, %v2755_v31  ;;  %v2812_v51 = vld [vmem:[#allocation2 + $0x92] sm:$0x1]  ;;  %v3283_v31 = vld [vmem:[#allocation2 + $0x1a] sm:$0xff] }
 0x486   : > { %2788 = vst.msk [vmem:[#allocation2 + $0xf1] sm:$0xff] %vm299_vm0, %v2756_v52  ;;  %v2848_v38 = vld [vmem:[#allocation2 + $0x9f] sm:$0x1] }
 0x487   : > { %2789 = vst.msk [vmem:[#allocation2 + $0xf9] sm:$0xff] %vm299_vm0, %v2757_v62  ;;  %v2813_v39 = vld [vmem:[#allocation2 + $0xaa] sm:$0x1] }
 0x488   : > { %2790 = vst.msk [vmem:[#allocation2 + $0x109] sm:$0xff] %vm299_vm0, %v2758_v35  ;;  %v2849_v48 = vld [vmem:[#allocation2 + $0xb7] sm:$0x1] }
 0x489   : > { %2791 = vst.msk [vmem:[#allocation2 + $0x111] sm:$0xff] %vm299_vm0, %v2759_v22  ;;  %v2814_v7 = vld [vmem:[#allocation2 + $0xc2] sm:$0x1]  ;;  %v2858_v22 = vld [vmem:[#allocation2 + $0x18f] sm:$0x1]  ;;  %v3528_v30 = vld [vmem:[#allocation2 + $0xb0] sm:$0xff] }
 0x48a   : > { %2792 = vst.msk [vmem:[#allocation2 + $0x121] sm:$0xff] %vm299_vm0, %v2760_v18  ;;  %v2850_v14 = vld [vmem:[#allocation2 + $0xcf] sm:$0x1] }
 0x48b   : > { %2793 = vst.msk [vmem:[#allocation2 + $0x129] sm:$0xff] %vm299_vm0, %v2761_v50  ;;  %v2815_v12 = vld [vmem:[#allocation2 + $0xda] sm:$0x1] }
 0x48c   : > { %2794 = vst.msk [vmem:[#allocation2 + $0x139] sm:$0xff] %vm299_vm0, %v2762_v4  ;;  %v2934_v4 = vld [vmem:[#allocation2 + $0x31] sm:$0xff] }
 0x48d   : > { %2795 = vst.msk [vmem:[#allocation2 + $0x141] sm:$0xff] %vm299_vm0, %v2763_v11  ;;  %v2935_v11 = vld [vmem:[#allocation2 + $0x39] sm:$0xff] }
 0x48e   : > { %2796 = vst.msk [vmem:[#allocation2 + $0x151] sm:$0xff] %vm299_vm0, %v2764_v63  ;;  %v2852_v58 = vld [vmem:[#allocation2 + $0xff] sm:$0x1]  ;;  %v7623_v63 = vpack.c.bf16 %v2935_v11, %v2934_v4  ;;  %v3532_v4 = vld [vmem:[#allocation2 + $0xe0] sm:$0xff] }
 0x48f   : > { %2797 = vst.msk [vmem:[#allocation2 + $0x159] sm:$0xff] %vm299_vm0, %v2765_v60  ;;  %v2817_v0 = vld [vmem:[#allocation2 + $0x10a] sm:$0x1] }
 0x490   : > { %2798 = vst.msk [vmem:[#allocation2 + $0x169] sm:$0xff] %vm299_vm0, %v2766_v8  ;;  %v2853_v9 = vld [vmem:[#allocation2 + $0x117] sm:$0x1] }
 0x491   : > { %2799 = vst.msk [vmem:[#allocation2 + $0x171] sm:$0xff] %vm299_vm0, %v2767_v49  ;;  %v2818_v2 = vld [vmem:[#allocation2 + $0x122] sm:$0x1] }
 0x492   : > { %2800 = vst.msk [vmem:[#allocation2 + $0x181] sm:$0xff] %vm299_vm0, %v2768_v19  ;;  %v2854_v40 = vld [vmem:[#allocation2 + $0x12f] sm:$0x1] }
 0x493   : > { %2802 = vst.msk [vmem:[#allocation2 + $0x1] sm:$0xff] %vm299_vm0, %v2740_v24  ;;  %v2851_v24 = vld [vmem:[#allocation2 + $0xe7] sm:$0x1]  ;;  %v2819_v29 = vld [vmem:[#allocation2 + $0x13a] sm:$0x1] }
 0x494   : > { %2803 = vst.msk [vmem:[#allocation2 + $0x9] sm:$0xff] %vm299_vm0, %v2741_v33  ;;  %v2816_v33 = vld [vmem:[#allocation2 + $0xf2] sm:$0x1]  ;;  %v2855_v54 = vld [vmem:[#allocation2 + $0x147] sm:$0x1] }
 0x495   : > { %2804 = vst.msk [vmem:[#allocation2 + $0x199] sm:$0xff] %vm299_vm0, %v2766_v8  ;;  %v2820_v46 = vld [vmem:[#allocation2 + $0x152] sm:$0x1] }
 0x496   : > { %2805 = vst.msk [vmem:[#allocation2 + $0x1a1] sm:$0xff] %vm299_vm0, %v2767_v49  ;;  %v2856_v37 = vld [vmem:[#allocation2 + $0x15f] sm:$0x1]  ;;  %v3520_v8 = vld [vmem:[#allocation2 + $0x50] sm:$0xff] }
 0x497   : > { %2825 = vst.msk [vmem:[#allocation2 + $0x18] sm:$0x1] %vm355_vm1, %v2807_v45  ;;  %v2821_v53 = vld [vmem:[#allocation2 + $0x16a] sm:$0x1]  ;;  %v3285_v45 = vld [vmem:[#allocation2 + $0x32] sm:$0xff] }
 0x498   : > { %2861 = vst.msk [vmem:[#allocation2 + $0x29] sm:$0x1] %vm355_vm1, %v2843_v36  ;;  %v2857_v52 = vld [vmem:[#allocation2 + $0x177] sm:$0x1] }
 0x499   : > { %2826 = vst.msk [vmem:[#allocation2 + $0x30] sm:$0x1] %vm355_vm1, %v2808_v56  ;;  %v2822_v35 = vld [vmem:[#allocation2 + $0x182] sm:$0x1]  ;;  %v2936_v56 = vld [vmem:[#allocation2 + $0x49] sm:$0xff] }
 0x49a   : > { %v2930_v17 = vld [vmem:[#allocation2 + $0x1] sm:$0xff]  ;;  %2862 = vst.msk [vmem:[#allocation2 + $0x41] sm:$0x1] %vm355_vm1, %v2844_v43  ;;  %v2937_v43 = vld [vmem:[#allocation2 + $0x51] sm:$0xff] }
 0x49b   : > { %v2806_v20 = vld [vmem:[#allocation2 + $0x2] sm:$0x1]  ;;  %v2931_v28 = vld [vmem:[#allocation2 + $0x9] sm:$0xff]  ;;  %2827 = vst.msk [vmem:[#allocation2 + $0x48] sm:$0x1] %vm355_vm1, %v2809_v26  ;;  %v7637_v26 = vpack.c.bf16 %v2937_v43, %v2936_v56 }
 0x49c   : > { %2824 = vst.msk [vmem:[#allocation2] sm:$0x1] %vm355_vm1, %v2806_v20  ;;  %v2842_v1 = vld [vmem:[#allocation2 + $0xf] sm:$0x1]  ;;  %v2962_v32 = vpack.c.bf16 %v2931_v28, %v2930_v17  ;;  %v3281_v6 = vld [vmem:[#allocation2 + $0x2] sm:$0xff] }
 0x49d   : > { %2860 = vst.msk [vmem:[#allocation2 + $0x11] sm:$0x1] %vm355_vm1, %v2842_v1  ;;  %v2879_v25 = vld [vmem:[#allocation2 + $0x8] sm:$0xff]  ;;  %v2823_v18 = vld [vmem:[#allocation2 + $0x19a] sm:$0x1] }
 0x49e   : > { %5633 = vmatmul.msk.bf16.vlgmr.msra.gmra.mxu1 %vm299_vm0, %v2962_v32  ;;  %v3515_v42 = vld [vmem:[#allocation2 + $0x18] sm:$0xff]  ;;  %2863 = vst.msk [vmem:[#allocation2 + $0x59] sm:$0x1] %vm355_vm1, %v2845_v10  ;;  %v2859_v50 = vld [vmem:[#allocation2 + $0x1a7] sm:$0x1]  ;;  %v3522_v17 = vld [vmem:[#allocation2 + $0x68] sm:$0xff] }
 0x49f   : > { %v7575_v3 = vpack.c.bf16 %v3516_v59, %v3515_v42  ;;  %2828 = vst.msk [vmem:[#allocation2 + $0x60] sm:$0x1] %vm355_vm1, %v2810_v27  ;;  %v3284_v34 = vld [vmem:[#allocation2 + $0x22] sm:$0xff]  ;;  %v3287_v1 = vld [vmem:[#allocation2 + $0x4a] sm:$0xff] }
 0x4a0   : > { %2864 = vst.msk [vmem:[#allocation2 + $0x71] sm:$0x1] %vm355_vm1, %v2846_v15  ;;  %v3517_v47 = vld [vmem:[#allocation2 + $0x30] sm:$0xff]  ;;  %v7610_v62 = vpack.c.bf16 %v3284_v34, %v3283_v31  ;;  %v2938_v27 = vld [vmem:[#allocation2 + $0x61] sm:$0xff] }
 0x4a1   : > { %5713 = vmatmul.msk.bf16.vlgmr.msrb.gmra.mxu0 %vm299_vm0, %v7575_v3  ;;  %2829 = vst.msk [vmem:[#allocation2 + $0x78] sm:$0x1] %vm355_vm1, %v2811_v41  ;;  %v7601_v21 = vpack.c.bf16 %v3518_v61, %v3517_v47  ;;  %v3286_v19 = vld [vmem:[#allocation2 + $0x3a] sm:$0xff]  ;;  %v2939_v15 = vld [vmem:[#allocation2 + $0x69] sm:$0xff] }
 0x4a2   : > { %2865 = vst.msk [vmem:[#allocation2 + $0x89] sm:$0x1] %vm355_vm1, %v2847_v23  ;;  %v3519_v60 = vld [vmem:[#allocation2 + $0x48] sm:$0xff]  ;;  %v7631_v36 = vpack.c.bf16 %v3286_v19, %v3285_v45  ;;  %v7651_v42 = vpack.c.bf16 %v2939_v15, %v2938_v27  ;;  %v3524_v41 = vld [vmem:[#allocation2 + $0x80] sm:$0xff] }
 0x4a3   : > { %v2878_v44 = vld [vmem:[#allocation2] sm:$0xff]  ;;  %2830 = vst.msk [vmem:[#allocation2 + $0x90] sm:$0x1] %vm355_vm1, %v2812_v51  ;;  %v7627_v49 = vpack.c.bf16 %v3520_v8, %v3519_v60 }
 0x4a4   : > { %v2910_v55 = vpack.c.bf16 %v2879_v25, %v2878_v44  ;;  %v3282_v13 = vld [vmem:[#allocation2 + $0xa] sm:$0xff]  ;;  %2866 = vst.msk [vmem:[#allocation2 + $0xa1] sm:$0x1] %vm355_vm1, %v2848_v38  ;;  %v3289_v51 = vld [vmem:[#allocation2 + $0x62] sm:$0xff]  ;;  %v2940_v44 = vld [vmem:[#allocation2 + $0x79] sm:$0xff] }
 0x4a5   : > { %v3313_v57 = vpack.c.bf16 %v3282_v13, %v3281_v6  ;;  %2831 = vst.msk [vmem:[#allocation2 + $0xa8] sm:$0x1] %vm355_vm1, %v2813_v39  ;;  %v3288_v28 = vld [vmem:[#allocation2 + $0x52] sm:$0xff]  ;;  %v2941_v25 = vld [vmem:[#allocation2 + $0x81] sm:$0xff] }
 0x4a6   : > { %5657 = vmatmul.msk.bf16.vlgmr.msrb.gmra.mxu2 %vm299_vm0, %v2910_v55  ;;  %2867 = vst.msk [vmem:[#allocation2 + $0xb9] sm:$0x1] %vm355_vm1, %v2849_v48  ;;  %v3521_v10 = vld [vmem:[#allocation2 + $0x60] sm:$0xff]  ;;  %v7645_v32 = vpack.c.bf16 %v3288_v28, %v3287_v1  ;;  %v7665_v39 = vpack.c.bf16 %v2941_v25, %v2940_v44  ;;  %v3526_v6 = vld [vmem:[#allocation2 + $0x98] sm:$0xff] }
 0x4a7   : > { %5685 = vmatmul.msk.bf16.vlgmr.msrb.gmra.mxu3 %vm299_vm0, %v3313_v57  ;;  %2832 = vst.msk [vmem:[#allocation2 + $0xc0] sm:$0x1] %vm355_vm1, %v2814_v7  ;;  %v7641_v20 = vpack.c.bf16 %v3522_v17, %v3521_v10  ;;  %v3290_v23 = vld [vmem:[#allocation2 + $0x6a] sm:$0xff]  ;;  %v3291_v57 = vld [vmem:[#allocation2 + $0x7a] sm:$0xff]  ;;  %v3297_v19 = vld [vmem:[#allocation2 + $0xc2] sm:$0xff] }
 0x4a8   : > { %2868 = vst.msk [vmem:[#allocation2 + $0xd1] sm:$0x1] %vm355_vm1, %v2850_v14  ;;  %v3523_v59 = vld [vmem:[#allocation2 + $0x78] sm:$0xff]  ;;  %v7659_v38 = vpack.c.bf16 %v3290_v23, %v3289_v51  ;;  %v2946_v31 = vld [vmem:[#allocation2 + $0xc1] sm:$0xff] }
 0x4a9   : > { %2833 = vst.msk [vmem:[#allocation2 + $0xd8] sm:$0x1] %vm355_vm1, %v2815_v12  ;;  %v3292_v48 = vld [vmem:[#allocation2 + $0x82] sm:$0xff]  ;;  %v2942_v14 = vld [vmem:[#allocation2 + $0x91] sm:$0xff]  ;;  %v2943_v12 = vld [vmem:[#allocation2 + $0x99] sm:$0xff] }
 0x4aa   : > { %2869 = vst.msk [vmem:[#allocation2 + $0xe9] sm:$0x1] %vm355_vm1, %v2851_v24  ;;  %v3525_v55 = vld [vmem:[#allocation2 + $0x90] sm:$0xff]  ;;  %v7673_v7 = vpack.c.bf16 %v3292_v48, %v3291_v57  ;;  %v7679_v24 = vpack.c.bf16 %v2943_v12, %v2942_v14  ;;  %v2948_v28 = vld [vmem:[#allocation2 + $0xd9] sm:$0xff]  ;;  %v2949_v1 = vld [vmem:[#allocation2 + $0xe1] sm:$0xff] }
 0x4ab   : > { %2834 = vst.msk [vmem:[#allocation2 + $0xf0] sm:$0x1] %vm355_vm1, %v2816_v33  ;;  %v7669_v13 = vpack.c.bf16 %v3526_v6, %v3525_v55  ;;  %v3534_v44 = vld [vmem:[#allocation2 + $0xf8] sm:$0xff] }
 0x4ac   : > { %2870 = vst.msk [vmem:[#allocation2 + $0x101] sm:$0x1] %vm355_vm1, %v2852_v58  ;;  %v3527_v33 = vld [vmem:[#allocation2 + $0xa8] sm:$0xff] }
 0x4ad   : > { %2835 = vst.msk [vmem:[#allocation2 + $0x108] sm:$0x1] %vm355_vm1, %v2817_v0  ;;  %v7686_v58 = vpack.c.bf16 %v3528_v30, %v3527_v33  ;;  %v3294_v0 = vld [vmem:[#allocation2 + $0x9a] sm:$0xff]  ;;  %v3296_v34 = vld [vmem:[#allocation2 + $0xb2] sm:$0xff] }
 0x4ae   : > { %5634 = vmatmul.msk.bf16.gmra.mxu1 %vm299_vm0, %v7594_v5  ;;  %2871 = vst.msk [vmem:[#allocation2 + $0x119] sm:$0x1] %vm355_vm1, %v2853_v9  ;;  %v3293_v9 = vld [vmem:[#allocation2 + $0x92] sm:$0xff]  ;;  %v3299_v33 = vld [vmem:[#allocation2 + $0xda] sm:$0xff] }
 0x4af   : > { %2836 = vst.msk [vmem:[#allocation2 + $0x120] sm:$0x1] %vm355_vm1, %v2818_v2  ;;  %v7690_v47 = vpack.c.bf16 %v3294_v0, %v3293_v9  ;;  %v2944_v2 = vld [vmem:[#allocation2 + $0xa9] sm:$0xff] }
 0x4b0   : > { %2872 = vst.msk [vmem:[#allocation2 + $0x131] sm:$0x1] %vm355_vm1, %v2854_v40  ;;  %v2945_v40 = vld [vmem:[#allocation2 + $0xb1] sm:$0xff] }
 0x4b1   : > { %5714 = vmatmul.msk.bf16.gmra.mxu0 %vm299_vm0, %v7601_v21  ;;  %2837 = vst.msk [vmem:[#allocation2 + $0x138] sm:$0x1] %vm355_vm1, %v2819_v29  ;;  %v7696_v61 = vpack.c.bf16 %v2945_v40, %v2944_v2  ;;  %v3529_v29 = vld [vmem:[#allocation2 + $0xc0] sm:$0xff]  ;;  %v3298_v60 = vld [vmem:[#allocation2 + $0xca] sm:$0xff] }
 0x4b2   : > { %2873 = vst.msk [vmem:[#allocation2 + $0x149] sm:$0x1] %vm355_vm1, %v2855_v54  ;;  %v3530_v54 = vld [vmem:[#allocation2 + $0xc8] sm:$0xff]  ;;  %v7718_v45 = vpack.c.bf16 %v3298_v60, %v3297_v19 }
 0x4b3   : > { %2838 = vst.msk [vmem:[#allocation2 + $0x150] sm:$0x1] %vm355_vm1, %v2820_v46  ;;  %v7700_v46 = vpack.c.bf16 %v3530_v54, %v3529_v29  ;;  %v3300_v57 = vld [vmem:[#allocation2 + $0xe2] sm:$0xff]  ;;  %v2950_v29 = vld [vmem:[#allocation2 + $0xf1] sm:$0xff]  ;;  %v2951_v54 = vld [vmem:[#allocation2 + $0xf9] sm:$0xff] }
 0x4b4   : > { %2874 = vst.msk [vmem:[#allocation2 + $0x161] sm:$0x1] %vm355_vm1, %v2856_v37  ;;  %v3295_v37 = vld [vmem:[#allocation2 + $0xaa] sm:$0xff]  ;;  %v7734_v30 = vpack.c.bf16 %v3300_v57, %v3299_v33 }
 0x4b5   : > { %2839 = vst.msk [vmem:[#allocation2 + $0x168] sm:$0x1] %vm355_vm1, %v2821_v53  ;;  %v7704_v53 = vpack.c.bf16 %v3296_v34, %v3295_v37 }
 0x4b6   : > { %5658 = vmatmul.msk.bf16.gmra.mxu2 %vm299_vm0, %v7575_v3  ;;  %2875 = vst.msk [vmem:[#allocation2 + $0x179] sm:$0x1] %vm355_vm1, %v2857_v52  ;;  %v7655_v3 = vpack.c.bf16 %v3524_v41, %v3523_v59  ;;  %v2947_v52 = vld [vmem:[#allocation2 + $0xc9] sm:$0xff]  ;;  %v7724_v59 = vpack.c.bf16 %v2949_v1, %v2948_v28 }
 0x4b7   : > { %5686 = vmatmul.msk.bf16.gmra.mxu3 %vm299_vm0, %v7610_v62  ;;  %2840 = vst.msk [vmem:[#allocation2 + $0x180] sm:$0x1] %vm355_vm1, %v2822_v35  ;;  %v3533_v41 = vld [vmem:[#allocation2 + $0xf0] sm:$0xff] }
 0x4b8   : > { %2876 = vst.msk [vmem:[#allocation2 + $0x191] sm:$0x1] %vm355_vm1, %v2858_v22  ;;  %v7710_v22 = vpack.c.bf16 %v2947_v52, %v2946_v31  ;;  %v7730_v25 = vpack.c.bf16 %v3534_v44, %v3533_v41  ;;  %v7742_v31 = vpack.c.bf16 %v2951_v54, %v2950_v29  ;;  %v3535_v52 = vld [vmem:[#allocation2 + $0x108] sm:$0xff]  ;;  %v3304_v54 = vld [vmem:[#allocation2 + $0x112] sm:$0xff] }
 0x4b9   : > { %2841 = vst.msk [vmem:[#allocation2 + $0x198] sm:$0x1] %vm355_vm1, %v2823_v18  ;;  %v3531_v18 = vld [vmem:[#allocation2 + $0xd8] sm:$0xff]  ;;  %v2952_v44 = vld [vmem:[#allocation2 + $0x109] sm:$0xff] }
 0x4ba   : > { %2877 = vst.msk [vmem:[#allocation2 + $0x1a9] sm:$0x1] %vm355_vm1, %v2859_v50  ;;  %v7714_v11 = vpack.c.bf16 %v3532_v4, %v3531_v18 }
 0x4be   : > { %5635 = vmatmul.msk.bf16.gmra.mxu1 %vm299_vm0, %v7623_v63 }
 0x4c1   : > { %5715 = vmatmul.msk.bf16.gmra.mxu0 %vm299_vm0, %v7627_v49 }
 0x4c6   : > { %5659 = vmatmul.msk.bf16.gmra.mxu2 %vm299_vm0, %v7601_v21 }
 0x4c7   : > { %5687 = vmatmul.msk.bf16.gmra.mxu3 %vm299_vm0, %v7631_v36 }
 0x4ce   : > { %5636 = vmatmul.msk.bf16.gmra.mxu1 %vm299_vm0, %v7637_v26 }
 0x4d1   : > { %5716 = vmatmul.msk.bf16.gmra.mxu0 %vm299_vm0, %v7641_v20 }
 0x4d6   : > { %5660 = vmatmul.msk.bf16.gmra.mxu2 %vm299_vm0, %v7627_v49 }
 0x4d7   : > { %5688 = vmatmul.msk.bf16.gmra.mxu3 %vm299_vm0, %v7645_v32 }
 0x4de   : > { %5637 = vmatmul.msk.bf16.gmra.mxu1 %vm299_vm0, %v7651_v42 }
 0x4e1   : > { %5717 = vmatmul.msk.bf16.gmra.mxu0 %vm299_vm0, %v7655_v3 }
 0x4e6   : > { %5661 = vmatmul.msk.bf16.gmra.mxu2 %vm299_vm0, %v7641_v20 }
 0x4e7   : > { %5689 = vmatmul.msk.bf16.gmra.mxu3 %vm299_vm0, %v7659_v38 }
 0x4ee   : > { %5638 = vmatmul.msk.bf16.gmra.mxu1 %vm299_vm0, %v7665_v39 }
 0x4f1   : > { %5718 = vmatmul.msk.bf16.gmra.mxu0 %vm299_vm0, %v7669_v13 }
 0x4f6   : > { %5662 = vmatmul.msk.bf16.gmra.mxu2 %vm299_vm0, %v7655_v3 }
 0x4f7   : > { %5690 = vmatmul.msk.bf16.gmra.mxu3 %vm299_vm0, %v7673_v7 }
 0x4fe   : > { %5639 = vmatmul.msk.bf16.gmra.mxu1 %vm299_vm0, %v7679_v24 }
 0x501   : > { %5719 = vmatmul.msk.bf16.gmra.mxu0 %vm299_vm0, %v7686_v58 }
 0x506   : > { %5663 = vmatmul.msk.bf16.gmra.mxu2 %vm299_vm0, %v7669_v13 }
 0x507   : > { %5691 = vmatmul.msk.bf16.gmra.mxu3 %vm299_vm0, %v7690_v47 }
 0x50e   : > { %5640 = vmatmul.msk.bf16.gmra.mxu1 %vm299_vm0, %v7696_v61 }
 0x511   : > { %5720 = vmatmul.msk.bf16.gmra.mxu0 %vm299_vm0, %v7700_v46 }
 0x516   : > { %5664 = vmatmul.msk.bf16.gmra.mxu2 %vm299_vm0, %v7686_v58 }
 0x517   : > { %5692 = vmatmul.msk.bf16.gmra.mxu3 %vm299_vm0, %v7704_v53 }
 0x51b   : > { %v3052_v35 = vpop.f32.mrf.mxu1 }
 0x51e   : > { %5641 = vmatmul.msk.bf16.gmra.mxu1 %vm299_vm0, %v7710_v22  ;;  %v3637_v50 = vpop.f32.mrf.mxu0 }
 0x521   : > { %5721 = vmatmul.msk.bf16.gmra.mxu0 %vm299_vm0, %v7714_v11 }
 0x523   : > { %v3054_v8 = vpop.f32.mrf.mxu1 }
 0x526   : > { %5665 = vmatmul.msk.bf16.gmra.mxu2 %vm299_vm0, %v7700_v46  ;;  %v3639_v56 = vpop.f32.mrf.mxu0 }
 0x527   : > { %5693 = vmatmul.msk.bf16.gmra.mxu3 %vm299_vm0, %v7718_v45 }
 0x529   : > { %v3201_v43 = vpop.f32.mrf.mxu2 }
 0x52a   : > { %v3202_v10 = vadd.f32 %v3201_v43, %v3052_v35  ;;  %v3403_v17 = vpop.f32.mrf.mxu3 }
 0x52b   : > { %v3057_v15 = vpop.f32.mrf.mxu1 }
 0x52c   : > { %v3483_v27 = vadd.f32 %v3403_v17, %v3202_v10  ;;  %v3301_v17 = vld [vmem:[#allocation2 + $0xf2] sm:$0xff] }
 0x52e   : > { %v7726_v23 = vadd.f32 %v3637_v50, %v3483_v27  ;;  %5642 = vmatmul.msk.bf16.gmra.mxu1 %vm299_vm0, %v7724_v59  ;;  %v3642_v51 = vpop.f32.mrf.mxu0  ;;  %v3536_v50 = vld [vmem:[#allocation2 + $0x110] sm:$0xff] }
 0x52f   : > { %v7748_v4 = vpack.c.bf16 %v3536_v50, %v3535_v52  ;;  %v3303_v52 = vld [vmem:[#allocation2 + $0x10a] sm:$0xff] }
 0x530   : > { %v7770_v50 = vpack.c.bf16 %v3304_v54, %v3303_v52  ;;  %v3305_v54 = vld [vmem:[#allocation2 + $0x122] sm:$0xff] }
 0x531   : > { %v3203_v55 = vpop.f32.mrf.mxu2  ;;  %5722 = vmatmul.msk.bf16.gmra.mxu0 %vm299_vm0, %v7730_v25 }
 0x532   : > { %v3204_v6 = vadd.f32 %v3203_v55, %v3054_v8  ;;  %v3405_v48 = vpop.f32.mrf.mxu3  ;;  %v2953_v55 = vld [vmem:[#allocation2 + $0x111] sm:$0xff] }
 0x533   : > { %v3059_v12 = vpop.f32.mrf.mxu1  ;;  %v7760_v57 = vpack.c.bf16 %v2953_v55, %v2952_v44  ;;  %v3540_v55 = vld [vmem:[#allocation2 + $0x140] sm:$0xff] }
 0x534   : > { %v3484_v14 = vadd.f32 %v3405_v48, %v3204_v6 }
 0x536   : > { %5666 = vmatmul.msk.bf16.gmra.mxu2 %vm299_vm0, %v7714_v11  ;;  %v7738_v16 = vadd.f32 %v3639_v56, %v3484_v14  ;;  %v3644_v0 = vpop.f32.mrf.mxu0  ;;  %v3302_v56 = vld [vmem:[#allocation2 + $0xfa] sm:$0xff] }
 0x537   : > { %5694 = vmatmul.msk.bf16.gmra.mxu3 %vm299_vm0, %v7734_v30  ;;  %v7752_v28 = vpack.c.bf16 %v3302_v56, %v3301_v17  ;;  %v3537_v14 = vld [vmem:[#allocation2 + $0x120] sm:$0xff] }
 0x539   : > { %v3206_v9 = vpop.f32.mrf.mxu2 }
 0x53a   : > { %v3207_v2 = vadd.f32 %v3206_v9, %v3057_v15  ;;  %v3408_v40 = vpop.f32.mrf.mxu3 }
 0x53b   : > { %v3062_v37 = vpop.f32.mrf.mxu1 }
 0x53c   : > { %v3485_v34 = vadd.f32 %v3408_v40, %v3207_v2 }
 0x53e   : > { %v7744_v35 = vadd.f32 %v3642_v51, %v3485_v34  ;;  %5643 = vmatmul.msk.bf16.gmra.mxu1 %vm299_vm0, %v7742_v31  ;;  %v3647_v18 = vpop.f32.mrf.mxu0 }
 0x541   : > { %v3208_v60 = vpop.f32.mrf.mxu2  ;;  %5723 = vmatmul.msk.bf16.gmra.mxu0 %vm299_vm0, %v7748_v4 }
 0x542   : > { %v3209_v8 = vadd.f32 %v3208_v60, %v3059_v12  ;;  %v3410_v19 = vpop.f32.mrf.mxu3 }
 0x543   : > { %v3064_v10 = vpop.f32.mrf.mxu1 }
 0x544   : > { %v3486_v43 = vadd.f32 %v3410_v19, %v3209_v8 }
 0x546   : > { %5667 = vmatmul.msk.bf16.gmra.mxu2 %vm299_vm0, %v7730_v25  ;;  %v7756_v1 = vadd.f32 %v3644_v0, %v3486_v43  ;;  %v3649_v27 = vpop.f32.mrf.mxu0  ;;  %v3538_v0 = vld [vmem:[#allocation2 + $0x128] sm:$0xff] }
 0x547   : > { %5695 = vmatmul.msk.bf16.gmra.mxu3 %vm299_vm0, %v7752_v28  ;;  %v7766_v9 = vpack.c.bf16 %v3538_v0, %v3537_v14  ;;  %v2954_v43 = vld [vmem:[#allocation2 + $0x121] sm:$0xff] }
 0x549   : > { %v3211_v15 = vpop.f32.mrf.mxu2 }
 0x54a   : > { %v3212_v41 = vadd.f32 %v3211_v15, %v3062_v37  ;;  %v3413_v51 = vpop.f32.mrf.mxu3 }
 0x54b   : > { %v3067_v48 = vpop.f32.mrf.mxu1 }
 0x54c   : > { %v3487_v6 = vadd.f32 %v3413_v51, %v3212_v41  ;;  %v3539_v51 = vld [vmem:[#allocation2 + $0x138] sm:$0xff] }
 0x54e   : > { %v7762_v12 = vadd.f32 %v3647_v18, %v3487_v6  ;;  %5644 = vmatmul.msk.bf16.gmra.mxu1 %vm299_vm0, %v7760_v57  ;;  %v3652_v33 = vpop.f32.mrf.mxu0  ;;  %v7784_v6 = vpack.c.bf16 %v3540_v55, %v3539_v51  ;;  %v3541_v55 = vld [vmem:[#allocation2 + $0x150] sm:$0xff] }
 0x550   : > { %8886 = vst [vmem:[#allocation41_spill] sm:$0xff] %v7784_v6 }
 0x551   : > { %v3213_v2 = vpop.f32.mrf.mxu2  ;;  %5724 = vmatmul.msk.bf16.gmra.mxu0 %vm299_vm0, %v7766_v9 }
 0x552   : > { %v3214_v40 = vadd.f32 %v3213_v2, %v3064_v10  ;;  %v3415_v29 = vpop.f32.mrf.mxu3  ;;  %v2955_v10 = vld [vmem:[#allocation2 + $0x129] sm:$0xff] }
 0x553   : > { %v3069_v37 = vpop.f32.mrf.mxu1  ;;  %v7778_v41 = vpack.c.bf16 %v2955_v10, %v2954_v43  ;;  %v3306_v2 = vld [vmem:[#allocation2 + $0x12a] sm:$0xff]  ;;  %v2957_v43 = vld [vmem:[#allocation2 + $0x141] sm:$0xff] }
 0x554   : > { %v3488_v34 = vadd.f32 %v3415_v29, %v3214_v40 }
 0x556   : > { %5668 = vmatmul.msk.bf16.gmra.mxu2 %vm299_vm0, %v7748_v4  ;;  %v7774_v18 = vadd.f32 %v3649_v27, %v3488_v34  ;;  %v3654_v60 = vpop.f32.mrf.mxu0  ;;  %v7788_v34 = vpack.c.bf16 %v3306_v2, %v3305_v54  ;;  %v3308_v54 = vld [vmem:[#allocation2 + $0x142] sm:$0xff] }
 0x557   : > { %5696 = vmatmul.msk.bf16.gmra.mxu3 %vm299_vm0, %v7770_v50 }
 0x558   : > { %8887 = vst [vmem:[#allocation44_spill] sm:$0xff] %v7788_v34 }
 0x559   : > { %v3216_v8 = vpop.f32.mrf.mxu2 }
 0x55a   : > { %v3217_v19 = vadd.f32 %v3216_v8, %v3067_v48  ;;  %v3418_v56 = vpop.f32.mrf.mxu3 }
 0x55b   : > { %v3072_v15 = vpop.f32.mrf.mxu1 }
 0x55c   : > { %v3489_v17 = vadd.f32 %v3418_v56, %v3217_v19  ;;  %v2956_v56 = vld [vmem:[#allocation2 + $0x139] sm:$0xff] }
 0x55d   : > { %v7796_v51 = vpack.c.bf16 %v2957_v43, %v2956_v56  ;;  %v5904_v56 = vld [vmem:[%s8685_s3 + $0x68] sm:$0xff] }
 0x55e   : > { %v7780_v44 = vadd.f32 %v3652_v33, %v3489_v17  ;;  %5645 = vmatmul.msk.bf16.gmra.mxu1 %vm299_vm0, %v7778_v41  ;;  %v3657_v27 = vpop.f32.mrf.mxu0  ;;  %4336 = vmatpush.bf16.msra.mxu3 %v5904_v56  ;;  %v5908_v56 = vld [vmem:[%s8685_s3 + $0x88] sm:$0xff] }
 0x55f   : > { %4804 = vmatpush.bf16.msra.mxu1 %v5908_v56 }
 0x561   : > { %v3218_v14 = vpop.f32.mrf.mxu2  ;;  %5725 = vmatmul.msk.bf16.gmra.mxu0 %vm299_vm0, %v7784_v6 }
 0x562   : > { %v3219_v0 = vadd.f32 %v3218_v14, %v3069_v37  ;;  %v3420_v48 = vpop.f32.mrf.mxu3 }
 0x563   : > { %v3074_v29 = vpop.f32.mrf.mxu1 }
 0x564   : > { %v3490_v40 = vadd.f32 %v3420_v48, %v3219_v0  ;;  %v3542_v0 = vld [vmem:[#allocation2 + $0x158] sm:$0xff] }
 0x565   : > { %v7802_v48 = vpack.c.bf16 %v3542_v0, %v3541_v55 }
 0x566   : > { %5669 = vmatmul.msk.bf16.gmra.mxu2 %vm299_vm0, %v7766_v9  ;;  %v7792_v33 = vadd.f32 %v3654_v60, %v3490_v40  ;;  %v3659_v52 = vpop.f32.mrf.mxu0 }
 0x567   : > { %5697 = vmatmul.msk.bf16.gmra.mxu3 %vm299_vm0, %v7788_v34  ;;  %8890 = vst [vmem:[#allocation56_spill] sm:$0xff] %v7802_v48 }
 0x568   : > { %8888 = vst [vmem:[#allocation49_spill] sm:$0xff] %v7792_v33  ;;  %v3545_v33 = vld [vmem:[#allocation2 + $0x180] sm:$0xff] }
 0x569   : > { %v3221_v37 = vpop.f32.mrf.mxu2 }
 0x56a   : > { %v3222_v8 = vadd.f32 %v3221_v37, %v3072_v15  ;;  %v3423_v19 = vpop.f32.mrf.mxu3 }
 0x56b   : > { %v3077_v17 = vpop.f32.mrf.mxu1 }
 0x56c   : > { %v3491_v10 = vadd.f32 %v3423_v19, %v3222_v8  ;;  %v3307_v19 = vld [vmem:[#allocation2 + $0x13a] sm:$0xff] }
 0x56d   : > { %v7812_v43 = vpack.c.bf16 %v3308_v54, %v3307_v19  ;;  %v5906_v54 = vld [vmem:[%s8685_s3 + $0x78] sm:$0xff] }
 0x56e   : > { %v7798_v14 = vadd.f32 %v3657_v27, %v3491_v10  ;;  %5646 = vmatmul.msk.bf16.gmra.mxu1 %vm299_vm0, %v7796_v51  ;;  %v3662_v60 = vpop.f32.mrf.mxu0  ;;  %v5902_v27 = vld [vmem:[%s8685_s3 + $0x58] sm:$0xff]  ;;  %4570 = vmatpush.bf16.msra.mxu0 %v5906_v54 }
 0x56f   : > { %8891 = vst [vmem:[#allocation59_spill] sm:$0xff] %v7812_v43  ;;  %4102 = vmatpush.bf16.msra.mxu2 %v5902_v27 }
 0x570   : > { %8889 = vst [vmem:[#allocation52_spill] sm:$0xff] %v7798_v14 }
 0x571   : > { %v3223_v2 = vpop.f32.mrf.mxu2  ;;  %5726 = vmatmul.msk.bf16.gmra.mxu0 %vm299_vm0, %v7802_v48 }
 0x572   : > { %v3224_v40 = vadd.f32 %v3223_v2, %v3074_v29  ;;  %v3425_v15 = vpop.f32.mrf.mxu3 }
 0x573   : > { %v3079_v8 = vpop.f32.mrf.mxu1 }
 0x574   : > { %v3492_v37 = vadd.f32 %v3425_v15, %v3224_v40  ;;  %v2958_v40 = vld [vmem:[#allocation2 + $0x151] sm:$0xff]  ;;  %v2959_v15 = vld [vmem:[#allocation2 + $0x159] sm:$0xff] }
 0x575   : > { %v7823_v19 = vpack.c.bf16 %v2959_v15, %v2958_v40  ;;  %v3310_v15 = vld [vmem:[#allocation2 + $0x15a] sm:$0xff] }
 0x576   : > { %5670 = vmatmul.msk.bf16.gmra.mxu2 %vm299_vm0, %v7784_v6  ;;  %v7816_v29 = vadd.f32 %v3659_v52, %v3492_v37  ;;  %v3664_v10 = vpop.f32.mrf.mxu0  ;;  %v3543_v52 = vld [vmem:[#allocation2 + $0x168] sm:$0xff] }
 0x577   : > { %5698 = vmatmul.msk.bf16.gmra.mxu3 %vm299_vm0, %v7812_v43  ;;  %8893 = vst [vmem:[#allocation46_spill] sm:$0xff] %v7823_v19 }
 0x578   : > { %8892 = vst [vmem:[#allocation62_spill] sm:$0xff] %v7816_v29  ;;  %v2960_v29 = vld [vmem:[#allocation2 + $0x169] sm:$0xff] }
 0x579   : > { %v3226_v55 = vpop.f32.mrf.mxu2 }
 0x57a   : > { %v3227_v0 = vadd.f32 %v3226_v55, %v3077_v17  ;;  %v3428_v2 = vpop.f32.mrf.mxu3  ;;  %v3544_v17 = vld [vmem:[#allocation2 + $0x170] sm:$0xff] }
 0x57b   : > { %v3082_v34 = vpop.f32.mrf.mxu1  ;;  %v7832_v55 = vpack.c.bf16 %v3544_v17, %v3543_v52  ;;  %v5903_v52 = vld [vmem:[%s8685_s3 + $0x60] sm:$0xff] }
 0x57c   : > { %v3493_v14 = vadd.f32 %v3428_v2, %v3227_v0  ;;  %4337 = vmatpush.bf16.msra.mxu3 %v5903_v52 }
 0x57e   : > { %v7825_v37 = vadd.f32 %v3662_v60, %v3493_v14  ;;  %5647 = vmatmul.msk.bf16.gmra.mxu1 %vm299_vm0, %v7823_v19  ;;  %v3667_v27 = vpop.f32.mrf.mxu0  ;;  %v3309_v14 = vld [vmem:[#allocation2 + $0x152] sm:$0xff] }
 0x57f   : > { %v7845_v17 = vpack.c.bf16 %v3310_v15, %v3309_v14  ;;  %v2961_v19 = vld [vmem:[#allocation2 + $0x171] sm:$0xff] }
 0x580   : > { %8894 = vst [vmem:[#allocation64_spill] sm:$0xff] %v7825_v37  ;;  %v5901_v37 = vld [vmem:[%s8685_s3 + $0x50] sm:$0xff]  ;;  %v7853_v14 = vpack.c.bf16 %v2961_v19, %v2960_v29 }
 0x581   : > { %v3228_v0 = vpop.f32.mrf.mxu2  ;;  %5727 = vmatmul.msk.bf16.gmra.mxu0 %vm299_vm0, %v7832_v55  ;;  %4103 = vmatpush.bf16.msra.mxu2 %v5901_v37  ;;  %v3311_v19 = vld [vmem:[#allocation2 + $0x16a] sm:$0xff] }
 0x582   : > { %v3229_v2 = vadd.f32 %v3228_v0, %v3079_v8  ;;  %v3430_v40 = vpop.f32.mrf.mxu3  ;;  %v5905_v8 = vld [vmem:[%s8685_s3 + $0x70] sm:$0xff] }
 0x583   : > { %v3084_v54 = vpop.f32.mrf.mxu1  ;;  %4571 = vmatpush.bf16.msra.mxu0 %v5905_v8 }
 0x584   : > { %v3494_v60 = vadd.f32 %v3430_v40, %v3229_v2 }
 0x586   : > { %5671 = vmatmul.msk.bf16.gmra.mxu2 %vm299_vm0, %v7802_v48  ;;  %v7849_v56 = vadd.f32 %v3664_v10, %v3494_v60  ;;  %v3669_v0 = vpop.f32.mrf.mxu0  ;;  %v3546_v60 = vld [vmem:[#allocation2 + $0x188] sm:$0xff] }
 0x587   : > { %5699 = vmatmul.msk.bf16.gmra.mxu3 %vm299_vm0, %v7845_v17  ;;  %v7859_v52 = vpack.c.bf16 %v3546_v60, %v3545_v33 }
 0x589   : > { %v3231_v2 = vpop.f32.mrf.mxu2  ;;  %8896 = vst [vmem:[#allocation68_spill] sm:$0xff] %v7859_v52 }
 0x58a   : > { %v3232_v40 = vadd.f32 %v3231_v2, %v3082_v34  ;;  %v3433_v43 = vpop.f32.mrf.mxu3  ;;  %v3312_v2 = vld [vmem:[#allocation2 + $0x172] sm:$0xff] }
 0x58b   : > { %v3087_v15 = vpop.f32.mrf.mxu1 }
 0x58c   : > { %v3495_v6 = vadd.f32 %v3433_v43, %v3232_v40  ;;  %v7863_v40 = vpack.c.bf16 %v3312_v2, %v3311_v19 }
 0x58e   : > { %v7855_v48 = vadd.f32 %v3667_v27, %v3495_v6  ;;  %5648 = vmatmul.msk.bf16.gmra.mxu1 %vm299_vm0, %v7853_v14  ;;  %v3672_v10 = vpop.f32.mrf.mxu0 }
 0x590   : > { %8895 = vst [vmem:[#allocation50_spill] sm:$0xff] %v7855_v48 }
 0x591   : > { %v3233_v37 = vpop.f32.mrf.mxu2  ;;  %5728 = vmatmul.msk.bf16.gmra.mxu0 %vm299_vm0, %v7859_v52 }
 0x592   : > { %v3234_v8 = vadd.f32 %v3233_v37, %v3084_v54  ;;  %v3435_v34 = vpop.f32.mrf.mxu3 }
 0x593   : > { %v3089_v29 = vpop.f32.mrf.mxu1 }
 0x594   : > { %v3496_v43 = vadd.f32 %v3435_v34, %v3234_v8 }
 0x596   : > { %5672 = vmatmul.msk.bf16.gmra.mxu2 %vm299_vm0, %v7832_v55  ;;  %v7867_v6 = vadd.f32 %v3669_v0, %v3496_v43  ;;  %v3674_v33 = vpop.f32.mrf.mxu0 }
 0x597   : > { %5700 = vmatmul.msk.bf16.gmra.mxu3 %vm299_vm0, %v7863_v40 }
 0x599   : > { %v3236_v27 = vpop.f32.mrf.mxu2 }
 0x59a   : > { %v3237_v54 = vadd.f32 %v3236_v27, %v3087_v15  ;;  %v3438_v60 = vpop.f32.mrf.mxu3 }
 0x59b   : > { %v3092_v48 = vpop.f32.mrf.mxu1 }
 0x59c   : > { %v3497_v37 = vadd.f32 %v3438_v60, %v3237_v54 }
 0x59e   : > { %v7871_v52 = vadd.f32 %v3672_v10, %v3497_v37  ;;  %5741 = vmatmul.msk.bf16.vlgmr.msrb.gmra.mxu1 %vm299_vm0, %v7594_v5  ;;  %v3677_v8 = vpop.f32.mrf.mxu0 }
 0x5a1   : > { %v3238_v34 = vpop.f32.mrf.mxu2  ;;  %5825 = vmatmul.msk.bf16.vlgmr.msra.gmra.mxu0 %vm299_vm0, %v7623_v63 }
 0x5a2   : > { %v3239_v2 = vadd.f32 %v3238_v34, %v3089_v29  ;;  %v3440_v19 = vpop.f32.mrf.mxu3 }
 0x5a3   : > { %v3094_v43 = vpop.f32.mrf.mxu1 }
 0x5a4   : > { %v3498_v0 = vadd.f32 %v3440_v19, %v3239_v2 }
 0x5a6   : > { %5769 = vmatmul.msk.bf16.vlgmr.msra.gmra.mxu2 %vm299_vm0, %v7610_v62  ;;  %v7879_v15 = vadd.f32 %v3674_v33, %v3498_v0  ;;  %v3679_v10 = vpop.f32.mrf.mxu0 }
 0x5a7   : > { %5797 = vmatmul.msk.bf16.vlgmr.msra.gmra.mxu3 %vm299_vm0, %v7601_v21 }
 0x5a9   : > { %v3241_v27 = vpop.f32.mrf.mxu2 }
 0x5aa   : > { %v3242_v5 = vadd.f32 %v3241_v27, %v3092_v48  ;;  %v3443_v54 = vpop.f32.mrf.mxu3 }
 0x5ab   : > { %v3097_v29 = vpop.f32.mrf.mxu1 }
 0x5ac   : > { %v3499_v60 = vadd.f32 %v3443_v54, %v3242_v5 }
 0x5ae   : > { %v7883_v37 = vadd.f32 %v3677_v8, %v3499_v60  ;;  %5742 = vmatmul.msk.bf16.gmra.mxu1 %vm299_vm0, %v7623_v63  ;;  %v3682_v34 = vpop.f32.mrf.mxu0 }
 0x5b1   : > { %v3243_v2 = vpop.f32.mrf.mxu2  ;;  %5826 = vmatmul.msk.bf16.gmra.mxu0 %vm299_vm0, %v7637_v26 }
 0x5b2   : > { %v3244_v19 = vadd.f32 %v3243_v2, %v3094_v43  ;;  %v3445_v62 = vpop.f32.mrf.mxu3 }
 0x5b3   : > { %v3099_v21 = vpop.f32.mrf.mxu1 }
 0x5b4   : > { %v3500_v33 = vadd.f32 %v3445_v62, %v3244_v19 }
 0x5b6   : > { %5770 = vmatmul.msk.bf16.gmra.mxu2 %vm299_vm0, %v7631_v36  ;;  %v7891_v48 = vadd.f32 %v3679_v10, %v3500_v33  ;;  %v3684_v8 = vpop.f32.mrf.mxu0 }
 0x5b7   : > { %5798 = vmatmul.msk.bf16.gmra.mxu3 %vm299_vm0, %v7627_v49 }
 0x5b9   : > { %v3246_v0 = vpop.f32.mrf.mxu2 }
 0x5ba   : > { %v3247_v63 = vadd.f32 %v3246_v0, %v3097_v29  ;;  %v3448_v27 = vpop.f32.mrf.mxu3 }
 0x5bb   : > { %v3102_v43 = vpop.f32.mrf.mxu1 }
 0x5bc   : > { %v3501_v5 = vadd.f32 %v3448_v27, %v3247_v63 }
 0x5be   : > { %v7895_v54 = vadd.f32 %v3682_v34, %v3501_v5  ;;  %5743 = vmatmul.msk.bf16.gmra.mxu1 %vm299_vm0, %v7637_v26  ;;  %v3687_v60 = vpop.f32.mrf.mxu0 }
 0x5c1   : > { %v3248_v2 = vpop.f32.mrf.mxu2  ;;  %5827 = vmatmul.msk.bf16.gmra.mxu0 %vm299_vm0, %v7651_v42 }
 0x5c2   : > { %v3249_v19 = vadd.f32 %v3248_v2, %v3099_v21  ;;  %v3450_v36 = vpop.f32.mrf.mxu3 }
 0x5c3   : > { %v3104_v49 = vpop.f32.mrf.mxu1 }
 0x5c4   : > { %v3502_v10 = vadd.f32 %v3450_v36, %v3249_v19 }
 0x5c6   : > { %5771 = vmatmul.msk.bf16.gmra.mxu2 %vm299_vm0, %v7645_v32  ;;  %v7903_v29 = vadd.f32 %v3684_v8, %v3502_v10  ;;  %v3689_v34 = vpop.f32.mrf.mxu0 }
 0x5c7   : > { %5799 = vmatmul.msk.bf16.gmra.mxu3 %vm299_vm0, %v7641_v20 }
 0x5c9   : > { %v3251_v62 = vpop.f32.mrf.mxu2 }
 0x5ca   : > { %v3252_v26 = vadd.f32 %v3251_v62, %v3102_v43  ;;  %v3453_v33 = vpop.f32.mrf.mxu3 }
 0x5cb   : > { %v3107_v21 = vpop.f32.mrf.mxu1 }
 0x5cc   : > { %v3503_v0 = vadd.f32 %v3453_v33, %v3252_v26 }
 0x5ce   : > { %v7907_v63 = vadd.f32 %v3687_v60, %v3503_v0  ;;  %5744 = vmatmul.msk.bf16.gmra.mxu1 %vm299_vm0, %v7651_v42  ;;  %v3692_v27 = vpop.f32.mrf.mxu0 }
 0x5d1   : > { %v3253_v5 = vpop.f32.mrf.mxu2  ;;  %5828 = vmatmul.msk.bf16.gmra.mxu0 %vm299_vm0, %v7665_v39 }
 0x5d2   : > { %v3254_v2 = vadd.f32 %v3253_v5, %v3104_v49  ;;  %v3455_v32 = vpop.f32.mrf.mxu3 }
 0x5d3   : > { %v3109_v20 = vpop.f32.mrf.mxu1 }
 0x5d4   : > { %v3504_v8 = vadd.f32 %v3455_v32, %v3254_v2 }
 0x5d6   : > { %5772 = vmatmul.msk.bf16.gmra.mxu2 %vm299_vm0, %v7659_v38  ;;  %v7915_v43 = vadd.f32 %v3689_v34, %v3504_v8  ;;  %v3694_v60 = vpop.f32.mrf.mxu0 }
 0x5d7   : > { %5800 = vmatmul.msk.bf16.gmra.mxu3 %vm299_vm0, %v7655_v3 }
 0x5d9   : > { %v3256_v19 = vpop.f32.mrf.mxu2 }
 0x5da   : > { %v3257_v42 = vadd.f32 %v3256_v19, %v3107_v21  ;;  %v3458_v36 = vpop.f32.mrf.mxu3 }
 0x5db   : > { %v3112_v49 = vpop.f32.mrf.mxu1 }
 0x5dc   : > { %v3505_v10 = vadd.f32 %v3458_v36, %v3257_v42 }
 0x5de   : > { %v7919_v62 = vadd.f32 %v3692_v27, %v3505_v10  ;;  %5745 = vmatmul.msk.bf16.gmra.mxu1 %vm299_vm0, %v7665_v39  ;;  %v3697_v26 = vpop.f32.mrf.mxu0 }
 0x5e1   : > { %v3258_v33 = vpop.f32.mrf.mxu2  ;;  %5829 = vmatmul.msk.bf16.gmra.mxu0 %vm299_vm0, %v7679_v24 }
 0x5e2   : > { %v3259_v0 = vadd.f32 %v3258_v33, %v3109_v20  ;;  %v3460_v38 = vpop.f32.mrf.mxu3 }
 0x5e3   : > { %v3114_v3 = vpop.f32.mrf.mxu1 }
 0x5e4   : > { %v3506_v34 = vadd.f32 %v3460_v38, %v3259_v0 }
 0x5e6   : > { %5773 = vmatmul.msk.bf16.gmra.mxu2 %vm299_vm0, %v7673_v7  ;;  %v7927_v21 = vadd.f32 %v3694_v60, %v3506_v34  ;;  %v3699_v27 = vpop.f32.mrf.mxu0 }
 0x5e7   : > { %5801 = vmatmul.msk.bf16.gmra.mxu3 %vm299_vm0, %v7669_v13 }
 0x5e9   : > { %v3261_v5 = vpop.f32.mrf.mxu2 }
 0x5ea   : > { %v3262_v39 = vadd.f32 %v3261_v5, %v3112_v49  ;;  %v3463_v2 = vpop.f32.mrf.mxu3 }
 0x5eb   : > { %v3117_v8 = vpop.f32.mrf.mxu1 }
 0x5ec   : > { %v3507_v32 = vadd.f32 %v3463_v2, %v3262_v39 }
 0x5ee   : > { %v7931_v20 = vadd.f32 %v3697_v26, %v3507_v32  ;;  %5746 = vmatmul.msk.bf16.gmra.mxu1 %vm299_vm0, %v7679_v24  ;;  %v3702_v19 = vpop.f32.mrf.mxu0 }
 0x5f1   : > { %v3263_v42 = vpop.f32.mrf.mxu2  ;;  %5830 = vmatmul.msk.bf16.gmra.mxu0 %vm299_vm0, %v7696_v61 }
 0x5f2   : > { %v3264_v36 = vadd.f32 %v3263_v42, %v3114_v3  ;;  %v3465_v7 = vpop.f32.mrf.mxu3 }
 0x5f3   : > { %v3119_v13 = vpop.f32.mrf.mxu1 }
 0x5f4   : > { %v3508_v60 = vadd.f32 %v3465_v7, %v3264_v36 }
 0x5f6   : > { %5774 = vmatmul.msk.bf16.gmra.mxu2 %vm299_vm0, %v7690_v47  ;;  %v7939_v10 = vadd.f32 %v3699_v27, %v3508_v60  ;;  %v3704_v49 = vpop.f32.mrf.mxu0  ;;  %v5907_v47 = vld [vmem:[%s8685_s3 + $0x80] sm:$0xff] }
 0x5f7   : > { %5802 = vmatmul.msk.bf16.gmra.mxu3 %vm299_vm0, %v7686_v58  ;;  %4805 = vmatpush.bf16.msra.mxu1 %v5907_v47 }
 0x5f9   : > { %v3266_v26 = vpop.f32.mrf.mxu2 }
 0x5fa   : > { %v3267_v24 = vadd.f32 %v3266_v26, %v3117_v8  ;;  %v3468_v33 = vpop.f32.mrf.mxu3 }
 0x5fb   : > { %v3122_v38 = vpop.f32.mrf.mxu1 }
 0x5fc   : > { %v3509_v0 = vadd.f32 %v3468_v33, %v3267_v24 }
 0x5fe   : > { %v7943_v34 = vadd.f32 %v3702_v19, %v3509_v0  ;;  %5747 = vmatmul.msk.bf16.gmra.mxu1 %vm299_vm0, %v7696_v61  ;;  %v3707_v3 = vpop.f32.mrf.mxu0 }
 0x601   : > { %v3268_v27 = vpop.f32.mrf.mxu2  ;;  %5831 = vmatmul.msk.bf16.gmra.mxu0 %vm299_vm0, %v7710_v22 }
 0x602   : > { %v3269_v5 = vadd.f32 %v3268_v27, %v3119_v13  ;;  %v3470_v58 = vpop.f32.mrf.mxu3 }
 0x603   : > { %v3124_v2 = vpop.f32.mrf.mxu1 }
 0x604   : > { %v3510_v39 = vadd.f32 %v3470_v58, %v3269_v5 }
 0x606   : > { %5775 = vmatmul.msk.bf16.gmra.mxu2 %vm299_vm0, %v7704_v53  ;;  %v7954_v32 = vadd.f32 %v3704_v49, %v3510_v39  ;;  %v3709_v61 = vpop.f32.mrf.mxu0 }
 0x607   : > { %5803 = vmatmul.msk.bf16.gmra.mxu3 %vm299_vm0, %v7700_v46 }
 0x609   : > { %v3271_v8 = vpop.f32.mrf.mxu2 }
 0x60a   : > { %v3272_v19 = vadd.f32 %v3271_v8, %v3122_v38  ;;  %v3473_v42 = vpop.f32.mrf.mxu3 }
 0x60b   : > { %v3127_v7 = vpop.f32.mrf.mxu1 }
 0x60c   : > { %v3511_v36 = vadd.f32 %v3473_v42, %v3272_v19 }
 0x60e   : > { %v7958_v60 = vadd.f32 %v3707_v3, %v3511_v36  ;;  %5748 = vmatmul.msk.bf16.gmra.mxu1 %vm299_vm0, %v7710_v22  ;;  %v3712_v13 = vpop.f32.mrf.mxu0 }
 0x611   : > { %v3273_v26 = vpop.f32.mrf.mxu2  ;;  %5832 = vmatmul.msk.bf16.gmra.mxu0 %vm299_vm0, %v7724_v59 }
 0x612   : > { %v3274_v24 = vadd.f32 %v3273_v26, %v3124_v2  ;;  %v3475_v53 = vpop.f32.mrf.mxu3 }
 0x613   : > { %v3129_v46 = vpop.f32.mrf.mxu1 }
 0x614   : > { %v3512_v49 = vadd.f32 %v3475_v53, %v3274_v24 }
 0x616   : > { %5776 = vmatmul.msk.bf16.gmra.mxu2 %vm299_vm0, %v7718_v45  ;;  %v7966_v33 = vadd.f32 %v3709_v61, %v3512_v49  ;;  %v3714_v0 = vpop.f32.mrf.mxu0 }
 0x617   : > { %5804 = vmatmul.msk.bf16.gmra.mxu3 %vm299_vm0, %v7714_v11 }
 0x619   : > { %v3276_v38 = vpop.f32.mrf.mxu2 }
 0x61a   : > { %v3277_v22 = vadd.f32 %v3276_v38, %v3127_v7  ;;  %v3478_v3 = vpop.f32.mrf.mxu3 }
 0x61b   : > { %v3871_v27 = vpop.f32.mrf.mxu1 }
 0x61c   : > { %v3513_v47 = vadd.f32 %v3478_v3, %v3277_v22  ;;  %v3951_v5 = vadd.f32 %v3871_v27, %v7726_v23 }
 0x61e   : > { %v7971_v58 = vadd.f32 %v3712_v13, %v3513_v47  ;;  %5749 = vmatmul.msk.bf16.gmra.mxu1 %vm299_vm0, %v7724_v59  ;;  %v4573_v39 = vpop.f32.mrf.mxu0 }
 0x621   : > { %v3278_v45 = vpop.f32.mrf.mxu2  ;;  %5833 = vmatmul.msk.bf16.gmra.mxu0 %vm299_vm0, %v7742_v31 }
 0x622   : > { %v3279_v2 = vadd.f32 %v3278_v45, %v3129_v46  ;;  %v3480_v61 = vpop.f32.mrf.mxu3 }
 0x623   : > { %v3873_v8 = vpop.f32.mrf.mxu1 }
 0x624   : > { %v3514_v11 = vadd.f32 %v3480_v61, %v3279_v2  ;;  %v3952_v19 = vadd.f32 %v3873_v8, %v7738_v16 }
 0x626   : > { %5777 = vmatmul.msk.bf16.gmra.mxu2 %vm299_vm0, %v7734_v30  ;;  %v7980_v23 = vadd.f32 %v3714_v0, %v3514_v11  ;;  %v4575_v59 = vpop.f32.mrf.mxu0 }
 0x627   : > { %5805 = vmatmul.msk.bf16.gmra.mxu3 %vm299_vm0, %v7730_v25 }
 0x629   : > { %v4105_v42 = vpop.f32.mrf.mxu2 }
 0x62a   : > { %v4185_v36 = vadd.f32 %v4105_v42, %v3951_v5  ;;  %v4339_v7 = vpop.f32.mrf.mxu3 }
 0x62b   : > { %v3876_v26 = vpop.f32.mrf.mxu1 }
 0x62c   : > { %v4419_v13 = vadd.f32 %v4339_v7, %v4185_v36  ;;  %v3953_v24 = vadd.f32 %v3876_v26, %v7744_v35 }
 0x62e   : > { %v7985_v53 = vadd.f32 %v4573_v39, %v4419_v13  ;;  %5750 = vmatmul.msk.bf16.gmra.mxu1 %vm299_vm0, %v7742_v31  ;;  %v4578_v16 = vpop.f32.mrf.mxu0 }
 0x631   : > { %v4107_v30 = vpop.f32.mrf.mxu2  ;;  %5834 = vmatmul.msk.bf16.gmra.mxu0 %vm299_vm0, %v7760_v57 }
 0x632   : > { %v4186_v49 = vadd.f32 %v4107_v30, %v3952_v19  ;;  %v4341_v46 = vpop.f32.mrf.mxu3 }
 0x633   : > { %v3878_v0 = vpop.f32.mrf.mxu1 }
 0x634   : > { %v4420_v25 = vadd.f32 %v4341_v46, %v4186_v49  ;;  %v3954_v38 = vadd.f32 %v3878_v0, %v7756_v1  ;;  %v8897_v49 = vld [vmem:[#allocation49_spill] sm:$0xff] }
 0x635   : > { %v8899_v0 = vld [vmem:[#allocation41_spill] sm:$0xff] }
 0x636   : > { %5778 = vmatmul.msk.bf16.gmra.mxu2 %vm299_vm0, %v7752_v28  ;;  %v7994_v35 = vadd.f32 %v4575_v59, %v4420_v25  ;;  %v4580_v31 = vpop.f32.mrf.mxu0  ;;  %v8898_v25 = vld [vmem:[#allocation44_spill] sm:$0xff] }
 0x637   : > { %5806 = vmatmul.msk.bf16.gmra.mxu3 %vm299_vm0, %v7748_v4 }
 0x639   : > { %v4110_v22 = vpop.f32.mrf.mxu2 }
 0x63a   : > { %v4187_v3 = vadd.f32 %v4110_v22, %v3953_v24  ;;  %v4344_v47 = vpop.f32.mrf.mxu3 }
 0x63b   : > { %v3881_v5 = vpop.f32.mrf.mxu1 }
 0x63c   : > { %v4421_v27 = vadd.f32 %v4344_v47, %v4187_v3  ;;  %v3955_v39 = vadd.f32 %v3881_v5, %v7762_v12 }
 0x63e   : > { %v7999_v45 = vadd.f32 %v4578_v16, %v4421_v27  ;;  %5751 = vmatmul.msk.bf16.gmra.mxu1 %vm299_vm0, %v7760_v57  ;;  %v4583_v1 = vpop.f32.mrf.mxu0  ;;  %v8900_v27 = vld [vmem:[#allocation52_spill] sm:$0xff] }
 0x641   : > { %v4112_v28 = vpop.f32.mrf.mxu2  ;;  %5835 = vmatmul.msk.bf16.gmra.mxu0 %vm299_vm0, %v7778_v41 }
 0x642   : > { %v4188_v2 = vadd.f32 %v4112_v28, %v3954_v38  ;;  %v4346_v61 = vpop.f32.mrf.mxu3 }
 0x643   : > { %v3883_v11 = vpop.f32.mrf.mxu1 }
 0x644   : > { %v4422_v4 = vadd.f32 %v4346_v61, %v4188_v2  ;;  %v3956_v8 = vadd.f32 %v3883_v11, %v7774_v18 }
 0x646   : > { %5779 = vmatmul.msk.bf16.gmra.mxu2 %vm299_vm0, %v7770_v50  ;;  %v8008_v12 = vadd.f32 %v4580_v31, %v4422_v4  ;;  %v4585_v57 = vpop.f32.mrf.mxu0  ;;  %v8901_v4 = vld [vmem:[#allocation46_spill] sm:$0xff] }
 0x647   : > { %5807 = vmatmul.msk.bf16.gmra.mxu3 %vm299_vm0, %v7766_v9 }
 0x649   : > { %v4115_v19 = vpop.f32.mrf.mxu2 }
 0x64a   : > { %v4189_v59 = vadd.f32 %v4115_v19, %v3955_v39  ;;  %v4349_v42 = vpop.f32.mrf.mxu3 }
 0x64b   : > { %v3886_v7 = vpop.f32.mrf.mxu1 }
 0x64c   : > { %v4423_v36 = vadd.f32 %v4349_v42, %v4189_v59  ;;  %v3957_v13 = vadd.f32 %v3886_v7, %v7780_v44  ;;  %v8903_v59 = vld [vmem:[#allocation59_spill] sm:$0xff] }
 0x64e   : > { %v8013_v26 = vadd.f32 %v4583_v1, %v4423_v36  ;;  %5752 = vmatmul.msk.bf16.gmra.mxu1 %vm299_vm0, %v7778_v41  ;;  %v4588_v18 = vpop.f32.mrf.mxu0  ;;  %v8904_v36 = vld [vmem:[#allocation56_spill] sm:$0xff] }
 0x651   : > { %v4117_v50 = vpop.f32.mrf.mxu2  ;;  %5836 = vmatmul.msk.bf16.gmra.mxu0 %vm299_vm0, %v7796_v51 }
 0x652   : > { %v4190_v24 = vadd.f32 %v4117_v50, %v3956_v8  ;;  %v4351_v16 = vpop.f32.mrf.mxu3 }
 0x653   : > { %v3888_v30 = vpop.f32.mrf.mxu1 }
 0x654   : > { %v4424_v9 = vadd.f32 %v4351_v16, %v4190_v24  ;;  %v3958_v46 = vadd.f32 %v3888_v30, %v8897_v49  ;;  %v8905_v16 = vld [vmem:[#allocation64_spill] sm:$0xff] }
 0x656   : > { %5780 = vmatmul.msk.bf16.gmra.mxu2 %vm299_vm0, %v8898_v25  ;;  %v8022_v44 = vadd.f32 %v4585_v57, %v4424_v9  ;;  %v4590_v41 = vpop.f32.mrf.mxu0  ;;  %v8902_v57 = vld [vmem:[#allocation62_spill] sm:$0xff] }
 0x657   : > { %5808 = vmatmul.msk.bf16.gmra.mxu3 %vm299_vm0, %v8899_v0 }
 0x659   : > { %v4120_v38 = vpop.f32.mrf.mxu2 }
 0x65a   : > { %v4191_v31 = vadd.f32 %v4120_v38, %v3957_v13  ;;  %v4354_v22 = vpop.f32.mrf.mxu3 }
 0x65b   : > { %v3891_v47 = vpop.f32.mrf.mxu1 }
 0x65c   : > { %v4425_v3 = vadd.f32 %v4354_v22, %v4191_v31  ;;  %v3959_v5 = vadd.f32 %v3891_v47, %v8900_v27 }
 0x65e   : > { %v8027_v39 = vadd.f32 %v4588_v18, %v4425_v3  ;;  %5753 = vmatmul.msk.bf16.gmra.mxu1 %vm299_vm0, %v7796_v51  ;;  %v4593_v1 = vpop.f32.mrf.mxu0 }
 0x661   : > { %v4122_v28 = vpop.f32.mrf.mxu2  ;;  %5837 = vmatmul.msk.bf16.gmra.mxu0 %vm299_vm0, %v8901_v4 }
 0x662   : > { %v4192_v2 = vadd.f32 %v4122_v28, %v3958_v46  ;;  %v4356_v61 = vpop.f32.mrf.mxu3 }
 0x663   : > { %v3893_v8 = vpop.f32.mrf.mxu1 }
 0x664   : > { %v4426_v11 = vadd.f32 %v4356_v61, %v4192_v2  ;;  %v3960_v19 = vadd.f32 %v3893_v8, %v8902_v57  ;;  %v8906_v2 = vld [vmem:[#allocation50_spill] sm:$0xff] }
 0x666   : > { %5781 = vmatmul.msk.bf16.gmra.mxu2 %vm299_vm0, %v8903_v59  ;;  %v8036_v42 = vadd.f32 %v4590_v41, %v4426_v11  ;;  %v4595_v51 = vpop.f32.mrf.mxu0  ;;  %v4480_v11 = vld [vmem:[#allocation2 + $0x189] sm:$0xff] }
 0x667   : > { %5809 = vmatmul.msk.bf16.gmra.mxu3 %vm299_vm0, %v8904_v36 }
 0x669   : > { %v4125_v7 = vpop.f32.mrf.mxu2 }
 0x66a   : > { %v4193_v13 = vadd.f32 %v4125_v7, %v3959_v5  ;;  %v4359_v18 = vpop.f32.mrf.mxu3 }
 0x66b   : > { %v3896_v24 = vpop.f32.mrf.mxu1 }
 0x66c   : > { %v4427_v50 = vadd.f32 %v4359_v18, %v4193_v13  ;;  %v3961_v9 = vadd.f32 %v3896_v24, %v8905_v16  ;;  %v8907_v13 = vld [vmem:[#allocation68_spill] sm:$0xff] }
 0x66e   : > { %v8041_v30 = vadd.f32 %v4593_v1, %v4427_v50  ;;  %5754 = vmatmul.msk.bf16.gmra.mxu1 %vm299_vm0, %v8901_v4  ;;  %v4598_v49 = vpop.f32.mrf.mxu0  ;;  %v4479_v4 = vld [vmem:[#allocation2 + $0x181] sm:$0xff] }
 0x671   : > { %v4127_v46 = vpop.f32.mrf.mxu2  ;;  %5838 = vmatmul.msk.bf16.gmra.mxu0 %vm299_vm0, %v7853_v14 }
 0x672   : > { %v4194_v25 = vadd.f32 %v4127_v46, %v3960_v19  ;;  %v4361_v0 = vpop.f32.mrf.mxu3  ;;  %v4481_v46 = vld [vmem:[#allocation2 + $0x199] sm:$0xff] }
 0x673   : > { %v3898_v38 = vpop.f32.mrf.mxu1 }
 0x674   : > { %v4428_v41 = vadd.f32 %v4361_v0, %v4194_v25  ;;  %v3962_v31 = vadd.f32 %v3898_v38, %v7849_v56  ;;  %v4497_v56 = vpack.c.bf16 %v4480_v11, %v4479_v4  ;;  %v4482_v25 = vld [vmem:[#allocation2 + $0x1a1] sm:$0xff]  ;;  %v4014_v38 = vld [vmem:[#allocation2 + $0x18a] sm:$0xff] }
 0x676   : > { %5782 = vmatmul.msk.bf16.gmra.mxu2 %vm299_vm0, %v7845_v17  ;;  %v8050_v22 = vadd.f32 %v4595_v51, %v4428_v41  ;;  %v4600_v3 = vpop.f32.mrf.mxu0 }
 0x677   : > { %5810 = vmatmul.msk.bf16.gmra.mxu3 %vm299_vm0, %v7832_v55 }
 0x679   : > { %v4130_v47 = vpop.f32.mrf.mxu2 }
 0x67a   : > { %v4195_v27 = vadd.f32 %v4130_v47, %v3961_v9  ;;  %v4364_v5 = vpop.f32.mrf.mxu3  ;;  %v4247_v47 = vld [vmem:[#allocation2 + $0x198] sm:$0xff] }
 0x67b   : > { %v3901_v28 = vpop.f32.mrf.mxu1 }
 0x67c   : > { %v4429_v1 = vadd.f32 %v4364_v5, %v4195_v27  ;;  %v3963_v61 = vadd.f32 %v3901_v28, %v8906_v2  ;;  %v4013_v27 = vld [vmem:[#allocation2 + $0x182] sm:$0xff] }
 0x67d   : > { %v8072_v28 = vpack.c.bf16 %v4014_v38, %v4013_v27  ;;  %v4688_v38 = vld [vmem:[#allocation2 + $0x52] sm:$0xff] }
 0x67e   : > { %v8055_v8 = vadd.f32 %v4598_v49, %v4429_v1  ;;  %5755 = vmatmul.msk.bf16.gmra.mxu1 %vm299_vm0, %v7853_v14  ;;  %v4603_v17 = vpop.f32.mrf.mxu0 }
 0x681   : > { %v4132_v57 = vpop.f32.mrf.mxu2  ;;  %5839 = vmatmul.msk.bf16.gmra.mxu0 %vm299_vm0, %v4497_v56 }
 0x682   : > { %v4196_v19 = vadd.f32 %v4132_v57, %v3962_v31  ;;  %v4366_v55 = vpop.f32.mrf.mxu3  ;;  %v4686_v57 = vld [vmem:[#allocation2 + $0x3a] sm:$0xff] }
 0x683   : > { %v3903_v36 = vpop.f32.mrf.mxu1 }
 0x684   : > { %v4430_v59 = vadd.f32 %v4366_v55, %v4196_v19  ;;  %v3964_v51 = vadd.f32 %v3903_v36, %v7867_v6  ;;  %v4685_v36 = vld [vmem:[#allocation2 + $0x32] sm:$0xff] }
 0x686   : > { %5783 = vmatmul.msk.bf16.gmra.mxu2 %vm299_vm0, %v7863_v40  ;;  %v8063_v7 = vadd.f32 %v4600_v3, %v4430_v59  ;;  %v4605_v14 = vpop.f32.mrf.mxu0  ;;  %v4498_v40 = vpack.c.bf16 %v4482_v25, %v4481_v46 }
 0x687   : > { %5811 = vmatmul.msk.bf16.gmra.mxu3 %vm299_vm0, %v8907_v13  ;;  %v4717_v13 = vpack.c.bf16 %v4686_v57, %v4685_v36 }
 0x689   : > { %v4135_v18 = vpop.f32.mrf.mxu2 }
 0x68a   : > { %v4197_v50 = vadd.f32 %v4135_v18, %v3963_v61  ;;  %v4369_v24 = vpop.f32.mrf.mxu3 }
 0x68b   : > { %v3906_v9 = vpop.f32.mrf.mxu1 }
 0x68c   : > { %v4431_v16 = vadd.f32 %v4369_v24, %v4197_v50  ;;  %v3965_v49 = vadd.f32 %v3906_v9, %v7871_v52  ;;  %v4248_v52 = vld [vmem:[#allocation2 + $0x1a0] sm:$0xff] }
 0x68d   : > { %v4264_v61 = vpack.c.bf16 %v4248_v52, %v4247_v47 }
 0x68e   : > { %v8068_v0 = vadd.f32 %v4603_v17, %v4431_v16  ;;  %5756 = vmatmul.msk.bf16.gmra.mxu1 %vm299_vm0, %v4497_v56  ;;  %v4608_v41 = vpop.f32.mrf.mxu0 }
 0x691   : > { %v4137_v6 = vpop.f32.mrf.mxu2  ;;  %5840 = vmatmul.msk.bf16.gmra.mxu0 %vm299_vm0, %v4498_v40 }
 0x692   : > { %v4198_v31 = vadd.f32 %v4137_v6, %v3964_v51  ;;  %v4371_v3 = vpop.f32.mrf.mxu3 }
 0x693   : > { %v3908_v1 = vpop.f32.mrf.mxu1 }
 0x694   : > { %v4432_v5 = vadd.f32 %v4371_v3, %v4198_v31  ;;  %v3966_v2 = vadd.f32 %v3908_v1, %v7879_v15 }
 0x696   : > { %5784 = vmatmul.msk.bf16.gmra.mxu2 %vm299_vm0, %v8072_v28  ;;  %v8077_v4 = vadd.f32 %v4605_v14, %v4432_v5  ;;  %v4610_v19 = vpop.f32.mrf.mxu0 }
 0x697   : > { %5812 = vmatmul.msk.bf16.gmra.mxu3 %vm299_vm0, %v4264_v61 }
 0x699   : > { %v4140_v11 = vpop.f32.mrf.mxu2 }
 0x69a   : > { %v4199_v17 = vadd.f32 %v4140_v11, %v3965_v49  ;;  %v4374_v56 = vpop.f32.mrf.mxu3 }
 0x69b   : > { %v3911_v59 = vpop.f32.mrf.mxu1 }
 0x69c   : > { %v4433_v55 = vadd.f32 %v4374_v56, %v4199_v17  ;;  %v3967_v51 = vadd.f32 %v3911_v59, %v7883_v37 }
 0x69e   : > { %v8081_v15 = vadd.f32 %v4608_v41, %v4433_v55  ;;  %5853 = vmatmul.msk.bf16.vlgmr.msra.gmra.mxu1 %vm299_vm0, %v4717_v13  ;;  %v4613_v49 = vpop.f32.mrf.mxu0  ;;  %v4687_v41 = vld [vmem:[#allocation2 + $0x4a] sm:$0xff] }
 0x69f   : > { %v4718_v47 = vpack.c.bf16 %v4688_v38, %v4687_v41 }
 0x6a1   : > { %v4142_v18 = vpop.f32.mrf.mxu2 }
 0x6a2   : > { %v4200_v14 = vadd.f32 %v4142_v18, %v3966_v2  ;;  %v4376_v50 = vpop.f32.mrf.mxu3 }
 0x6a3   : > { %v3913_v16 = vpop.f32.mrf.mxu1 }
 0x6a4   : > { %v4434_v24 = vadd.f32 %v4376_v50, %v4200_v14  ;;  %v3968_v9 = vadd.f32 %v3913_v16, %v7891_v48 }
 0x6a6   : > { %v8085_v46 = vadd.f32 %v4610_v19, %v4434_v24  ;;  %v4615_v5 = vpop.f32.mrf.mxu0 }
 0x6a9   : > { %v4145_v25 = vpop.f32.mrf.mxu2 }
 0x6aa   : > { %v4201_v40 = vadd.f32 %v4145_v25, %v3967_v51  ;;  %v4379_v6 = vpop.f32.mrf.mxu3  ;;  %v4689_v51 = vld [vmem:[#allocation2 + $0x62] sm:$0xff] }
 0x6ab   : > { %v3916_v31 = vpop.f32.mrf.mxu1 }
 0x6ac   : > { %v4435_v37 = vadd.f32 %v4379_v6, %v4201_v40  ;;  %v3969_v3 = vadd.f32 %v3916_v31, %v7895_v54  ;;  %v4690_v54 = vld [vmem:[#allocation2 + $0x6a] sm:$0xff] }
 0x6ad   : > { %v4719_v18 = vpack.c.bf16 %v4690_v54, %v4689_v51 }
 0x6ae   : > { %v8088_v27 = vadd.f32 %v4613_v49, %v4435_v37  ;;  %5854 = vmatmul.msk.bf16.gmra.mxu1 %vm299_vm0, %v4718_v47  ;;  %v4618_v56 = vpop.f32.mrf.mxu0  ;;  %v4692_v37 = vld [vmem:[#allocation2 + $0x82] sm:$0xff] }
 0x6b1   : > { %v4147_v1 = vpop.f32.mrf.mxu2 }
 0x6b2   : > { %v4202_v48 = vadd.f32 %v4147_v1, %v3968_v9  ;;  %v4381_v52 = vpop.f32.mrf.mxu3 }
 0x6b3   : > { %v3918_v61 = vpop.f32.mrf.mxu1 }
 0x6b4   : > { %v4436_v2 = vadd.f32 %v4381_v52, %v4202_v48  ;;  %v3970_v11 = vadd.f32 %v3918_v61, %v7903_v29 }
 0x6b6   : > { %v8092_v17 = vadd.f32 %v4615_v5, %v4436_v2  ;;  %v4620_v16 = vpop.f32.mrf.mxu0  ;;  %v4694_v2 = vld [vmem:[#allocation2 + $0x9a] sm:$0xff] }
 0x6b9   : > { %v4150_v57 = vpop.f32.mrf.mxu2 }
 0x6ba   : > { %v4203_v19 = vadd.f32 %v4150_v57, %v3969_v3  ;;  %v4384_v55 = vpop.f32.mrf.mxu3  ;;  %v4691_v3 = vld [vmem:[#allocation2 + $0x7a] sm:$0xff] }
 0x6bb   : > { %v3921_v36 = vpop.f32.mrf.mxu1  ;;  %v4720_v1 = vpack.c.bf16 %v4692_v37, %v4691_v3  ;;  %v4702_v37 = vld [vmem:[#allocation2 + $0xfa] sm:$0xff] }
 0x6bc   : > { %v4437_v59 = vadd.f32 %v4384_v55, %v4203_v19  ;;  %v3971_v13 = vadd.f32 %v3921_v36, %v7907_v63  ;;  %v4696_v55 = vld [vmem:[#allocation2 + $0xb2] sm:$0xff] }
 0x6be   : > { %v8095_v14 = vadd.f32 %v4618_v56, %v4437_v59  ;;  %5855 = vmatmul.msk.bf16.gmra.mxu1 %vm299_vm0, %v4719_v18  ;;  %v4623_v47 = vpop.f32.mrf.mxu0  ;;  %v4695_v59 = vld [vmem:[#allocation2 + $0xaa] sm:$0xff] }
 0x6c1   : > { %v4152_v50 = vpop.f32.mrf.mxu2 }
 0x6c2   : > { %v4204_v24 = vadd.f32 %v4152_v50, %v3970_v11  ;;  %v4386_v29 = vpop.f32.mrf.mxu3  ;;  %v4693_v11 = vld [vmem:[#allocation2 + $0x92] sm:$0xff]  ;;  %v4697_v50 = vld [vmem:[#allocation2 + $0xc2] sm:$0xff] }
 0x6c3   : > { %v3923_v49 = vpop.f32.mrf.mxu1  ;;  %v4721_v57 = vpack.c.bf16 %v4694_v2, %v4693_v11  ;;  %v4706_v11 = vld [vmem:[#allocation2 + $0x12a] sm:$0xff] }
 0x6c4   : > { %v4438_v9 = vadd.f32 %v4386_v29, %v4204_v24  ;;  %v8099_v25 = vadd.f32 %v3923_v49, %v7915_v43  ;;  %v4699_v49 = vld [vmem:[#allocation2 + $0xda] sm:$0xff] }
 0x6c6   : > { %v8101_v40 = vadd.f32 %v4620_v16, %v4438_v9  ;;  %v4700_v16 = vld [vmem:[#allocation2 + $0xe2] sm:$0xff] }
 0x6c9   : > { %v4155_v6 = vpop.f32.mrf.mxu2 }
 0x6ca   : > { %v4205_v38 = vadd.f32 %v4155_v6, %v3971_v13  ;;  %v4389_v63 = vpop.f32.mrf.mxu3  ;;  %v4698_v13 = vld [vmem:[#allocation2 + $0xca] sm:$0xff] }
 0x6cb   : > { %v3926_v41 = vpop.f32.mrf.mxu1 }
 0x6cc   : > { %v4439_v31 = vadd.f32 %v4389_v63, %v4205_v38  ;;  %v8104_v5 = vadd.f32 %v3926_v41, %v7919_v62 }
 0x6ce   : > { %v8106_v48 = vadd.f32 %v4623_v47, %v4439_v31  ;;  %5856 = vmatmul.msk.bf16.gmra.mxu1 %vm299_vm0, %v4720_v1  ;;  %v4701_v31 = vld [vmem:[#allocation2 + $0xf2] sm:$0xff] }
 0x6cf   : > { %v4704_v47 = vld [vmem:[#allocation2 + $0x112] sm:$0xff] }
 0x6d3   : > { %v3928_v43 = vpop.f32.mrf.mxu1 }
 0x6d4   : > { %v8110_v52 = vadd.f32 %v3928_v43, %v7927_v21  ;;  %v4722_v21 = vpack.c.bf16 %v4696_v55, %v4695_v59  ;;  %v4703_v43 = vld [vmem:[#allocation2 + $0x10a] sm:$0xff]  ;;  %v4708_v59 = vld [vmem:[#allocation2 + $0x142] sm:$0xff] }
 0x6db   : > { %v3931_v61 = vpop.f32.mrf.mxu1 }
 0x6dc   : > { %v8113_v56 = vadd.f32 %v3931_v61, %v7931_v20 }
 0x6de   : > { %5857 = vmatmul.msk.bf16.gmra.mxu1 %vm299_vm0, %v4721_v57 }
 0x6e3   : > { %v3933_v62 = vpop.f32.mrf.mxu1 }
 0x6e4   : > { %v8117_v19 = vadd.f32 %v3933_v62, %v7939_v10  ;;  %v4723_v10 = vpack.c.bf16 %v4698_v13, %v4697_v50  ;;  %v4705_v62 = vld [vmem:[#allocation2 + $0x122] sm:$0xff]  ;;  %v4710_v50 = vld [vmem:[#allocation2 + $0x15a] sm:$0xff] }
 0x6eb   : > { %v3936_v54 = vpop.f32.mrf.mxu1 }
 0x6ec   : > { %v8120_v36 = vadd.f32 %v3936_v54, %v7943_v34 }
 0x6ee   : > { %5858 = vmatmul.msk.bf16.gmra.mxu1 %vm299_vm0, %v4722_v21 }
 0x6f3   : > { %v3938_v51 = vpop.f32.mrf.mxu1 }
 0x6f4   : > { %v8124_v20 = vadd.f32 %v3938_v51, %v7954_v32  ;;  %v4724_v32 = vpack.c.bf16 %v4700_v16, %v4699_v49  ;;  %v4707_v51 = vld [vmem:[#allocation2 + $0x13a] sm:$0xff]  ;;  %v4712_v49 = vld [vmem:[#allocation2 + $0x172] sm:$0xff] }
 0x6fb   : > { %v3941_v18 = vpop.f32.mrf.mxu1 }
 0x6fc   : > { %v8127_v24 = vadd.f32 %v3941_v18, %v7958_v60 }
 0x6fe   : > { %5859 = vmatmul.msk.bf16.gmra.mxu1 %vm299_vm0, %v4723_v10 }
 0x703   : > { %v3943_v29 = vpop.f32.mrf.mxu1 }
 0x704   : > { %v8131_v34 = vadd.f32 %v3943_v29, %v7966_v33  ;;  %v4725_v33 = vpack.c.bf16 %v4702_v37, %v4701_v31  ;;  %v4709_v29 = vld [vmem:[#allocation2 + $0x152] sm:$0xff] }
 0x70b   : > { %v3946_v9 = vpop.f32.mrf.mxu1 }
 0x70c   : > { %v8134_v6 = vadd.f32 %v3946_v9, %v7971_v58 }
 0x70e   : > { %5860 = vmatmul.msk.bf16.gmra.mxu1 %vm299_vm0, %v4724_v32 }
 0x713   : > { %v3948_v38 = vpop.f32.mrf.mxu1 }
 0x714   : > { %v8138_v60 = vadd.f32 %v3948_v38, %v7980_v23  ;;  %v4726_v23 = vpack.c.bf16 %v4704_v47, %v4703_v43  ;;  %v4711_v38 = vld [vmem:[#allocation2 + $0x16a] sm:$0xff] }
 0x71b   : > { %v4807_v63 = vpop.f32.mrf.mxu1 }
 0x71c   : > { %v8141_v41 = vadd.f32 %v4807_v63, %v7985_v53 }
 0x71e   : > { %5861 = vmatmul.msk.bf16.gmra.mxu1 %vm299_vm0, %v4725_v33 }
 0x723   : > { %v4809_v3 = vpop.f32.mrf.mxu1 }
 0x724   : > { %v8145_v58 = vadd.f32 %v4809_v3, %v7994_v35  ;;  %v4727_v35 = vpack.c.bf16 %v4706_v11, %v4705_v62  ;;  %v8200_v11 = vpop.f32.mrf.mxu2  ;;  %v8205_v62 = vpop.f32.mrf.mxu3 }
 0x72b   : > { %v4812_v1 = vpop.f32.mrf.mxu1 }
 0x72c   : > { %v8148_v2 = vadd.f32 %v4812_v1, %v7999_v45  ;;  %v4715_v1 = vld [vmem:[#allocation2 + $0x19a] sm:$0xff] }
 0x72e   : > { %5862 = vmatmul.msk.bf16.gmra.mxu1 %vm299_vm0, %v4726_v23 }
 0x733   : > { %v4814_v61 = vpop.f32.mrf.mxu1 }
 0x734   : > { %v8152_v53 = vadd.f32 %v4814_v61, %v8008_v12  ;;  %v4728_v12 = vpack.c.bf16 %v4708_v59, %v4707_v51  ;;  %v8214_v59 = vpop.f32.mrf.mxu3 }
 0x73b   : > { %v4817_v57 = vpop.f32.mrf.mxu1 }
 0x73c   : > { %v8155_v55 = vadd.f32 %v4817_v57, %v8013_v26 }
 0x73e   : > { %5863 = vmatmul.msk.bf16.gmra.mxu1 %vm299_vm0, %v4727_v35  ;;  %v8207_v35 = vpop.f32.mrf.mxu0 }
 0x743   : > { %v4819_v54 = vpop.f32.mrf.mxu1 }
 0x744   : > { %v8159_v45 = vadd.f32 %v4819_v54, %v8022_v44  ;;  %v4729_v44 = vpack.c.bf16 %v4710_v50, %v4709_v29 }
 0x746   : > { %v8219_v51 = vpop.f32.mrf.mxu0 }
 0x74b   : > { %v4822_v21 = vpop.f32.mrf.mxu1 }
 0x74c   : > { %v8162_v13 = vadd.f32 %v4822_v21, %v8027_v39 }
 0x74e   : > { %5864 = vmatmul.msk.bf16.gmra.mxu1 %vm299_vm0, %v4728_v12  ;;  %v8226_v12 = vld [vmem:[%s8686_s4] ss:$0 sm:$0xff] }
 0x74f   : > { %v8243_v29 = vadd.f32 %v8226_v12, %v8148_v2 }
 0x751   : > { %v5026_v2 = vmul.f32 %v8243_v29, %v8243_v29 }
 0x753   : > { %v4824_v18 = vpop.f32.mrf.mxu1 }
 0x754   : > { %v8166_v26 = vadd.f32 %v4824_v18, %v8036_v42  ;;  %v4730_v42 = vpack.c.bf16 %v4712_v49, %v4711_v38 }
 0x75b   : > { %v4827_v10 = vpop.f32.mrf.mxu1 }
 0x75c   : > { %v8169_v16 = vadd.f32 %v4827_v10, %v8041_v30  ;;  %v8235_v10 = vpop.f32.mrf.mxu3 }
 0x75e   : > { %5865 = vmatmul.msk.bf16.gmra.mxu1 %vm299_vm0, %v4729_v44  ;;  %v8245_v44 = vpop.f32.mrf.mxu0 }
 0x763   : > { %v4829_v9 = vpop.f32.mrf.mxu1 }
 0x764   : > { %v8173_v39 = vadd.f32 %v4829_v9, %v8050_v22 }
 0x76b   : > { %v4832_v32 = vpop.f32.mrf.mxu1 }
 0x76c   : > { %v8176_v37 = vadd.f32 %v4832_v32, %v8055_v8  ;;  %v4716_v8 = vld [vmem:[#allocation2 + $0x1a2] sm:$0xff]  ;;  %v8263_v32 = vadd.f32 %v8226_v12, %v8155_v55 }
 0x76d   : > { %v4732_v23 = vpack.c.bf16 %v4716_v8, %v4715_v1 }
 0x76e   : > { %5866 = vmatmul.msk.bf16.gmra.mxu1 %vm299_vm0, %v4730_v42 }
 0x773   : > { %v4834_v63 = vpop.f32.mrf.mxu1 }
 0x774   : > { %v8180_v30 = vadd.f32 %v4834_v63, %v8063_v7  ;;  %v4958_v63 = vsel %vm299_vm0, %v8243_v29, 0.0 }
 0x77b   : > { %v4837_v31 = vpop.f32.mrf.mxu1 }
 0x77c   : > { %v8183_v33 = vadd.f32 %v4837_v31, %v8068_v0 }
 0x77e   : > { %5867 = vmatmul.msk.bf16.gmra.mxu1 %vm299_vm0, %v8072_v28 }
 0x783   : > { %v4839_v22 = vpop.f32.mrf.mxu1 }
 0x784   : > { %v8188_v3 = vadd.f32 %v4839_v22, %v8077_v4  ;;  %v8276_v22 = vadd.f32 %v8226_v12, %v8159_v45 }
 0x786   : > { %8908 = vst [vmem:[#allocation54_spill] sm:$0xff] %v8276_v22 }
 0x78b   : > { %v4842_v47 = vpop.f32.mrf.mxu1 }
 0x78c   : > { %v8191_v43 = vadd.f32 %v4842_v47, %v8081_v15  ;;  %v5059_v47 = vsel %vm299_vm0, %v5026_v2, 0.0 }
 0x78e   : > { %5868 = vmatmul.msk.bf16.gmra.mxu1 %vm299_vm0, %v4732_v23  ;;  %v5028_v23 = vmul.f32 %v8263_v32, %v8263_v32 }
 0x790   : > { %v5063_v2 = vsel %vm299_vm0, %v5028_v23, 0.0 }
 0x793   : > { %v4844_v7 = vpop.f32.mrf.mxu1 }
 0x794   : > { %v8195_v0 = vadd.f32 %v4844_v7, %v8085_v46  ;;  %v8212_v46 = vpop.f32.mrf.mxu2  ;;  %v8286_v7 = vadd.f32 %v8226_v12, %v8162_v13  ;;  %v8299_v13 = vpop.f32.mrf.mxu0 }
 0x796   : > { %8909 = vst [vmem:[#allocation55_spill] sm:$0xff] %v8286_v7 }
 0x79b   : > { %v4847_v61 = vpop.f32.mrf.mxu1 }
 0x79c   : > { %v8198_v28 = vadd.f32 %v4847_v61, %v8088_v27  ;;  %v8288_v61 = vpop.f32.mrf.mxu3 }
 0x7a3   : > { %v4849_v4 = vpop.f32.mrf.mxu1 }
 0x7a4   : > { %v8203_v57 = vadd.f32 %v4849_v4, %v8092_v17  ;;  %v8221_v17 = vpop.f32.mrf.mxu2 }
 0x7ab   : > { %v4852_v15 = vpop.f32.mrf.mxu1 }
 0x7ac   : > { %v8210_v54 = vadd.f32 %v4852_v15, %v8095_v14  ;;  %v8230_v14 = vadd.f32 %v8226_v12, %v8145_v58  ;;  %v8251_v58 = vadd.f32 %v8226_v12, %v8152_v53 }
 0x7ae   : > { %v5025_v9 = vmul.f32 %v8230_v14, %v8230_v14  ;;  %v5027_v31 = vmul.f32 %v8251_v58, %v8251_v58  ;;  %v4960_v1 = vsel %vm299_vm0, %v8251_v58, 0.0 }
 0x7b0   : > { %v5057_v42 = vsel %vm299_vm0, %v5025_v9, 0.0  ;;  %v5061_v15 = vsel %vm299_vm0, %v5027_v31, 0.0  ;;  %v8297_v9 = vadd.f32 %v8226_v12, %v8166_v26 }
 0x7b2   : > { %8910 = vst [vmem:[#allocation57_spill] sm:$0xff] %v8297_v9  ;;  %v5031_v23 = vmul.f32 %v8297_v9, %v8297_v9 }
 0x7b3   : > { %v4854_v27 = vpop.f32.mrf.mxu1 }
 0x7b4   : > { %v8217_v21 = vadd.f32 %v4854_v27, %v8101_v40  ;;  %v8239_v40 = vadd.f32 %v8226_v12, %v8141_v41  ;;  %v4956_v41 = vsel %vm299_vm0, %v8230_v14, 0.0  ;;  %v4962_v27 = vsel %vm299_vm0, %v8263_v32, 0.0 }
 0x7b6   : > { %v5024_v49 = vmul.f32 %v8239_v40, %v8239_v40  ;;  %v4955_v38 = vsel %vm299_vm0, %v8239_v40, 0.0 }
 0x7b7   : > { %v4957_v8 = vadd.f32 %v4956_v41, %v4955_v38  ;;  %v4964_v38 = vsel %vm299_vm0, %v8276_v22, 0.0 }
 0x7b8   : > { %v5056_v55 = vsel %vm299_vm0, %v5024_v49, 0.0 }
 0x7b9   : > { %v5058_v4 = vadd.f32 %v5057_v42, %v5056_v55  ;;  %v4959_v45 = vadd.f32 %v4958_v63, %v4957_v8  ;;  %v5030_v42 = vmul.f32 %v8286_v7, %v8286_v7  ;;  %v8308_v63 = vadd.f32 %v8226_v12, %v8169_v16 }
 0x7bb   : > { %v4857_v18 = vpop.f32.mrf.mxu1  ;;  %v5060_v49 = vadd.f32 %v5059_v47, %v5058_v4  ;;  %v4961_v41 = vadd.f32 %v4960_v1, %v4959_v45  ;;  %v4966_v1 = vsel %vm299_vm0, %v8286_v7, 0.0  ;;  %v8321_v4 = vadd.f32 %v8226_v12, %v8173_v39 }
 0x7bc   : > { %v8233_v50 = vadd.f32 %v4857_v18, %v8106_v48  ;;  %v8253_v48 = vpop.f32.mrf.mxu2  ;;  %v5029_v18 = vmul.f32 %v8276_v22, %v8276_v22  ;;  %v5067_v22 = vsel %vm299_vm0, %v5030_v42, 0.0 }
 0x7bd   : > { %v5062_v26 = vadd.f32 %v5061_v15, %v5060_v49  ;;  %v4963_v55 = vadd.f32 %v4962_v27, %v4961_v41  ;;  %v4968_v15 = vsel %vm299_vm0, %v8297_v9, 0.0  ;;  %v5032_v27 = vmul.f32 %v8308_v63, %v8308_v63 }
 0x7be   : > { %v5065_v47 = vsel %vm299_vm0, %v5029_v18, 0.0  ;;  %v8330_v18 = vadd.f32 %v8226_v12, %v8176_v37  ;;  %v4206_v49 = vadd.f32 %v8200_v11, %v8099_v25  ;;  %v5033_v42 = vmul.f32 %v8321_v4, %v8321_v4 }
 0x7bf   : > { %v5064_v16 = vadd.f32 %v5063_v2, %v5062_v26  ;;  %v4965_v45 = vadd.f32 %v4964_v38, %v4963_v55  ;;  %v5069_v2 = vsel %vm299_vm0, %v5031_v23, 0.0  ;;  %v4970_v38 = vsel %vm299_vm0, %v8308_v63, 0.0  ;;  %v4401_v55 = vpop.f32.mrf.mxu3 }
 0x7c0   : > { %v8341_v26 = vadd.f32 %v8226_v12, %v8180_v30  ;;  %v5071_v7 = vsel %vm299_vm0, %v5032_v27, 0.0  ;;  %v4972_v25 = vsel %vm299_vm0, %v8321_v4, 0.0  ;;  %v5034_v11 = vmul.f32 %v8330_v18, %v8330_v18 }
 0x7c1   : > { %v5066_v41 = vadd.f32 %v5065_v47, %v5064_v16  ;;  %v4967_v39 = vadd.f32 %v4966_v1, %v4965_v45  ;;  %v8350_v47 = vadd.f32 %v8226_v12, %v8183_v33  ;;  %v4440_v1 = vadd.f32 %v8205_v62, %v4206_v49  ;;  %v8357_v45 = vpop.f32.mrf.mxu0 }
 0x7c2   : > { %v4207_v30 = vadd.f32 %v8212_v46, %v8104_v5  ;;  %v4974_v27 = vsel %vm299_vm0, %v8330_v18, 0.0  ;;  %v5035_v33 = vmul.f32 %v8341_v26, %v8341_v26  ;;  %v8366_v62 = vadd.f32 %v8226_v12, %v8188_v3 }
 0x7c3   : > { %v8267_v53 = vpop.f32.mrf.mxu1  ;;  %v5068_v37 = vadd.f32 %v5067_v22, %v5066_v41  ;;  %v4969_v9 = vadd.f32 %v4968_v15, %v4967_v39  ;;  %v5073_v15 = vsel %vm299_vm0, %v5033_v42, 0.0  ;;  %v4208_v5 = vadd.f32 %v8221_v17, %v8110_v52 }
 0x7c4   : > { %v8310_v31 = vpop.f32.mrf.mxu2  ;;  %v4209_v46 = vadd.f32 %v8253_v48, %v8113_v56  ;;  %v5075_v39 = vsel %vm299_vm0, %v5034_v11, 0.0  ;;  %v8379_v3 = vadd.f32 %v8226_v12, %v8191_v43  ;;  %v4441_v52 = vadd.f32 %v8214_v59, %v4207_v30 }
 0x7c5   : > { %v5070_v23 = vadd.f32 %v5069_v2, %v5068_v37  ;;  %v4971_v22 = vadd.f32 %v4970_v38, %v4969_v9  ;;  %v4976_v2 = vsel %vm299_vm0, %v8341_v26, 0.0  ;;  %v5036_v38 = vmul.f32 %v8350_v47, %v8350_v47 }
 0x7c6   : > { %v4674_v56 = vadd.f32 %v8207_v35, %v4440_v1  ;;  %v5077_v48 = vsel %vm299_vm0, %v5035_v33, 0.0  ;;  %v5037_v37 = vmul.f32 %v8366_v62, %v8366_v62  ;;  %v4442_v43 = vadd.f32 %v8235_v10, %v4208_v5 }
 0x7c7   : > { %v5072_v49 = vadd.f32 %v5071_v7, %v5070_v23  ;;  %v4973_v41 = vadd.f32 %v4972_v25, %v4971_v22  ;;  %v4978_v7 = vsel %vm299_vm0, %v8350_v47, 0.0  ;;  %v8390_v25 = vadd.f32 %v8226_v12, %v8195_v0  ;;  %v4404_v10 = vpop.f32.mrf.mxu3 }
 0x7c8   : > { %v4443_v59 = vadd.f32 %v8288_v61, %v4209_v46  ;;  %v5079_v35 = vsel %vm299_vm0, %v5036_v38, 0.0  ;;  %v4980_v1 = vsel %vm299_vm0, %v8366_v62, 0.0  ;;  %v5038_v23 = vmul.f32 %v8379_v3, %v8379_v3 }
 0x7c9   : > { %v5074_v17 = vadd.f32 %v5073_v15, %v5072_v49  ;;  %v4975_v42 = vadd.f32 %v4974_v27, %v4973_v41  ;;  %v8401_v22 = vadd.f32 %v8226_v12, %v8198_v28  ;;  %v4210_v0 = vadd.f32 %v8310_v31, %v8117_v19 }
 0x7ca   : > { %v4675_v27 = vadd.f32 %v8219_v51, %v4441_v52  ;;  %v5081_v5 = vsel %vm299_vm0, %v5037_v37, 0.0  ;;  %v4982_v46 = vsel %vm299_vm0, %v8379_v3, 0.0  ;;  %v5039_v49 = vmul.f32 %v8390_v25, %v8390_v25 }
 0x7cb   : > { %v8312_v8 = vpop.f32.mrf.mxu1  ;;  %v5076_v11 = vadd.f32 %v5075_v39, %v5074_v17  ;;  %v4977_v30 = vadd.f32 %v4976_v2, %v4975_v42  ;;  %v8413_v28 = vadd.f32 %v8226_v12, %v8203_v57  ;;  %v8417_v31 = vadd.f32 %v8226_v12, %v8210_v54  ;;  %v4638_v39 = vpop.f32.mrf.mxu0 }
 0x7cc   : > { %v4170_v9 = vpop.f32.mrf.mxu2  ;;  %v4676_v51 = vadd.f32 %v8245_v44, %v4442_v43  ;;  %v5083_v2 = vsel %vm299_vm0, %v5038_v23, 0.0  ;;  %v4984_v38 = vsel %vm299_vm0, %v8390_v25, 0.0  ;;  %v5040_v52 = vmul.f32 %v8401_v22, %v8401_v22 }
 0x7cd   : > { %v5078_v15 = vadd.f32 %v5077_v48, %v5076_v11  ;;  %v4979_v61 = vadd.f32 %v4978_v7, %v4977_v30  ;;  %v4677_v57 = vadd.f32 %v8299_v13, %v4443_v59  ;;  %v4444_v17 = vadd.f32 %v4401_v55, %v4210_v0 }
 0x7ce   : > { %v4908_v54 = vadd.f32 %v8267_v53, %v4674_v56  ;;  %v5085_v37 = vsel %vm299_vm0, %v5039_v49, 0.0  ;;  %v4986_v44 = vsel %vm299_vm0, %v8401_v22, 0.0  ;;  %v5041_v43 = vmul.f32 %v8413_v28, %v8413_v28 }
 0x7cf   : > { %v5080_v41 = vadd.f32 %v5079_v35, %v5078_v15  ;;  %v4981_v19 = vadd.f32 %v4980_v1, %v4979_v61  ;;  %v8434_v11 = vadd.f32 %v8226_v12, %v8217_v21  ;;  %v4211_v13 = vadd.f32 %v4170_v9, %v8120_v36 }
 0x7d0   : > { %v5042_v30 = vmul.f32 %v8417_v31, %v8417_v31  ;;  %v5087_v53 = vsel %vm299_vm0, %v5040_v52, 0.0  ;;  %v4988_v56 = vsel %vm299_vm0, %v8413_v28, 0.0  ;;  %v8444_v35 = vadd.f32 %v8226_v12, %v8233_v50 }
 0x7d1   : > { %v5082_v48 = vadd.f32 %v5081_v5, %v5080_v41  ;;  %v4983_v7 = vadd.f32 %v4982_v46, %v4981_v19  ;;  %v4909_v1 = vadd.f32 %v8312_v8, %v4675_v27  ;;  %v8448_v36 = vadd.f32 %v8226_v12, %v4908_v54  ;;  %v4406_v8 = vpop.f32.mrf.mxu3 }
 0x7d2   : > { %v4678_v9 = vadd.f32 %v8357_v45, %v4444_v17  ;;  %v5089_v15 = vsel %vm299_vm0, %v5041_v43, 0.0  ;;  %v4990_v61 = vsel %vm299_vm0, %v8417_v31, 0.0  ;;  %v5043_v5 = vmul.f32 %v8434_v11, %v8434_v11 }
 0x7d3   : > { %v8355_v16 = vpop.f32.mrf.mxu1  ;;  %v5084_v55 = vadd.f32 %v5083_v2, %v5082_v48  ;;  %v4985_v59 = vadd.f32 %v4984_v38, %v4983_v7  ;;  %v4445_v46 = vadd.f32 %v4404_v10, %v4211_v13  ;;  %v5091_v41 = vsel %vm299_vm0, %v5042_v30, 0.0  ;;  %v4640_v10 = vpop.f32.mrf.mxu0 }
 0x7d4   : > { %v4172_v42 = vpop.f32.mrf.mxu2  ;;  %v4910_v50 = vadd.f32 %v8355_v16, %v4676_v51  ;;  %v4992_v45 = vsel %vm299_vm0, %v8434_v11, 0.0  ;;  %v5044_v19 = vmul.f32 %v8444_v35, %v8444_v35  ;;  %v8463_v2 = vadd.f32 %v8226_v12, %v4909_v1 }
 0x7d5   : > { %v5086_v21 = vadd.f32 %v5085_v37, %v5084_v55  ;;  %v4987_v23 = vadd.f32 %v4986_v44, %v4985_v59  ;;  %v5045_v16 = vmul.f32 %v8448_v36, %v8448_v36  ;;  %v5093_v51 = vsel %vm299_vm0, %v5043_v5, 0.0 }
 0x7d6   : > { %v4994_v48 = vsel %vm299_vm0, %v8444_v35, 0.0  ;;  %v8471_v7 = vadd.f32 %v8226_v12, %v4910_v50  ;;  %v4212_v37 = vadd.f32 %v4172_v42, %v8124_v20  ;;  %v5095_v13 = vsel %vm299_vm0, %v5044_v19, 0.0 }
 0x7d7   : > { %v5088_v27 = vadd.f32 %v5087_v53, %v5086_v21  ;;  %v4989_v49 = vadd.f32 %v4988_v56, %v4987_v23  ;;  %v4996_v55 = vsel %vm299_vm0, %v8448_v36, 0.0  ;;  %v5046_v59 = vmul.f32 %v8463_v2, %v8463_v2 }
 0x7d8   : > { %v5097_v1 = vsel %vm299_vm0, %v5045_v16, 0.0  ;;  %v4998_v42 = vsel %vm299_vm0, %v8463_v2, 0.0  ;;  %v5000_v5 = vsel %vm299_vm0, %v8471_v7, 0.0 }
 0x7d9   : > { %v5090_v52 = vadd.f32 %v5089_v15, %v5088_v27  ;;  %v4991_v17 = vadd.f32 %v4990_v61, %v4989_v49  ;;  %v5099_v61 = vsel %vm299_vm0, %v5046_v59, 0.0  ;;  %v4409_v27 = vpop.f32.mrf.mxu3 }
 0x7db   : > { %v4867_v33 = vpop.f32.mrf.mxu1  ;;  %v5092_v43 = vadd.f32 %v5091_v41, %v5090_v52  ;;  %v4643_v16 = vpop.f32.mrf.mxu0 }
 0x7dc   : > { %v4911_v38 = vadd.f32 %v4867_v33, %v4677_v57  ;;  %v4175_v44 = vpop.f32.mrf.mxu2  ;;  %v4993_v33 = vadd.f32 %v4992_v45, %v4991_v17  ;;  %v4679_v57 = vadd.f32 %v4638_v39, %v4445_v46  ;;  %v5047_v39 = vmul.f32 %v8471_v7, %v8471_v7 }
 0x7dd   : > { %v5094_v53 = vadd.f32 %v5093_v51, %v5092_v43  ;;  %v4213_v51 = vadd.f32 %v4175_v44, %v8127_v24 }
 0x7de   : > { %v8480_v30 = vadd.f32 %v8226_v12, %v4911_v38  ;;  %v4995_v56 = vadd.f32 %v4994_v48, %v4993_v33  ;;  %v5101_v45 = vsel %vm299_vm0, %v5047_v39, 0.0 }
 0x7df   : > { %v4447_v44 = vadd.f32 %v4409_v27, %v4213_v51 }
 0x7e0   : > { %v4997_v15 = vadd.f32 %v4996_v55, %v4995_v56  ;;  %v5048_v50 = vmul.f32 %v8480_v30, %v8480_v30 }
 0x7e2   : > { %v4999_v41 = vadd.f32 %v4998_v42, %v4997_v15  ;;  %v5103_v48 = vsel %vm299_vm0, %v5048_v50, 0.0  ;;  %v4681_v50 = vadd.f32 %v4643_v16, %v4447_v44 }
 0x7e3   : > { %v4869_v0 = vpop.f32.mrf.mxu1 }
 0x7e4   : > { %v4912_v54 = vadd.f32 %v4869_v0, %v4678_v9  ;;  %v4446_v9 = vadd.f32 %v4406_v8, %v4212_v37  ;;  %v5096_v0 = vadd.f32 %v5095_v13, %v5094_v53  ;;  %v5002_v8 = vsel %vm299_vm0, %v8480_v30, 0.0  ;;  %v4177_v43 = vpop.f32.mrf.mxu2 }
 0x7e5   : > { %v5001_v52 = vadd.f32 %v5000_v5, %v4999_v41 }
 0x7e6   : > { %v8488_v21 = vadd.f32 %v8226_v12, %v4912_v54  ;;  %v5098_v49 = vadd.f32 %v5097_v1, %v5096_v0  ;;  %v4680_v17 = vadd.f32 %v4640_v10, %v4446_v9  ;;  %v4411_v9 = vpop.f32.mrf.mxu3 }
 0x7e8   : > { %v5049_v19 = vmul.f32 %v8488_v21, %v8488_v21  ;;  %v5100_v38 = vadd.f32 %v5099_v61, %v5098_v49  ;;  %v5004_v54 = vsel %vm299_vm0, %v8488_v21, 0.0  ;;  %v4214_v61 = vadd.f32 %v4177_v43, %v8131_v34 }
 0x7ea   : > { %v5102_v33 = vadd.f32 %v5101_v45, %v5100_v38  ;;  %v5105_v55 = vsel %vm299_vm0, %v5049_v19, 0.0  ;;  %v4645_v45 = vpop.f32.mrf.mxu0  ;;  %v4448_v19 = vadd.f32 %v4411_v9, %v4214_v61 }
 0x7eb   : > { %v4872_v20 = vpop.f32.mrf.mxu1 }
 0x7ec   : > { %v4913_v23 = vadd.f32 %v4872_v20, %v4679_v57  ;;  %v5003_v57 = vadd.f32 %v5002_v8, %v5001_v52  ;;  %v5104_v53 = vadd.f32 %v5103_v48, %v5102_v33  ;;  %v4180_v8 = vpop.f32.mrf.mxu2  ;;  %v4682_v48 = vadd.f32 %v4645_v45, %v4448_v19 }
 0x7ed   : > { %v4215_v34 = vadd.f32 %v4180_v8, %v8134_v6 }
 0x7ee   : > { %v8496_v46 = vadd.f32 %v8226_v12, %v4913_v23  ;;  %v5005_v24 = vadd.f32 %v5004_v54, %v5003_v57  ;;  %v5106_v20 = vadd.f32 %v5105_v55, %v5104_v53  ;;  %v4414_v54 = vpop.f32.mrf.mxu3 }
 0x7ef   : > { %v4449_v57 = vadd.f32 %v4414_v54, %v4215_v34 }
 0x7f0   : > { %v5050_v37 = vmul.f32 %v8496_v46, %v8496_v46  ;;  %v5006_v10 = vsel %vm299_vm0, %v8496_v46, 0.0 }
 0x7f1   : > { %v5007_v42 = vadd.f32 %v5006_v10, %v5005_v24 }
 0x7f2   : > { %v5107_v56 = vsel %vm299_vm0, %v5050_v37, 0.0  ;;  %v4648_v55 = vpop.f32.mrf.mxu0 }
 0x7f3   : > { %v4874_v13 = vpop.f32.mrf.mxu1  ;;  %v5108_v0 = vadd.f32 %v5107_v56, %v5106_v20  ;;  %v4683_v56 = vadd.f32 %v4648_v55, %v4449_v57 }
 0x7f4   : > { %v4914_v59 = vadd.f32 %v4874_v13, %v4680_v17  ;;  %v4182_v10 = vpop.f32.mrf.mxu2 }
 0x7f5   : > { %v4216_v24 = vadd.f32 %v4182_v10, %v8138_v60 }
 0x7f6   : > { %v8514_v1 = vadd.f32 %v8226_v12, %v4914_v59 }
 0x7f8   : > { %v5008_v39 = vsel %vm299_vm0, %v8514_v1, 0.0  ;;  %v5051_v23 = vmul.f32 %v8514_v1, %v8514_v1 }
 0x7f9   : > { %v5009_v15 = vadd.f32 %v5008_v39, %v5007_v42 }
 0x7fa   : > { %v5109_v5 = vsel %vm299_vm0, %v5051_v23, 0.0  ;;  %v4416_v23 = vpop.f32.mrf.mxu3 }
 0x7fb   : > { %v5110_v27 = vadd.f32 %v5109_v5, %v5108_v0  ;;  %v4877_v49 = vpop.f32.mrf.mxu1  ;;  %v4450_v9 = vadd.f32 %v4416_v23, %v4216_v24  ;;  %v4650_v5 = vpop.f32.mrf.mxu0 }
 0x7fc   : > { %v4915_v41 = vadd.f32 %v4877_v49, %v4681_v50 }
 0x7fe   : > { %v8523_v38 = vadd.f32 %v8226_v12, %v4915_v41 }
 0x800   : > { %v5010_v52 = vsel %vm299_vm0, %v8523_v38, 0.0  ;;  %v5052_v17 = vmul.f32 %v8523_v38, %v8523_v38 }
 0x801   : > { %v5011_v51 = vadd.f32 %v5010_v52, %v5009_v15 }
 0x802   : > { %v5111_v16 = vsel %vm299_vm0, %v5052_v17, 0.0 }
 0x803   : > { %v5112_v37 = vadd.f32 %v5111_v16, %v5110_v27  ;;  %v4879_v43 = vpop.f32.mrf.mxu1  ;;  %v4684_v27 = vadd.f32 %v4650_v5, %v4450_v9 }
 0x804   : > { %v4916_v33 = vadd.f32 %v4879_v43, %v4682_v48 }
 0x806   : > { %v8532_v13 = vadd.f32 %v8226_v12, %v4916_v33 }
 0x808   : > { %v5012_v59 = vsel %vm299_vm0, %v8532_v13, 0.0  ;;  %v5053_v53 = vmul.f32 %v8532_v13, %v8532_v13 }
 0x809   : > { %v5013_v6 = vadd.f32 %v5012_v59, %v5011_v51 }
 0x80a   : > { %v5113_v44 = vsel %vm299_vm0, %v5053_v53, 0.0 }
 0x80b   : > { %v5114_v20 = vadd.f32 %v5113_v44, %v5112_v37  ;;  %v4882_v42 = vpop.f32.mrf.mxu1 }
 0x80c   : > { %v4917_v39 = vadd.f32 %v4882_v42, %v4683_v56 }
 0x80e   : > { %v8541_v0 = vadd.f32 %v8226_v12, %v4917_v39 }
 0x810   : > { %v5014_v15 = vsel %vm299_vm0, %v8541_v0, 0.0  ;;  %v5054_v61 = vmul.f32 %v8541_v0, %v8541_v0 }
 0x811   : > { %v5015_v50 = vadd.f32 %v5014_v15, %v5013_v6 }
 0x812   : > { %v5115_v60 = vsel %vm299_vm0, %v5054_v61, 0.0 }
 0x813   : > { %v5116_v49 = vadd.f32 %v5115_v60, %v5114_v20  ;;  %v4884_v41 = vpop.f32.mrf.mxu1 }
 0x814   : > { %v4918_v45 = vadd.f32 %v4884_v41, %v4684_v27 }
 0x816   : > { %v8549_v8 = vadd.f32 %v8226_v12, %v4918_v45 }
 0x818   : > { %v5016_v19 = vsel %vm299_vm0, %v8549_v8, 0.0  ;;  %v5055_v52 = vmul.f32 %v8549_v8, %v8549_v8 }
 0x819   : > { %v5017_v17 = vadd.f32 %v5016_v19, %v5015_v50 }
 0x81a   : > { %v5117_v51 = vsel %vm299_vm0, %v5055_v52, 0.0 }
 0x81b   : > { %v5018_v34 = vrot.slane %v5017_v17, 4  ;;  %v5118_v16 = vadd.f32 %v5117_v51, %v5116_v49 }
 0x81d   : > { %v5019_v48 = vadd.f32 %v5018_v34, %v5017_v17  ;;  %v5119_v54 = vrot.slane %v5118_v16, 4 }
 0x81f   : > { %v5020_v37 = vrot.slane %v5019_v48, 2  ;;  %v5120_v43 = vadd.f32 %v5119_v54, %v5118_v16 }
 0x821   : > { %v5021_v33 = vadd.f32 %v5020_v37, %v5019_v48  ;;  %v5121_v57 = vrot.slane %v5120_v43, 2 }
 0x823   : > { %v5022_v55 = vrot.slane %v5021_v33, 1  ;;  %v5122_v12 = vadd.f32 %v5121_v57, %v5120_v43 }
 0x825   : > { %v5023_v10 = vadd.f32 %v5022_v55, %v5021_v33  ;;  %v5123_v59 = vrot.slane %v5122_v12, 1 }
 0x827   : > { %v5124_v53 = vadd.f32 %v5123_v59, %v5122_v12  ;;  %v8556_v6 = vmul.f32 0.00390625, %v5023_v10  ;;  %v8911_v12 = vld [vmem:[#allocation14_spill] sm:$0xff] }
 0x829   : > { %v5126_v24 = vmul.f32 0.00390625, %v5124_v53  ;;  %v5127_v44 = vmul.f32 %v8556_v6, %v8556_v6  ;;  %v5161_v56 = vsub.f32 %v8549_v8, %v8556_v6  ;;  %v5156_v42 = vsub.f32 %v8496_v46, %v8556_v6  ;;  %v8913_v53 = vld [vmem:[#allocation54_spill] sm:$0xff]  ;;  %v8924_v8 = vld [vmem:[#allocation24_spill] sm:$0xff] }
 0x82a   : > { %v5157_v39 = vsub.f32 %v8514_v1, %v8556_v6  ;;  %v5158_v23 = vsub.f32 %v8523_v38, %v8556_v6  ;;  %v5159_v15 = vsub.f32 %v8532_v13, %v8556_v6  ;;  %v5160_v61 = vsub.f32 %v8541_v0, %v8556_v6  ;;  %v8922_v0 = vld [vmem:[#allocation22_spill] sm:$0xff] }
 0x82b   : > { %v5128_v20 = vsub.f32 %v5126_v24, %v5127_v44  ;;  %v5147_v45 = vsub.f32 %v8413_v28, %v8556_v6  ;;  %v5148_v52 = vsub.f32 %v8417_v31, %v8556_v6  ;;  %v5149_v17 = vsub.f32 %v8434_v11, %v8556_v6  ;;  %v8914_v44 = vld [vmem:[#allocation55_spill] sm:$0xff] }
 0x82c   : > { %v5150_v51 = vsub.f32 %v8444_v35, %v8556_v6  ;;  %v5146_v34 = vsub.f32 %v8401_v22, %v8556_v6  ;;  %v5130_v16 = vsub.f32 %v8239_v40, %v8556_v6  ;;  %v5131_v28 = vsub.f32 %v8230_v14, %v8556_v6 }
 0x82d   : > { %v5129_v9 = vmax.f32 %v5128_v20, 0.0  ;;  %v5151_v31 = vsub.f32 %v8448_v36, %v8556_v6  ;;  %v5132_v11 = vsub.f32 %v8243_v29, %v8556_v6  ;;  %v5133_v54 = vsub.f32 %v8251_v58, %v8556_v6  ;;  %v8912_v36 = vld [vmem:[#allocation3_spill] sm:$0xff] }
 0x82e   : > { %v5152_v14 = vsub.f32 %v8463_v2, %v8556_v6  ;;  %v5134_v29 = vsub.f32 %v8263_v32, %v8556_v6  ;;  %v5153_v58 = vsub.f32 %v8471_v7, %v8556_v6  ;;  %v5135_v24 = vsub.f32 %v8913_v53, %v8556_v6  ;;  %v8927_v53 = vld [vmem:[#allocation9_spill] sm:$0xff] }
 0x82f   : > { %v5162_v5 = vadd.f32 1e-05, %v5129_v9  ;;  %v5136_v20 = vsub.f32 %v8914_v44, %v8556_v6  ;;  %v8915_v9 = vld [vmem:[#allocation57_spill] sm:$0xff]  ;;  %v5154_v7 = vsub.f32 %v8480_v30, %v8556_v6  ;;  %v5144_v46 = vsub.f32 %v8379_v3, %v8556_v6  ;;  %v8929_v44 = vld [vmem:[#allocation10_spill] sm:$0xff] }
 0x831   : > { %5926 = vrsqrt.f32 %v5162_v5  ;;  %vm5169_vm6 = vweird.f32 %v5162_v5 }
 0x837   : > { %v5927_v50 = vpop.eup %5926 }
 0x838   : > { %v5164_v60 = vmul.f32 %v5927_v50, %v5162_v5  ;;  %vm5170_vm5 = vweird.f32 %v5927_v50  ;;  %v5137_v5 = vsub.f32 %v8915_v9, %v8556_v6  ;;  %v8930_v9 = vld [vmem:[#allocation27_spill] sm:$0xff] }
 0x839   : > { %vm5171_vm7 = vmor %vm5169_vm6, %vm5170_vm5 }
 0x83a   : > { %v5165_v27 = vmul.f32 %v5927_v50, %v5164_v60 }
 0x83c   : > { %v5166_v49 = vmul.f32 0.5, %v5165_v27 }
 0x83e   : > { %v5167_v41 = vsub.f32 1.5, %v5166_v49 }
 0x840   : > { %v5168_v19 = vmul.f32 %v5927_v50, %v5167_v41 }
 0x842   : > { %v5172_v48 = vsel %vm5171_vm7, %v5927_v50, %v5168_v19 }
 0x843   : > { %v5189_v35 = vmul.f32 %v5172_v48, %v5146_v34  ;;  %v5173_v37 = vmul.f32 %v5172_v48, %v5130_v16  ;;  %v5190_v43 = vmul.f32 %v5172_v48, %v5147_v45  ;;  %v5174_v22 = vmul.f32 %v5172_v48, %v5131_v28 }
 0x844   : > { %v5191_v33 = vmul.f32 %v5172_v48, %v5148_v52  ;;  %v5175_v57 = vmul.f32 %v5172_v48, %v5132_v11  ;;  %v5192_v40 = vmul.f32 %v5172_v48, %v5149_v17  ;;  %v5176_v55 = vmul.f32 %v5172_v48, %v5133_v54 }
 0x845   : > { %v5221_v10 = vadd.f32 %v5189_v35, %v8911_v12  ;;  %v5205_v59 = vadd.f32 %v5173_v37, %v8912_v36  ;;  %v5193_v2 = vmul.f32 %v5172_v48, %v5150_v51  ;;  %v5177_v50 = vmul.f32 %v5172_v48, %v5134_v29  ;;  %v8917_v35 = vld [vmem:[#allocation4_spill] sm:$0xff]  ;;  %v8923_v29 = vld [vmem:[#allocation7_spill] sm:$0xff] }
 0x846   : > { %v5194_v60 = vmul.f32 %v5172_v48, %v5151_v31  ;;  %v5178_v27 = vmul.f32 %v5172_v48, %v5135_v24  ;;  %v5195_v49 = vmul.f32 %v5172_v48, %v5152_v14  ;;  %v5179_v32 = vmul.f32 %v5172_v48, %v5136_v20 }
 0x847   : > { %5269 = vxpose.xlu0.b32.start [1/16] (narrow) %v5221_v10, 32  ;;  %5237 = vxpose.xlu2.b32.start [1/16] (narrow) %v5205_v59, 32  ;;  %v5196_v41 = vmul.f32 %v5172_v48, %v5153_v58  ;;  %v5155_v45 = vsub.f32 %v8488_v21, %v8556_v6  ;;  %v5180_v19 = vmul.f32 %v5172_v48, %v5137_v5  ;;  %v8919_v10 = vld [vmem:[#allocation5_spill] sm:$0xff] }
 0x848   : > { %v5138_v52 = vsub.f32 %v8308_v63, %v8556_v6  ;;  %v5139_v17 = vsub.f32 %v8321_v4, %v8556_v6  ;;  %v5140_v51 = vsub.f32 %v8330_v18, %v8556_v6  ;;  %v5197_v34 = vmul.f32 %v5172_v48, %v5154_v7  ;;  %v8916_v4 = vld [vmem:[#allocation16_spill] sm:$0xff] }
 0x849   : > { %v5198_v28 = vmul.f32 %v5172_v48, %v5155_v45  ;;  %v5141_v31 = vsub.f32 %v8341_v26, %v8556_v6  ;;  %v5199_v21 = vmul.f32 %v5172_v48, %v5156_v42  ;;  %v5200_v63 = vmul.f32 %v5172_v48, %v5157_v39  ;;  %v8933_v7 = vld [vmem:[#allocation12_spill] sm:$0xff] }
 0x84a   : > { %v5181_v16 = vmul.f32 %v5172_v48, %v5138_v52  ;;  %v5182_v30 = vmul.f32 %v5172_v48, %v5139_v17  ;;  %v5183_v11 = vmul.f32 %v5172_v48, %v5140_v51  ;;  %v5222_v54 = vadd.f32 %v5190_v43, %v8916_v4  ;;  %v8935_v52 = vld [vmem:[#allocation13_spill] sm:$0xff]  ;;  %v8937_v51 = vld [vmem:[#allocation15_spill] sm:$0xff] }
 0x84b   : > { %v5206_v18 = vadd.f32 %v5174_v22, %v8917_v35  ;;  %v5184_v37 = vmul.f32 %v5172_v48, %v5141_v31  ;;  %v5142_v14 = vsub.f32 %v8350_v47, %v8556_v6  ;;  %v5143_v26 = vsub.f32 %v8366_v62, %v8556_v6  ;;  %v8939_v4 = vld [vmem:[#allocation17_spill] sm:$0xff] }
 0x84c   : > { %v5201_v1 = vmul.f32 %v5172_v48, %v5158_v23  ;;  %v5145_v39 = vsub.f32 %v8390_v25, %v8556_v6  ;;  %v5202_v47 = vmul.f32 %v5172_v48, %v5159_v15  ;;  %v5203_v62 = vmul.f32 %v5172_v48, %v5160_v61  ;;  %v8918_v23 = vld [vmem:[#allocation18_spill] sm:$0xff]  ;;  %v8920_v25 = vld [vmem:[#allocation20_spill] sm:$0xff] }
 0x84d   : > { %v5185_v42 = vmul.f32 %v5172_v48, %v5142_v14  ;;  %v5186_v43 = vmul.f32 %v5172_v48, %v5143_v26  ;;  %v5187_v3 = vmul.f32 %v5172_v48, %v5144_v46  ;;  %v5204_v22 = vmul.f32 %v5172_v48, %v5161_v56  ;;  %v8921_v15 = vld [vmem:[#allocation6_spill] sm:$0xff]  ;;  %v8925_v56 = vld [vmem:[#allocation8_spill] sm:$0xff]  ;;  %v8945_v46 = vld [vmem:[#allocation23_spill] sm:$0xff] }
 0x84e   : > { %v5188_v38 = vmul.f32 %v5172_v48, %v5145_v39  ;;  %v5223_v12 = vadd.f32 %v5191_v33, %v8918_v23  ;;  %v5207_v36 = vadd.f32 %v5175_v57, %v8919_v10  ;;  %v5224_v13 = vadd.f32 %v5192_v40, %v8920_v25  ;;  %v8926_v33 = vld [vmem:[#allocation25_spill] sm:$0xff] }
 0x84f   : > { %5270 = vxpose.xlu0.b32.cont [2/16] (narrow) %v5222_v54, 32  ;;  %5238 = vxpose.xlu2.b32.cont [2/16] (narrow) %v5206_v18, 32  ;;  %v5208_v59 = vadd.f32 %v5176_v55, %v8921_v15  ;;  %v5225_v61 = vadd.f32 %v5193_v2, %v8922_v0  ;;  %v5209_v58 = vadd.f32 %v5177_v50, %v8923_v29  ;;  %v8928_v55 = vld [vmem:[#allocation26_spill] sm:$0xff]  ;;  %v8931_v2 = vld [vmem:[#allocation11_spill] sm:$0xff] }
 0x850   : > { %v5226_v6 = vadd.f32 %v5194_v60, %v8924_v8  ;;  %v5210_v48 = vadd.f32 %v5178_v27, %v8925_v56  ;;  %v5227_v57 = vadd.f32 %v5195_v49, %v8926_v33  ;;  %v5211_v40 = vadd.f32 %v5179_v32, %v8927_v53  ;;  %v8932_v60 = vld [vmem:[#allocation28_spill] sm:$0xff]  ;;  %v8934_v32 = vld [vmem:[#allocation29_spill] sm:$0xff] }
 0x851   : > { %v5228_v24 = vadd.f32 %v5196_v41, %v8928_v55  ;;  %v5212_v20 = vadd.f32 %v5180_v19, %v8929_v44  ;;  %v5229_v5 = vadd.f32 %v5197_v34, %v8930_v9  ;;  %v5213_v50 = vadd.f32 %v5181_v16, %v8931_v2  ;;  %v8936_v19 = vld [vmem:[#allocation30_spill] sm:$0xff]  ;;  %v8938_v16 = vld [vmem:[#allocation31_spill] sm:$0xff] }
 0x852   : > { %v5230_v27 = vadd.f32 %v5198_v28, %v8932_v60  ;;  %v5214_v49 = vadd.f32 %v5182_v30, %v8933_v7  ;;  %v5231_v45 = vadd.f32 %v5199_v21, %v8934_v32  ;;  %v5215_v41 = vadd.f32 %v5183_v11, %v8935_v52  ;;  %v8940_v30 = vld [vmem:[#allocation32_spill] sm:$0xff]  ;;  %v8941_v21 = vld [vmem:[#allocation19_spill] sm:$0xff] }
 0x853   : > { %v5232_v17 = vadd.f32 %v5200_v63, %v8936_v19  ;;  %v5216_v34 = vadd.f32 %v5184_v37, %v8937_v51  ;;  %v5233_v31 = vadd.f32 %v5201_v1, %v8938_v16  ;;  %v5217_v28 = vadd.f32 %v5185_v42, %v8939_v4  ;;  %v8942_v11 = vld [vmem:[#allocation43_spill] sm:$0xff]  ;;  %v8943_v63 = vld [vmem:[#allocation21_spill] sm:$0xff] }
 0x854   : > { %v5234_v54 = vadd.f32 %v5202_v47, %v8940_v30  ;;  %v5218_v35 = vadd.f32 %v5186_v43, %v8941_v21  ;;  %v5235_v18 = vadd.f32 %v5203_v62, %v8942_v11  ;;  %v5219_v14 = vadd.f32 %v5187_v3, %v8943_v63  ;;  %v8944_v37 = vld [vmem:[#allocation47_spill] sm:$0xff] }
 0x855   : > { %v5236_v26 = vadd.f32 %v5204_v22, %v8944_v37  ;;  %v5220_v1 = vadd.f32 %v5188_v38, %v8945_v46 }
 0x857   : > { %5271 = vxpose.xlu0.b32.cont [3/16] (narrow) %v5223_v12, 32  ;;  %5239 = vxpose.xlu2.b32.cont [3/16] (narrow) %v5207_v36, 32 }
 0x85f   : > { %5272 = vxpose.xlu0.b32.cont [4/16] (narrow) %v5224_v13, 32  ;;  %5240 = vxpose.xlu2.b32.cont [4/16] (narrow) %v5208_v59, 32 }
 0x867   : > { %5273 = vxpose.xlu0.b32.cont [5/16] (narrow) %v5225_v61, 32  ;;  %5241 = vxpose.xlu2.b32.cont [5/16] (narrow) %v5209_v58, 32 }
 0x86f   : > { %5274 = vxpose.xlu0.b32.cont [6/16] (narrow) %v5226_v6, 32  ;;  %5242 = vxpose.xlu2.b32.cont [6/16] (narrow) %v5210_v48, 32 }
 0x877   : > { %5275 = vxpose.xlu0.b32.cont [7/16] (narrow) %v5227_v57, 32  ;;  %5243 = vxpose.xlu2.b32.cont [7/16] (narrow) %v5211_v40, 32 }
 0x87f   : > { %5276 = vxpose.xlu0.b32.cont [8/16] (narrow) %v5228_v24, 32  ;;  %5244 = vxpose.xlu2.b32.cont [8/16] (narrow) %v5212_v20, 32 }
 0x887   : > { %5277 = vxpose.xlu0.b32.cont [9/16] (narrow) %v5229_v5, 32  ;;  %5245 = vxpose.xlu2.b32.cont [9/16] (narrow) %v5213_v50, 32 }
 0x88f   : > { %5278 = vxpose.xlu0.b32.cont [10/16] (narrow) %v5230_v27, 32  ;;  %5246 = vxpose.xlu2.b32.cont [10/16] (narrow) %v5214_v49, 32 }
 0x897   : > { %5279 = vxpose.xlu0.b32.cont [11/16] (narrow) %v5231_v45, 32  ;;  %5247 = vxpose.xlu2.b32.cont [11/16] (narrow) %v5215_v41, 32 }
 0x89f   : > { %5280 = vxpose.xlu0.b32.cont [12/16] (narrow) %v5232_v17, 32  ;;  %5248 = vxpose.xlu2.b32.cont [12/16] (narrow) %v5216_v34, 32 }
 0x8a7   : > { %5281 = vxpose.xlu0.b32.cont [13/16] (narrow) %v5233_v31, 32  ;;  %5249 = vxpose.xlu2.b32.cont [13/16] (narrow) %v5217_v28, 32 }
 0x8af   : > { %5282 = vxpose.xlu0.b32.cont [14/16] (narrow) %v5234_v54, 32  ;;  %5250 = vxpose.xlu2.b32.cont [14/16] (narrow) %v5218_v35, 32 }
 0x8b7   : > { %5283 = vxpose.xlu0.b32.cont [15/16] (narrow) %v5235_v18, 32  ;;  %5251 = vxpose.xlu2.b32.cont [15/16] (narrow) %v5219_v14, 32 }
 0x8bf   : > { %5284 = vxpose.xlu0.b32.end [16/16] (narrow) %v5236_v26, 32  ;;  %5252 = vxpose.xlu2.b32.end [16/16] (narrow) %v5220_v1, 32 }
 0x8e0   : > { %v5253_v42 = vpop.trf.xlu2 }
 0x8e1   : > { %5301 = vst [vmem:[%s224_s11] sm:$0xff] %v5253_v42 }
 0x8e8   : > { %v5254_v39 = vpop.trf.xlu2 }
 0x8e9   : > { %5303 = vst [vmem:[%s224_s11 + $0x10] sm:$0xff] %v5254_v39 }
 0x8eb   : > { %v5285_v47 = vpop.trf.xlu0 }
 0x8ec   : > { %5302 = vst [vmem:[%s224_s11 + $0x8] sm:$0xff] %v5285_v47 }
 0x8f0   : > { %v5255_v43 = vpop.trf.xlu2 }
 0x8f1   : > { %5305 = vst [vmem:[%s224_s11 + $0x20] sm:$0xff] %v5255_v43 }
 0x8f3   : > { %v5286_v62 = vpop.trf.xlu0 }
 0x8f4   : > { %5304 = vst [vmem:[%s224_s11 + $0x18] sm:$0xff] %v5286_v62 }
 0x8f8   : > { %v5256_v3 = vpop.trf.xlu2 }
 0x8f9   : > { %5307 = vst [vmem:[%s224_s11 + $0x30] sm:$0xff] %v5256_v3 }
 0x8fb   : > { %v5287_v22 = vpop.trf.xlu0 }
 0x8fc   : > { %5306 = vst [vmem:[%s224_s11 + $0x28] sm:$0xff] %v5287_v22 }
 0x903   : > { %v5288_v38 = vpop.trf.xlu0 }
 0x904   : > { %5308 = vst [vmem:[%s224_s11 + $0x38] sm:$0xff] %v5288_v38 }
 0x905 PF: > { %s15_s18 = sadd.s32 1, %s5934_s18  }
 0x906   : > { %p12_p4 = scmp.ge.s32.totalorder %s15_s18, 4  }
 0x908   :  { %14 = sbr.rel (!%p12_p4) target bundleno = 1 (0x1), region = 89 }

</bundles_post_ra>
